<compile_context>
chip_gen: v7x
topology: tpu7x:2x2x1
jax: 0.10.0
libtpu: 0.0.40
codegen_flags: <defaults>
</compile_context>

<pallas_src>
import functools

import jax
import jax.numpy as jnp
import numpy as np
from jax.experimental import pallas as pl
from jax.experimental.pallas import tpu as pltpu


def _round_up(x, m):
    return ((x + m - 1) // m) * m


# --------------------------------------------------------------------------
# Pallas kernel: one instance-tile step of the MIL forward pass
# --------------------------------------------------------------------------
def mil_attention_mtl_kernel(
    # inputs
    h_ref,                 # (TN, L)   bf16 instance-feature tile
    w1_ref, b1_ref,        # (L, H) bf16, (1, H) f32
    w2_ref, b2_ref,        # (H, H) bf16, (1, H) f32
    wab_ref, bab_ref,      # (H, 2D) bf16, (1, 2D) f32   fused gating weights [Wa | Wb]
    wc_ref, bc_ref,        # (D, n_att) bf16, (n_att, 1) f32
    wcat_ref, bcat_ref,    # (H, Cpad) bf16, (1, Cpad) f32  fused (zero-padded) classifiers
    # outputs
    a_raw_ref,             # (n_att, TN)  pre-softmax attention scores (lane-dense)
    m_ref,                 # (n_att, H)   pooled bag features M
    logits_ref,            # (n_att, Cpad) fused per-task logits
    # scratch (online-softmax state, persistent across grid steps)
    m_sc, l_sc, acc_sc,    # (n_att,1) f32, (n_att,1) f32, (n_att,H) f32
    *,
    n_valid, attn_dim,
):
    f32 = jnp.float32
    bf16 = jnp.bfloat16
    i = pl.program_id(0)
    tn = h_ref.shape[0]

    @pl.when(i == 0)
    def _init():
        m_sc[...] = jnp.full_like(m_sc, -jnp.inf)
        l_sc[...] = jnp.zeros_like(l_sc)
        acc_sc[...] = jnp.zeros_like(acc_sc)

    # Backbone: Linear(L,H)+ReLU, Linear(H,H)+ReLU  (bf16 MXU, f32 accumulate)
    h = h_ref[...]
    h1 = jnp.maximum(
        jnp.dot(h, w1_ref[...], preferred_element_type=f32) + b1_ref[...], 0.0)
    h2 = jnp.maximum(
        jnp.dot(h1.astype(bf16), w2_ref[...], preferred_element_type=f32) + b2_ref[...], 0.0)
    h2_b = h2.astype(bf16)

    # Gated attention: single fused matmul, then split at a lane-tile boundary (D % 128 == 0).
    ab = jnp.dot(h2_b, wab_ref[...], preferred_element_type=f32) + bab_ref[...]
    a = jnp.tanh(ab[:, :attn_dim])
    b = jax.nn.sigmoid(ab[:, attn_dim:])
    gated = (a * b).astype(bf16)                               # (TN, D)

    # Attention logits produced lane-dense as (n_att, TN): contract D of Wc with gated.
    A_t = jax.lax.dot_general(
        wc_ref[...], gated,
        dimension_numbers=(((0,), (1,)), ((), ())),
        preferred_element_type=f32) + bc_ref[...]              # (n_att, TN)
    a_raw_ref[...] = A_t

    # Online softmax over the instance (lane) axis; mask padded instances to -inf.
    col = jax.lax.broadcasted_iota(jnp.int32, A_t.shape, 1) + i * tn
    A_m = jnp.where(col < n_valid, A_t, -jnp.inf)

    tile_max = jnp.max(A_m, axis=1, keepdims=True)             # (n_att, 1)
    m_new = jnp.maximum(m_sc[...], tile_max)
    alpha = jnp.exp(m_sc[...] - m_new)
    p = jnp.exp(A_m - m_new)                                   # (n_att, TN); padded cols -> 0
    l_sc[...] = alpha * l_sc[...] + jnp.sum(p, axis=1, keepdims=True)
    acc_sc[...] = alpha * acc_sc[...] + jnp.dot(
        p.astype(bf16), h2_b, preferred_element_type=f32)      # (n_att, H)
    m_sc[...] = m_new

    @pl.when(i == pl.num_programs(0) - 1)
    def _finalize():
        inv_l = pl.reciprocal(l_sc[...], approx=True)
        M = acc_sc[...] * inv_l                                # (n_att, H)
        m_ref[...] = M
        logits_ref[...] = jnp.dot(
            M.astype(bf16), wcat_ref[...], preferred_element_type=f32) + bcat_ref[...]


# --------------------------------------------------------------------------
# Wrapper
# --------------------------------------------------------------------------
@functools.partial(jax.jit, static_argnames=("tile_n",))
def mil_attention_mtl_forward(h, params, tile_n=None):
    f32 = jnp.float32
    bf16 = jnp.bfloat16

    N, L = h.shape
    H = params["w1"].shape[1]
    D = params["wa"].shape[1]
    n_att = params["wc"].shape[1]

    # ---- fuse / cast weights (bf16 MXU operands, f32 biases) ----
    w1 = params["w1"].astype(bf16)
    b1 = params["b1"].astype(f32)
    w2 = params["w2"].astype(bf16)
    b2 = params["b2"].astype(f32)
    wab = jnp.concatenate([params["wa"], params["wb"]], axis=1).astype(bf16)   # (H, 2D)
    bab = jnp.concatenate([params["ba"], params["bb"]], axis=1).astype(f32)    # (1, 2D)
    wc = params["wc"].astype(bf16)                                             # (D, n_att)
    bc = params["bc"].reshape(n_att, 1).astype(f32)                            # (n_att, 1)

    c_sizes = (params["wc1"].shape[1], params["wc2"].shape[1], params["wc3"].shape[1])
    c_tot = sum(c_sizes)
    c_pad = _round_up(c_tot, 128)          # lane-dense classifier output (unmasked stores)
    wcat = jnp.zeros((H, c_pad), f32)
    bcat = jnp.zeros((1, c_pad), f32)
    off = 0
    for wk, bk, cs in (("wc1", "bc1", c_sizes[0]),
                       ("wc2", "bc2", c_sizes[1]),
                       ("wc3", "bc3", c_sizes[2])):
        wcat = wcat.at[:, off:off + cs].set(params[wk])
        bcat = bcat.at[:, off:off + cs].set(params[bk])
        off += cs
    wcat = wcat.astype(bf16)

    # ---- tile the instance axis ----
    if tile_n is None:
        tn = min(512, _round_up(max(N, 1), 128))   # 512 fits v7x's 64 MiB comfortably
    else:
        assert tile_n % 128 == 0, "tile_n must be a multiple of 128"
        tn = tile_n
    n_pad = _round_up(N, tn)
    h_pad = jnp.pad(h.astype(bf16), ((0, n_pad - N), (0, 0)))
    grid = (n_pad // tn,)

    kernel = functools.partial(mil_attention_mtl_kernel, n_valid=N, attn_dim=D)

    def const2d(shape):
        return pl.BlockSpec(shape, lambda i: (0, 0))

    flops = (2 * n_pad * (L * H + H * H + H * 2 * D + D * n_att + n_att * H)
             + 2 * n_att * H * c_pad)
    transcendentals = n_pad * (2 * D + 2 * n_att)
    bytes_accessed = (n_pad * L * 2
                      + (L * H + H * H + H * 2 * D + D * n_att + H * c_pad) * 2
                      + (n_att * n_pad + n_att * H + n_att * c_pad) * 4)
    cost = pl.CostEstimate(flops=flops, transcendentals=transcendentals,
                           bytes_accessed=bytes_accessed)

    a_raw_pad, M, logits_full = pl.pallas_call(
        kernel,
        out_shape=(
            jax.ShapeDtypeStruct((n_att, n_pad), jnp.float32),   # A_raw (lane-dense)
            jax.ShapeDtypeStruct((n_att, H), jnp.float32),       # pooled features M
            jax.ShapeDtypeStruct((n_att, c_pad), jnp.float32),   # fused logits
        ),
        grid=grid,
        in_specs=[
            pl.BlockSpec((tn, L), lambda i: (i, 0)),   # streamed h tile
            const2d((L, H)), const2d((1, H)),
            const2d((H, H)), const2d((1, H)),
            const2d((H, 2 * D)), const2d((1, 2 * D)),
            const2d((D, n_att)), const2d((n_att, 1)),
            const2d((H, c_pad)), const2d((1, c_pad)),
        ],
        out_specs=(
            pl.BlockSpec((n_att, tn), lambda i: (0, i)),
            pl.BlockSpec((n_att, H), lambda i: (0, 0)),
            pl.BlockSpec((n_att, c_pad), lambda i: (0, 0)),
        ),
        scratch_shapes=[
            pltpu.VMEM((n_att, 1), jnp.float32),   # running max
            pltpu.VMEM((n_att, 1), jnp.float32),   # running sum
            pltpu.VMEM((n_att, H), jnp.float32),   # unnormalized pooled features
        ],
        compiler_params=pltpu.CompilerParams(
            dimension_semantics=("arbitrary",),
            vmem_limit_bytes=32 * 1024 * 1024,     # valid on v5e/v6e/v7x (v7x has 64 MiB)
        ),
        cost_estimate=cost,
    )(h_pad, w1, b1, w2, b2, wab, bab, wc, bc, wcat, bcat)
    # TODO(synk): on v7x a leading size-2 "parallel" grid axis (per-TC partial online-softmax
    # state + a tiny combine) would use both TensorCores for very large bags.

    # ---- post-processing glue (matches the PyTorch forward) ----
    A_raw = a_raw_pad[:, :N]                       # (3, N), already transposed layout
    results = {"A": A_raw, "features": M}
    off = 0
    for t, cs in enumerate(c_sizes):
        lt = logits_full[t:t + 1, off:off + cs]
        results[f"logits_task{t+1}"] = lt
        results[f"Y_prob_task{t+1}"] = jax.nn.softmax(lt, axis=1)
        results[f"Y_hat_task{t+1}"] = jnp.argmax(lt, axis=1).reshape(1, 1)
        off += cs
    return results


# --------------------------------------------------------------------------
# Deterministic parameter construction (size_arg='big': [1024, 512, 384])
# --------------------------------------------------------------------------
def make_params(key, L=1024, H=512, D=384, n_att=3, n_classes=(2, 2, 2)):
    ks = jax.random.split(key, 9)
    scale = 0.02

    def lin(k, fin, fout):
        return scale * jax.random.normal(k, (fin, fout), jnp.float32)

    def bias(fout, val=0.01):
        return jnp.full((1, fout), val, jnp.float32)

    return {
        "w1": lin(ks[0], L, H),  "b1": bias(H),
        "w2": lin(ks[1], H, H),  "b2": bias(H),
        "wa": lin(ks[2], H, D),  "ba": bias(D),
        "wb": lin(ks[3], H, D),  "bb": bias(D),
        "wc": lin(ks[4], D, n_att), "bc": bias(n_att),
        "wc1": lin(ks[5], H, n_classes[0]), "bc1": bias(n_classes[0]),
        "wc2": lin(ks[6], H, n_classes[1]), "bc2": bias(n_classes[1]),
        "wc3": lin(ks[7], H, n_classes[2]), "bc3": bias(n_classes[2]),
    }


# --------------------------------------------------------------------------
# Pure-JAX f32 reference (mirrors the PyTorch forward) for correctness checking
# --------------------------------------------------------------------------
def reference_forward(h, p):
    h1 = jnp.maximum(h @ p["w1"] + p["b1"], 0.0)
    h2 = jnp.maximum(h1 @ p["w2"] + p["b2"], 0.0)
    a = jnp.tanh(h2 @ p["wa"] + p["ba"])
    b = jax.nn.sigmoid(h2 @ p["wb"] + p["bb"])
    A = (a * b) @ p["wc"] + p["bc"]           # (N, 3)
    A_raw = A.T                                # (3, N)
    A_sm = jax.nn.softmax(A_raw, axis=1)       # softmax over instances
    M = A_sm @ h2                              # (3, H)
    l1 = M[0:1] @ p["wc1"] + p["bc1"]
    l2 = M[1:2] @ p["wc2"] + p["bc2"]
    l3 = M[2:3] @ p["wc3"] + p["bc3"]
    return A_raw, M, jnp.concatenate([l1, l2, l3], axis=0)


def _check(results, h, params, atol=2e-2, rtol=2e-2):
    A_ref, M_ref, logits_ref = reference_forward(h, params)
    logits_got = jnp.concatenate(
        [results["logits_task1"], results["logits_task2"], results["logits_task3"]], axis=0)
    assert np.allclose(np.asarray(results["A"]), np.asarray(A_ref), atol=atol, rtol=rtol)
    assert np.allclose(np.asarray(results["features"]), np.asarray(M_ref), atol=atol, rtol=rtol)
    assert np.allclose(np.asarray(logits_got), np.asarray(logits_ref), atol=atol, rtol=rtol)


if __name__ == "__main__":
    key = jax.random.PRNGKey(0)
    k_h1, k_h2, k_p = jax.random.split(key, 3)
    params = make_params(k_p)

    # Small bag (8 instances, single padded tile).
    h_small = jax.random.normal(k_h1, (8, 1024), jnp.float32)
    res_small = mil_attention_mtl_forward(h_small, params)
    jax.block_until_ready(res_small)
    _check(res_small, h_small, params)

    # Larger bag with a forced small tile: exercises the multi-tile grid,
    # online-softmax accumulation, and padded-instance masking (300 -> 3 tiles of 128).
    h_big = jax.random.normal(k_h2, (300, 1024), jnp.float32)
    res_big = mil_attention_mtl_forward(h_big, params, tile_n=128)
    jax.block_until_ready(res_big)
    _check(res_big, h_big, params)

    print("KERNEL_OK")
</pallas_src>

<mosaic_0001>
module attributes {stable_mosaic.version = 11 : i64} {
  func.func @mil_attention_mtl_kernel(%arg0: i32, %arg1: memref<128x1024xbf16, #tpu.memory_space<vmem>>, %arg2: memref<1024x512xbf16, #tpu.memory_space<vmem>>, %arg3: memref<1x512xf32, #tpu.memory_space<vmem>>, %arg4: memref<512x512xbf16, #tpu.memory_space<vmem>>, %arg5: memref<1x512xf32, #tpu.memory_space<vmem>>, %arg6: memref<512x768xbf16, #tpu.memory_space<vmem>>, %arg7: memref<1x768xf32, #tpu.memory_space<vmem>>, %arg8: memref<384x3xbf16, #tpu.memory_space<vmem>>, %arg9: memref<3x1xf32, #tpu.memory_space<vmem>>, %arg10: memref<512x128xbf16, #tpu.memory_space<vmem>>, %arg11: memref<1x128xf32, #tpu.memory_space<vmem>>, %arg12: memref<3x128xf32, #tpu.memory_space<vmem>>, %arg13: memref<3x512xf32, #tpu.memory_space<vmem>>, %arg14: memref<3x128xf32, #tpu.memory_space<vmem>>, %arg15: memref<3x1xf32, #tpu.memory_space<vmem>>, %arg16: memref<3x1xf32, #tpu.memory_space<vmem>>, %arg17: memref<3x512xf32, #tpu.memory_space<vmem>>) attributes {dimension_semantics = [#tpu.dimension_semantics<arbitrary>], iteration_bounds = array<i64: 1>, scalar_prefetch = 0 : i64, scratch_operands = 3 : i64, tpu.core_type = #tpu.core_type<tc>, window_params = [{transform_indices = @transform_0, window_bounds = array<i64: 128, 1024>}, {pipeline_mode = #tpu.pipeline_mode<synchronous>, transform_indices = @transform_1, window_bounds = array<i64: 1024, 512>}, {pipeline_mode = #tpu.pipeline_mode<synchronous>, transform_indices = @transform_2, window_bounds = array<i64: 1, 512>}, {pipeline_mode = #tpu.pipeline_mode<synchronous>, transform_indices = @transform_3, window_bounds = array<i64: 512, 512>}, {pipeline_mode = #tpu.pipeline_mode<synchronous>, transform_indices = @transform_4, window_bounds = array<i64: 1, 512>}, {pipeline_mode = #tpu.pipeline_mode<synchronous>, transform_indices = @transform_5, window_bounds = array<i64: 512, 768>}, {pipeline_mode = #tpu.pipeline_mode<synchronous>, transform_indices = @transform_6, window_bounds = array<i64: 1, 768>}, {pipeline_mode = #tpu.pipeline_mode<synchronous>, transform_indices = @transform_7, window_bounds = array<i64: 384, 3>}, {pipeline_mode = #tpu.pipeline_mode<synchronous>, transform_indices = @transform_8, window_bounds = array<i64: 3, 1>}, {pipeline_mode = #tpu.pipeline_mode<synchronous>, transform_indices = @transform_9, window_bounds = array<i64: 512, 128>}, {pipeline_mode = #tpu.pipeline_mode<synchronous>, transform_indices = @transform_10, window_bounds = array<i64: 1, 128>}, {transform_indices = @transform_11, window_bounds = array<i64: 3, 128>}, {pipeline_mode = #tpu.pipeline_mode<synchronous>, transform_indices = @transform_12, window_bounds = array<i64: 3, 512>}, {pipeline_mode = #tpu.pipeline_mode<synchronous>, transform_indices = @transform_13, window_bounds = array<i64: 3, 128>}]} {
    %c0_i32 = arith.constant 0 : i32
    %0 = arith.cmpi eq, %arg0, %c0_i32 : i32
    %1 = arith.extui %0 : i1 to i32
    %c0_i32_0 = arith.constant 0 : i32
    %2 = arith.cmpi ne, %1, %c0_i32_0 : i32
    scf.if %2 {
      %cst_46 = arith.constant 0xFF800000 : f32
      %76 = vector.broadcast %cst_46 : f32 to vector<3x1xf32>
      %c0_47 = arith.constant 0 : index
      %c0_48 = arith.constant 0 : index
      %77 = vector.load %arg15[%c0_47, %c0_48] : memref<3x1xf32, #tpu.memory_space<vmem>>, vector<3x1xf32>
      tpu.vector_store %arg15[%c0_47, %c0_48], %76 {strides = array<i32>} : memref<3x1xf32, #tpu.memory_space<vmem>>, vector<3x1xf32>,
      %cst_49 = arith.constant 0.000000e+00 : f32
      %78 = vector.broadcast %cst_49 : f32 to vector<3x1xf32>
      %c0_50 = arith.constant 0 : index
      %c0_51 = arith.constant 0 : index
      %79 = vector.load %arg16[%c0_50, %c0_51] : memref<3x1xf32, #tpu.memory_space<vmem>>, vector<3x1xf32>
      tpu.vector_store %arg16[%c0_50, %c0_51], %78 {strides = array<i32>} : memref<3x1xf32, #tpu.memory_space<vmem>>, vector<3x1xf32>,
      %cst_52 = arith.constant 0.000000e+00 : f32
      %80 = vector.broadcast %cst_52 : f32 to vector<3x512xf32>
      %c0_53 = arith.constant 0 : index
      %c0_54 = arith.constant 0 : index
      %81 = vector.load %arg17[%c0_53, %c0_54] : memref<3x512xf32, #tpu.memory_space<vmem>>, vector<3x512xf32>
      tpu.vector_store %arg17[%c0_53, %c0_54], %80 {strides = array<i32>} : memref<3x512xf32, #tpu.memory_space<vmem>>, vector<3x512xf32>,
    } else {
    }
    %c0 = arith.constant 0 : index
    %c0_1 = arith.constant 0 : index
    %3 = vector.load %arg1[%c0, %c0_1] : memref<128x1024xbf16, #tpu.memory_space<vmem>>, vector<128x1024xbf16>
    %c0_2 = arith.constant 0 : index
    %c0_3 = arith.constant 0 : index
    %4 = vector.load %arg2[%c0_2, %c0_3] : memref<1024x512xbf16, #tpu.memory_space<vmem>>, vector<1024x512xbf16>
    %cst = arith.constant dense<0.000000e+00> : vector<128x512xf32>
    %5 = tpu.matmul %3, %4, %cst {dimension_numbers = #tpu.dot_dimension_numbers<[1], [0], [0], [1], [0, 0, 1, 1], [], []>} : vector<128x1024xbf16>, vector<1024x512xbf16>, vector<128x512xf32> -> vector<128x512xf32>
    %c0_4 = arith.constant 0 : index
    %c0_5 = arith.constant 0 : index
    %6 = vector.load %arg3[%c0_4, %c0_5] : memref<1x512xf32, #tpu.memory_space<vmem>>, vector<1x512xf32>
    %7 = vector.broadcast %6 : vector<1x512xf32> to vector<128x512xf32>
    %8 = arith.addf %5, %7 : vector<128x512xf32>
    %cst_6 = arith.constant 0.000000e+00 : f32
    %9 = vector.broadcast %cst_6 : f32 to vector<128x512xf32>
    %10 = arith.maximumf %8, %9 : vector<128x512xf32>
    %11 = arith.truncf %10 : vector<128x512xf32> to vector<128x512xbf16>
    %c0_7 = arith.constant 0 : index
    %c0_8 = arith.constant 0 : index
    %12 = vector.load %arg4[%c0_7, %c0_8] : memref<512x512xbf16, #tpu.memory_space<vmem>>, vector<512x512xbf16>
    %cst_9 = arith.constant dense<0.000000e+00> : vector<128x512xf32>
    %13 = tpu.matmul %11, %12, %cst_9 {dimension_numbers = #tpu.dot_dimension_numbers<[1], [0], [0], [1], [0, 0, 1, 1], [], []>} : vector<128x512xbf16>, vector<512x512xbf16>, vector<128x512xf32> -> vector<128x512xf32>
    %c0_10 = arith.constant 0 : index
    %c0_11 = arith.constant 0 : index
    %14 = vector.load %arg5[%c0_10, %c0_11] : memref<1x512xf32, #tpu.memory_space<vmem>>, vector<1x512xf32>
    %15 = vector.broadcast %14 : vector<1x512xf32> to vector<128x512xf32>
    %16 = arith.addf %13, %15 : vector<128x512xf32>
    %cst_12 = arith.constant 0.000000e+00 : f32
    %17 = vector.broadcast %cst_12 : f32 to vector<128x512xf32>
    %18 = arith.maximumf %16, %17 : vector<128x512xf32>
    %19 = arith.truncf %18 : vector<128x512xf32> to vector<128x512xbf16>
    %c0_13 = arith.constant 0 : index
    %c0_14 = arith.constant 0 : index
    %20 = vector.load %arg6[%c0_13, %c0_14] : memref<512x768xbf16, #tpu.memory_space<vmem>>, vector<512x768xbf16>
    %cst_15 = arith.constant dense<0.000000e+00> : vector<128x768xf32>
    %21 = tpu.matmul %19, %20, %cst_15 {dimension_numbers = #tpu.dot_dimension_numbers<[1], [0], [0], [1], [0, 0, 1, 1], [], []>} : vector<128x512xbf16>, vector<512x768xbf16>, vector<128x768xf32> -> vector<128x768xf32>
    %c0_16 = arith.constant 0 : index
    %c0_17 = arith.constant 0 : index
    %22 = vector.load %arg7[%c0_16, %c0_17] : memref<1x768xf32, #tpu.memory_space<vmem>>, vector<1x768xf32>
    %23 = vector.broadcast %22 : vector<1x768xf32> to vector<128x768xf32>
    %24 = arith.addf %21, %23 : vector<128x768xf32>
    %25 = vector.extract_strided_slice %24 {offsets = [0, 0], sizes = [128, 384], strides = [1, 1]} : vector<128x768xf32> to vector<128x384xf32>
    %26 = math.tanh %25 : vector<128x384xf32>
    %27 = vector.extract_strided_slice %24 {offsets = [0, 384], sizes = [128, 384], strides = [1, 1]} : vector<128x768xf32> to vector<128x384xf32>
    %28 = arith.negf %27 : vector<128x384xf32>
    %29 = math.exp %28 : vector<128x384xf32>
    %cst_18 = arith.constant 1.000000e+00 : f32
    %30 = vector.broadcast %cst_18 : f32 to vector<128x384xf32>
    %31 = arith.addf %30, %29 : vector<128x384xf32>
    %32 = arith.divf %30, %31 : vector<128x384xf32>
    %33 = arith.mulf %26, %32 : vector<128x384xf32>
    %34 = arith.truncf %33 : vector<128x384xf32> to vector<128x384xbf16>
    %c0_19 = arith.constant 0 : index
    %c0_20 = arith.constant 0 : index
    %35 = vector.load %arg8[%c0_19, %c0_20] : memref<384x3xbf16, #tpu.memory_space<vmem>>, vector<384x3xbf16>
    %cst_21 = arith.constant dense<0.000000e+00> : vector<3x128xf32>
    %36 = tpu.matmul %35, %34, %cst_21 {dimension_numbers = #tpu.dot_dimension_numbers<[0], [1], [1], [0], [0, 1, 1, 0], [], []>} : vector<384x3xbf16>, vector<128x384xbf16>, vector<3x128xf32> -> vector<3x128xf32>
    %c0_22 = arith.constant 0 : index
    %c0_23 = arith.constant 0 : index
    %37 = vector.load %arg9[%c0_22, %c0_23] : memref<3x1xf32, #tpu.memory_space<vmem>>, vector<3x1xf32>
    %38 = vector.broadcast %37 : vector<3x1xf32> to vector<3x128xf32>
    %39 = arith.addf %36, %38 : vector<3x128xf32>
    %c0_24 = arith.constant 0 : index
    %c0_25 = arith.constant 0 : index
    %40 = vector.load %arg12[%c0_24, %c0_25] : memref<3x128xf32, #tpu.memory_space<vmem>>, vector<3x128xf32>
    tpu.vector_store %arg12[%c0_24, %c0_25], %39 {strides = array<i32>} : memref<3x128xf32, #tpu.memory_space<vmem>>, vector<3x128xf32>,
    %41 = tpu.iota {dimensions = array<i32: 1>} : vector<3x128xi32>
    %c128_i32 = arith.constant 128 : i32
    %42 = arith.muli %arg0, %c128_i32 : i32
    %43 = vector.broadcast %42 : i32 to vector<3x128xi32>
    %44 = arith.addi %41, %43 : vector<3x128xi32>
    %c8_i32 = arith.constant 8 : i32
    %45 = vector.broadcast %c8_i32 : i32 to vector<3x128xi32>
    %46 = arith.cmpi slt, %44, %45 : vector<3x128xi32>
    %cst_26 = arith.constant 0xFF800000 : f32
    %47 = vector.broadcast %cst_26 : f32 to vector<3x128xf32>
    %48 = arith.select %46, %39, %47 : vector<3x128xi1>, vector<3x128xf32>
    %cst_27 = arith.constant dense<0xFF800000> : vector<3xf32>
    %49 = vector.multi_reduction <maximumf>, %48, %cst_27 [1] : vector<3x128xf32> to vector<3xf32>
    %50 = vector.shape_cast %49 : vector<3xf32> to vector<3x1xf32>
    %c0_28 = arith.constant 0 : index
    %c0_29 = arith.constant 0 : index
    %51 = vector.load %arg15[%c0_28, %c0_29] : memref<3x1xf32, #tpu.memory_space<vmem>>, vector<3x1xf32>
    %52 = arith.maximumf %51, %50 : vector<3x1xf32>
    %c0_30 = arith.constant 0 : index
    %c0_31 = arith.constant 0 : index
    %53 = vector.load %arg15[%c0_30, %c0_31] : memref<3x1xf32, #tpu.memory_space<vmem>>, vector<3x1xf32>
    %54 = arith.subf %53, %52 : vector<3x1xf32>
    %55 = math.exp %54 : vector<3x1xf32>
    %56 = vector.broadcast %52 : vector<3x1xf32> to vector<3x128xf32>
    %57 = arith.subf %48, %56 : vector<3x128xf32>
    %58 = math.exp %57 : vector<3x128xf32>
    %c0_32 = arith.constant 0 : index
    %c0_33 = arith.constant 0 : index
    %59 = vector.load %arg16[%c0_32, %c0_33] : memref<3x1xf32, #tpu.memory_space<vmem>>, vector<3x1xf32>
    %60 = arith.mulf %55, %59 : vector<3x1xf32>
    %cst_34 = arith.constant dense<0.000000e+00> : vector<3xf32>
    %61 = vector.multi_reduction <add>, %58, %cst_34 [1] : vector<3x128xf32> to vector<3xf32>
    %62 = vector.shape_cast %61 : vector<3xf32> to vector<3x1xf32>
    %63 = arith.addf %60, %62 : vector<3x1xf32>
    %c0_35 = arith.constant 0 : index
    %c0_36 = arith.constant 0 : index
    %64 = vector.load %arg16[%c0_35, %c0_36] : memref<3x1xf32, #tpu.memory_space<vmem>>, vector<3x1xf32>
    tpu.vector_store %arg16[%c0_35, %c0_36], %63 {strides = array<i32>} : memref<3x1xf32, #tpu.memory_space<vmem>>, vector<3x1xf32>,
    %c0_37 = arith.constant 0 : index
    %c0_38 = arith.constant 0 : index
    %65 = vector.load %arg17[%c0_37, %c0_38] : memref<3x512xf32, #tpu.memory_space<vmem>>, vector<3x512xf32>
    %66 = vector.broadcast %55 : vector<3x1xf32> to vector<3x512xf32>
    %67 = arith.mulf %66, %65 : vector<3x512xf32>
    %68 = arith.truncf %58 : vector<3x128xf32> to vector<3x128xbf16>
    %cst_39 = arith.constant dense<0.000000e+00> : vector<3x512xf32>
    %69 = tpu.matmul %68, %19, %cst_39 {dimension_numbers = #tpu.dot_dimension_numbers<[1], [0], [0], [1], [0, 0, 1, 1], [], []>} : vector<3x128xbf16>, vector<128x512xbf16>, vector<3x512xf32> -> vector<3x512xf32>
    %70 = arith.addf %67, %69 : vector<3x512xf32>
    %c0_40 = arith.constant 0 : index
    %c0_41 = arith.constant 0 : index
    %71 = vector.load %arg17[%c0_40, %c0_41] : memref<3x512xf32, #tpu.memory_space<vmem>>, vector<3x512xf32>
    tpu.vector_store %arg17[%c0_40, %c0_41], %70 {strides = array<i32>} : memref<3x512xf32, #tpu.memory_space<vmem>>, vector<3x512xf32>,
    %c0_42 = arith.constant 0 : index
    %c0_43 = arith.constant 0 : index
    %72 = vector.load %arg15[%c0_42, %c0_43] : memref<3x1xf32, #tpu.memory_space<vmem>>, vector<3x1xf32>
    tpu.vector_store %arg15[%c0_42, %c0_43], %52 {strides = array<i32>} : memref<3x1xf32, #tpu.memory_space<vmem>>, vector<3x1xf32>,
    %c0_i32_44 = arith.constant 0 : i32
    %73 = arith.cmpi eq, %arg0, %c0_i32_44 : i32
    %74 = arith.extui %73 : i1 to i32
    %c0_i32_45 = arith.constant 0 : i32
    %75 = arith.cmpi ne, %74, %c0_i32_45 : i32
    scf.if %75 {
      %c0_46 = arith.constant 0 : index
      %c0_47 = arith.constant 0 : index
      %76 = vector.load %arg16[%c0_46, %c0_47] : memref<3x1xf32, #tpu.memory_space<vmem>>, vector<3x1xf32>
      %77 = tpu.reciprocal %76 {approx = true} : vector<3x1xf32> -> vector<3x1xf32>
      %c0_48 = arith.constant 0 : index
      %c0_49 = arith.constant 0 : index
      %78 = vector.load %arg17[%c0_48, %c0_49] : memref<3x512xf32, #tpu.memory_space<vmem>>, vector<3x512xf32>
      %79 = vector.broadcast %77 : vector<3x1xf32> to vector<3x512xf32>
      %80 = arith.mulf %78, %79 : vector<3x512xf32>
      %c0_50 = arith.constant 0 : index
      %c0_51 = arith.constant 0 : index
      %81 = vector.load %arg13[%c0_50, %c0_51] : memref<3x512xf32, #tpu.memory_space<vmem>>, vector<3x512xf32>
      tpu.vector_store %arg13[%c0_50, %c0_51], %80 {strides = array<i32>} : memref<3x512xf32, #tpu.memory_space<vmem>>, vector<3x512xf32>,
      %82 = arith.truncf %80 : vector<3x512xf32> to vector<3x512xbf16>
      %c0_52 = arith.constant 0 : index
      %c0_53 = arith.constant 0 : index
      %83 = vector.load %arg10[%c0_52, %c0_53] : memref<512x128xbf16, #tpu.memory_space<vmem>>, vector<512x128xbf16>
      %cst_54 = arith.constant dense<0.000000e+00> : vector<3x128xf32>
      %84 = tpu.matmul %82, %83, %cst_54 {dimension_numbers = #tpu.dot_dimension_numbers<[1], [0], [0], [1], [0, 0, 1, 1], [], []>} : vector<3x512xbf16>, vector<512x128xbf16>, vector<3x128xf32> -> vector<3x128xf32>
      %c0_55 = arith.constant 0 : index
      %c0_56 = arith.constant 0 : index
      %85 = vector.load %arg11[%c0_55, %c0_56] : memref<1x128xf32, #tpu.memory_space<vmem>>, vector<1x128xf32>
      %86 = vector.broadcast %85 : vector<1x128xf32> to vector<3x128xf32>
      %87 = arith.addf %84, %86 : vector<3x128xf32>
      %c0_57 = arith.constant 0 : index
      %c0_58 = arith.constant 0 : index
      %88 = vector.load %arg14[%c0_57, %c0_58] : memref<3x128xf32, #tpu.memory_space<vmem>>, vector<3x128xf32>
      tpu.vector_store %arg14[%c0_57, %c0_58], %87 {strides = array<i32>} : memref<3x128xf32, #tpu.memory_space<vmem>>, vector<3x128xf32>,
    } else {
    }
    return
  }
  func.func @transform_0(%arg0: i32) -> (i32, i32) {
    %c0_i32 = arith.constant 0 : i32
    %c0_i32_0 = arith.constant 0 : i32
    return %arg0, %c0_i32 : i32, i32
  }
  func.func @transform_1(%arg0: i32) -> (i32, i32) {
    %c0_i32 = arith.constant 0 : i32
    %c0_i32_0 = arith.constant 0 : i32
    %c0_i32_1 = arith.constant 0 : i32
    return %c0_i32, %c0_i32_0 : i32, i32
  }
  func.func @transform_2(%arg0: i32) -> (i32, i32) {
    %c0_i32 = arith.constant 0 : i32
    %c0_i32_0 = arith.constant 0 : i32
    %c0_i32_1 = arith.constant 0 : i32
    return %c0_i32, %c0_i32_0 : i32, i32
  }
  func.func @transform_3(%arg0: i32) -> (i32, i32) {
    %c0_i32 = arith.constant 0 : i32
    %c0_i32_0 = arith.constant 0 : i32
    %c0_i32_1 = arith.constant 0 : i32
    return %c0_i32, %c0_i32_0 : i32, i32
  }
  func.func @transform_4(%arg0: i32) -> (i32, i32) {
    %c0_i32 = arith.constant 0 : i32
    %c0_i32_0 = arith.constant 0 : i32
    %c0_i32_1 = arith.constant 0 : i32
    return %c0_i32, %c0_i32_0 : i32, i32
  }
  func.func @transform_5(%arg0: i32) -> (i32, i32) {
    %c0_i32 = arith.constant 0 : i32
    %c0_i32_0 = arith.constant 0 : i32
    %c0_i32_1 = arith.constant 0 : i32
    return %c0_i32, %c0_i32_0 : i32, i32
  }
  func.func @transform_6(%arg0: i32) -> (i32, i32) {
    %c0_i32 = arith.constant 0 : i32
    %c0_i32_0 = arith.constant 0 : i32
    %c0_i32_1 = arith.constant 0 : i32
    return %c0_i32, %c0_i32_0 : i32, i32
  }
  func.func @transform_7(%arg0: i32) -> (i32, i32) {
    %c0_i32 = arith.constant 0 : i32
    %c0_i32_0 = arith.constant 0 : i32
    %c0_i32_1 = arith.constant 0 : i32
    return %c0_i32, %c0_i32_0 : i32, i32
  }
  func.func @transform_8(%arg0: i32) -> (i32, i32) {
    %c0_i32 = arith.constant 0 : i32
    %c0_i32_0 = arith.constant 0 : i32
    %c0_i32_1 = arith.constant 0 : i32
    return %c0_i32, %c0_i32_0 : i32, i32
  }
  func.func @transform_9(%arg0: i32) -> (i32, i32) {
    %c0_i32 = arith.constant 0 : i32
    %c0_i32_0 = arith.constant 0 : i32
    %c0_i32_1 = arith.constant 0 : i32
    return %c0_i32, %c0_i32_0 : i32, i32
  }
  func.func @transform_10(%arg0: i32) -> (i32, i32) {
    %c0_i32 = arith.constant 0 : i32
    %c0_i32_0 = arith.constant 0 : i32
    %c0_i32_1 = arith.constant 0 : i32
    return %c0_i32, %c0_i32_0 : i32, i32
  }
  func.func @transform_11(%arg0: i32) -> (i32, i32) {
    %c0_i32 = arith.constant 0 : i32
    %c0_i32_0 = arith.constant 0 : i32
    return %c0_i32, %arg0 : i32, i32
  }
  func.func @transform_12(%arg0: i32) -> (i32, i32) {
    %c0_i32 = arith.constant 0 : i32
    %c0_i32_0 = arith.constant 0 : i32
    %c0_i32_1 = arith.constant 0 : i32
    return %c0_i32, %c0_i32_0 : i32, i32
  }
  func.func @transform_13(%arg0: i32) -> (i32, i32) {
    %c0_i32 = arith.constant 0 : i32
    %c0_i32_0 = arith.constant 0 : i32
    %c0_i32_1 = arith.constant 0 : i32
    return %c0_i32, %c0_i32_0 : i32, i32
  }
}

</mosaic_0001>

<bundles_post_ra>
// kernel: mil_attention_mtl_forward.1
= control target key start
LH: loop header
LB: loop body
LE: loop exit
PB: predicated region body
PF: predicated region fallthrough
CT: control target
= control target key end

     0   :  { %19 = vsyncpa [#allocation6], 0  ;;  %s13267_s0 = inlined_call_operand.vmem [shape: bf16[128,1024], index: 0, kind: input, shape index: {}]   ;;  %s13268_s1 = inlined_call_operand.vmem [shape: bf16[1024,512], index: 1, kind: input, shape index: {}]   ;;  %s13269_s2 = inlined_call_operand.vmem [shape: f32[1,512], index: 2, kind: input, shape index: {}]   ;;  %s13270_s3 = inlined_call_operand.vmem [shape: bf16[512,512], index: 3, kind: input, shape index: {}]   ;;  %s13271_s4 = inlined_call_operand.vmem [shape: f32[1,512], index: 4, kind: input, shape index: {}]   ;;  %s13272_s5 = inlined_call_operand.vmem [shape: bf16[512,768], index: 5, kind: input, shape index: {}]   ;;  %s13273_s6 = inlined_call_operand.vmem [shape: f32[1,768], index: 6, kind: input, shape index: {}]   ;;  %s13274_s7 = inlined_call_operand.vmem [shape: bf16[384,3], index: 7, kind: input, shape index: {}]   ;;  %s13275_s8 = inlined_call_operand.vmem [shape: f32[3,1], index: 8, kind: input, shape index: {}]   ;;  %s13276_s9 = inlined_call_operand.vmem [shape: bf16[512,128], index: 9, kind: input, shape index: {}]   ;;  %s13277_s10 = inlined_call_operand.vmem [shape: f32[1,128], index: 10, kind: input, shape index: {}]   ;;  %s13278_s11 = inlined_call_operand.hbm [shape: f32[3,128], index: 11, kind: output, shape index: {0}]   ;;  %s13279_s12 = inlined_call_operand.hbm [shape: f32[3,512], index: 12, kind: output, shape index: {1}]   ;;  %s13280_s13 = inlined_call_operand.vmem [shape: f32[3,128], index: 13, kind: output, shape index: {2}]  }
   0x1   :  { %v8894_v0 = vld [vmem:[%s13268_s1 + $0x4] ss:$16 sps:$4 sm:$0xff]   ;;  %v8896_v1 = vld [vmem:[%s13268_s1 + $0xc] ss:$16 sps:$4 sm:$0xff]   ;;  %v8898_v2 = vld [vmem:[%s13268_s1] ss:$16 sps:$4 sm:$0xff]  }
   0x2   :  { %1995 = vmatprep.subr.bf16.mxu0 %v8894_v0  ;;  %v8899_v3 = vld [vmem:[%s13268_s1 + $0x8] ss:$16 sps:$4 sm:$0xff]   ;;  %2447 = vmatprep.subr.bf16.mxu1 %v8896_v1  ;;  %v8900_v4 = vld [vmem:[%s13268_s1 + $0x24] ss:$16 sps:$4 sm:$0xff]   ;;  %v8902_v5 = vld [vmem:[%s13268_s1 + $0x2c] ss:$16 sps:$4 sm:$0xff]  }
   0x3   :  { %1996 = vmatpush1.bf16.msra.mxu0 %v8898_v2  ;;  %2448 = vmatpush1.bf16.msra.mxu1 %v8899_v3  ;;  %v8904_v6 = vld [vmem:[%s13268_s1 + $0x20] ss:$16 sps:$4 sm:$0xff]   ;;  %v8905_v7 = vld [vmem:[%s13268_s1 + $0x28] ss:$16 sps:$4 sm:$0xff]   ;;  %v8906_v8 = vld [vmem:[%s13268_s1 + $0x44] ss:$16 sps:$4 sm:$0xff]  }
   0x4   :  { %1997 = vmatprep.subr.bf16.mxu0 %v8900_v4  ;;  %2449 = vmatprep.subr.bf16.mxu1 %v8902_v5  ;;  %v8908_v9 = vld [vmem:[%s13268_s1 + $0x4c] ss:$16 sps:$4 sm:$0xff]   ;;  %v8910_v10 = vld [vmem:[%s13268_s1 + $0x40] ss:$16 sps:$4 sm:$0xff]   ;;  %v8911_v11 = vld [vmem:[%s13268_s1 + $0x48] ss:$16 sps:$4 sm:$0xff]  }
   0x5   :  { %v8912_v12 = vld [vmem:[%s13268_s1 + $0x64] ss:$16 sps:$4 sm:$0xff]   ;;  %v8914_v13 = vld [vmem:[%s13268_s1 + $0x6c] ss:$16 sps:$4 sm:$0xff]   ;;  %v8916_v14 = vld [vmem:[%s13268_s1 + $0x60] ss:$16 sps:$4 sm:$0xff]  }
   0x6   :  { %v8917_v15 = vld [vmem:[%s13268_s1 + $0x68] ss:$16 sps:$4 sm:$0xff]   ;;  %v8918_v16 = vld [vmem:[%s13268_s1 + $0x84] ss:$16 sps:$4 sm:$0xff]   ;;  %v8920_v17 = vld [vmem:[%s13268_s1 + $0x8c] ss:$16 sps:$4 sm:$0xff]  }
   0x7   :  { %1998 = vmatpush1.bf16.msra.mxu0 %v8904_v6  ;;  %2450 = vmatpush1.bf16.msra.mxu1 %v8905_v7  ;;  %v8922_v18 = vld [vmem:[%s13268_s1 + $0x80] ss:$16 sps:$4 sm:$0xff]   ;;  %v8923_v19 = vld [vmem:[%s13268_s1 + $0x88] ss:$16 sps:$4 sm:$0xff]   ;;  %v8924_v20 = vld [vmem:[%s13268_s1 + $0xa4] ss:$16 sps:$4 sm:$0xff]  }
   0x8   :  { %1999 = vmatprep.subr.bf16.mxu0 %v8906_v8  ;;  %2451 = vmatprep.subr.bf16.mxu1 %v8908_v9  ;;  %v8926_v21 = vld [vmem:[%s13268_s1 + $0xac] ss:$16 sps:$4 sm:$0xff]   ;;  %v8928_v22 = vld [vmem:[%s13268_s1 + $0xa0] ss:$16 sps:$4 sm:$0xff]   ;;  %v8929_v23 = vld [vmem:[%s13268_s1 + $0xa8] ss:$16 sps:$4 sm:$0xff]  }
   0x9   :  { %v8930_v24 = vld [vmem:[%s13268_s1 + $0xc4] ss:$16 sps:$4 sm:$0xff]   ;;  %v8932_v25 = vld [vmem:[%s13268_s1 + $0xcc] ss:$16 sps:$4 sm:$0xff]   ;;  %v8934_v26 = vld [vmem:[%s13268_s1 + $0xc0] ss:$16 sps:$4 sm:$0xff]  }
   0xa   :  { %v8935_v27 = vld [vmem:[%s13268_s1 + $0xc8] ss:$16 sps:$4 sm:$0xff]   ;;  %v8936_v28 = vld [vmem:[%s13268_s1 + $0xe4] ss:$16 sps:$4 sm:$0xff]   ;;  %v8938_v29 = vld [vmem:[%s13268_s1 + $0xec] ss:$16 sps:$4 sm:$0xff]  }
   0xb   :  { %2000 = vmatpush1.bf16.msra.mxu0 %v8910_v10  ;;  %2452 = vmatpush1.bf16.msra.mxu1 %v8911_v11  ;;  %v8940_v30 = vld [vmem:[%s13268_s1 + $0xe0] ss:$16 sps:$4 sm:$0xff]   ;;  %v8941_v31 = vld [vmem:[%s13268_s1 + $0xe8] ss:$16 sps:$4 sm:$0xff]   ;;  %v8942_v32 = vld [vmem:[%s13268_s1 + $0x104] ss:$16 sps:$4 sm:$0xff]  }
   0xc   :  { %2001 = vmatprep.subr.bf16.mxu0 %v8912_v12  ;;  %2453 = vmatprep.subr.bf16.mxu1 %v8914_v13  ;;  %v8944_v33 = vld [vmem:[%s13268_s1 + $0x10c] ss:$16 sps:$4 sm:$0xff]   ;;  %v8946_v34 = vld [vmem:[%s13268_s1 + $0x100] ss:$16 sps:$4 sm:$0xff]   ;;  %v8947_v35 = vld [vmem:[%s13268_s1 + $0x108] ss:$16 sps:$4 sm:$0xff]  }
   0xd   :  { %v8948_v36 = vld [vmem:[%s13268_s1 + $0x124] ss:$16 sps:$4 sm:$0xff]   ;;  %v8950_v37 = vld [vmem:[%s13268_s1 + $0x12c] ss:$16 sps:$4 sm:$0xff]   ;;  %v8952_v38 = vld [vmem:[%s13268_s1 + $0x120] ss:$16 sps:$4 sm:$0xff]  }
   0xe   :  { %v8953_v39 = vld [vmem:[%s13268_s1 + $0x128] ss:$16 sps:$4 sm:$0xff]   ;;  %v8954_v40 = vld [vmem:[%s13268_s1 + $0x144] ss:$16 sps:$4 sm:$0xff]   ;;  %v8956_v41 = vld [vmem:[%s13268_s1 + $0x14c] ss:$16 sps:$4 sm:$0xff]  }
   0xf   :  { %2002 = vmatpush1.bf16.msra.mxu0 %v8916_v14  ;;  %2454 = vmatpush1.bf16.msra.mxu1 %v8917_v15  ;;  %v8958_v42 = vld [vmem:[%s13268_s1 + $0x140] ss:$16 sps:$4 sm:$0xff]   ;;  %v8959_v43 = vld [vmem:[%s13268_s1 + $0x148] ss:$16 sps:$4 sm:$0xff]   ;;  %v8960_v44 = vld [vmem:[%s13268_s1 + $0x164] ss:$16 sps:$4 sm:$0xff]  }
  0x10   :  { %2003 = vmatprep.subr.bf16.mxu0 %v8918_v16  ;;  %2455 = vmatprep.subr.bf16.mxu1 %v8920_v17  ;;  %v8962_v45 = vld [vmem:[%s13268_s1 + $0x16c] ss:$16 sps:$4 sm:$0xff]   ;;  %v53_v46 = vld [vmem:[%s13267_s0] sm:$0xff]  ;;  %v8965_v49 = vld [vmem:[%s13268_s1 + $0x168] ss:$16 sps:$4 sm:$0xff]  }
  0x11   :  { %v57_v47 = vld [vmem:[%s13267_s0 + $0x20] sm:$0xff]  ;;  %v8968_v52 = vld [vmem:[%s13268_s1 + $0x18c] ss:$16 sps:$4 sm:$0xff]   ;;  %v8971_v54 = vld [vmem:[%s13268_s1 + $0x188] ss:$16 sps:$4 sm:$0xff]  }
  0x12   :  { %v8964_v48 = vld [vmem:[%s13268_s1 + $0x160] ss:$16 sps:$4 sm:$0xff]   ;;  %v7487_v50 = vcombine.high %v53_v46, %v57_v47  ;;  %v8966_v51 = vld [vmem:[%s13268_s1 + $0x184] ss:$16 sps:$4 sm:$0xff]   ;;  %v8974_v56 = vld [vmem:[%s13268_s1 + $0x1ac] ss:$16 sps:$4 sm:$0xff]   ;;  %v7486_v7 = vcombine.low %v53_v46, %v57_v47 }
  0x13   :  { %2004 = vmatpush1.bf16.msra.mxu0 %v8922_v18  ;;  %2456 = vmatpush1.bf16.msra.mxu1 %v8923_v19  ;;  %v8970_v53 = vld [vmem:[%s13268_s1 + $0x180] ss:$16 sps:$4 sm:$0xff]   ;;  %v8972_v55 = vld [vmem:[%s13268_s1 + $0x1a4] ss:$16 sps:$4 sm:$0xff]   ;;  %v8977_v58 = vld [vmem:[%s13268_s1 + $0x1a8] ss:$16 sps:$4 sm:$0xff]  }
  0x14   :  { %2005 = vmatprep.subr.bf16.mxu0 %v8924_v20  ;;  %2457 = vmatprep.subr.bf16.mxu1 %v8926_v21  ;;  %v8976_v57 = vld [vmem:[%s13268_s1 + $0x1a0] ss:$16 sps:$4 sm:$0xff]   ;;  %v8978_v59 = vld [vmem:[%s13268_s1 + $0x1c4] ss:$16 sps:$4 sm:$0xff]   ;;  %v8980_v60 = vld [vmem:[%s13268_s1 + $0x1cc] ss:$16 sps:$4 sm:$0xff]  }
  0x15   :  { %2027 = vmatprep.mubr.bf16.mxu0 %v7487_v50  ;;  %2479 = vmatprep.mubr.bf16.mxu1 %v7487_v50  ;;  %v8982_v61 = vld [vmem:[%s13268_s1 + $0x1c0] ss:$16 sps:$4 sm:$0xff]   ;;  %v8983_v62 = vld [vmem:[%s13268_s1 + $0x1c8] ss:$16 sps:$4 sm:$0xff]   ;;  %v8984_v63 = vld [vmem:[%s13268_s1 + $0x1e4] ss:$16 sps:$4 sm:$0xff]  }
  0x16   :  { %v8986_v0 = vld [vmem:[%s13268_s1 + $0x1ec] ss:$16 sps:$4 sm:$0xff]   ;;  %v8988_v1 = vld [vmem:[%s13268_s1 + $0x1e0] ss:$16 sps:$4 sm:$0xff]   ;;  %v8989_v2 = vld [vmem:[%s13268_s1 + $0x1e8] ss:$16 sps:$4 sm:$0xff]  }
  0x17   :  { %2006 = vmatpush1.bf16.msra.mxu0 %v8928_v22  ;;  %2458 = vmatpush1.bf16.msra.mxu1 %v8929_v23  ;;  %v8992_v3 = vld [vmem:[%s13268_s1 + $0x204] ss:$16 sps:$4 sm:$0xff]   ;;  %v8995_v4 = vld [vmem:[%s13268_s1 + $0x20c] ss:$16 sps:$4 sm:$0xff]   ;;  %v8990_v5 = vld [vmem:[%s13268_s1 + $0x200] ss:$16 sps:$4 sm:$0xff]  }
  0x18   :  { %2007 = vmatprep.subr.bf16.mxu0 %v8930_v24  ;;  %2459 = vmatprep.subr.bf16.mxu1 %v8932_v25  ;;  %v8993_v6 = vld [vmem:[%s13268_s1 + $0x208] ss:$16 sps:$4 sm:$0xff]   ;;  %v61_v8 = vld [vmem:[%s13267_s0 + $0x40] sm:$0xff]  ;;  %v9001_v11 = vld [vmem:[%s13268_s1 + $0x22c] ss:$16 sps:$4 sm:$0xff]  }
  0x19   :  { %v65_v9 = vld [vmem:[%s13267_s0 + $0x60] sm:$0xff]  ;;  %v8999_v14 = vld [vmem:[%s13268_s1 + $0x228] ss:$16 sps:$4 sm:$0xff]   ;;  %v9007_v16 = vld [vmem:[%s13268_s1 + $0x24c] ss:$16 sps:$4 sm:$0xff]  }
  0x1a   :  { %v8998_v10 = vld [vmem:[%s13268_s1 + $0x224] ss:$16 sps:$4 sm:$0xff]   ;;  %v7495_v12 = vcombine.high %v61_v8, %v65_v9  ;;  %v8996_v13 = vld [vmem:[%s13268_s1 + $0x220] ss:$16 sps:$4 sm:$0xff]   ;;  %v7494_v18 = vcombine.low %v61_v8, %v65_v9  ;;  %v9005_v21 = vld [vmem:[%s13268_s1 + $0x248] ss:$16 sps:$4 sm:$0xff]  }
  0x1b   :  { %2008 = vmatpush1.bf16.msra.mxu0 %v8934_v26  ;;  %2460 = vmatpush1.bf16.msra.mxu1 %v8935_v27  ;;  %v9004_v15 = vld [vmem:[%s13268_s1 + $0x244] ss:$16 sps:$4 sm:$0xff]   ;;  %v9002_v20 = vld [vmem:[%s13268_s1 + $0x240] ss:$16 sps:$4 sm:$0xff]   ;;  %v9013_v23 = vld [vmem:[%s13268_s1 + $0x26c] ss:$16 sps:$4 sm:$0xff]  }
  0x1c   :  { %2009 = vmatprep.subr.bf16.mxu0 %v8936_v28  ;;  %2461 = vmatprep.subr.bf16.mxu1 %v8938_v29  ;;  %v69_v17 = vld [vmem:[%s13267_s0 + $0x80] sm:$0xff]  ;;  %v9011_v26 = vld [vmem:[%s13268_s1 + $0x268] ss:$16 sps:$4 sm:$0xff]   ;;  %v9019_v28 = vld [vmem:[%s13268_s1 + $0x28c] ss:$16 sps:$4 sm:$0xff]  }
  0x1d   :  { %v73_v19 = vld [vmem:[%s13267_s0 + $0xa0] sm:$0xff]  ;;  %v9037_v47 = vld [vmem:[%s13268_s1 + $0x2ec] ss:$16 sps:$4 sm:$0xff]   ;;  %v9035_v50 = vld [vmem:[%s13268_s1 + $0x2e8] ss:$16 sps:$4 sm:$0xff]  }
  0x1e   :  { %v9010_v22 = vld [vmem:[%s13268_s1 + $0x264] ss:$16 sps:$4 sm:$0xff]   ;;  %v7503_v24 = vcombine.high %v69_v17, %v73_v19  ;;  %v9008_v25 = vld [vmem:[%s13268_s1 + $0x260] ss:$16 sps:$4 sm:$0xff]  }
  0x1f   :  { %2010 = vmatpush1.bf16.msra.mxu0 %v8940_v30  ;;  %2462 = vmatpush1.bf16.msra.mxu1 %v8941_v31  ;;  %v9016_v27 = vld [vmem:[%s13268_s1 + $0x284] ss:$16 sps:$4 sm:$0xff]   ;;  %v7502_v30 = vcombine.low %v69_v17, %v73_v19  ;;  %v9056_v9 = vld [vmem:[%s13268_s1 + $0x360] ss:$16 sps:$4 sm:$0xff]   ;;  %v9073_v19 = vld [vmem:[%s13268_s1 + $0x3ac] ss:$16 sps:$4 sm:$0xff]  }
  0x20   :  { %2011 = vmatprep.subr.bf16.mxu0 %v8942_v32  ;;  %2463 = vmatprep.subr.bf16.mxu1 %v8944_v33  ;;  %v77_v29 = vld [vmem:[%s13267_s0 + $0xc0] sm:$0xff]  ;;  %v9017_v33 = vld [vmem:[%s13268_s1 + $0x288] ss:$16 sps:$4 sm:$0xff]  }
  0x21   :  { %v81_v31 = vld [vmem:[%s13267_s0 + $0xe0] sm:$0xff] }
  0x22   :  { %v9014_v32 = vld [vmem:[%s13268_s1 + $0x280] ss:$16 sps:$4 sm:$0xff]   ;;  %v9034_v46 = vld [vmem:[%s13268_s1 + $0x2e4] ss:$16 sps:$4 sm:$0xff]  }
  0x23   :  { %2012 = vmatpush1.bf16.msra.mxu0 %v8946_v34  ;;  %2464 = vmatpush1.bf16.msra.mxu1 %v8947_v35  ;;  %v9022_v34 = vld [vmem:[%s13268_s1 + $0x2a4] ss:$16 sps:$4 sm:$0xff]   ;;  %v9025_v35 = vld [vmem:[%s13268_s1 + $0x2ac] ss:$16 sps:$4 sm:$0xff]  }
  0x24   :  { %2013 = vmatprep.subr.bf16.mxu0 %v8948_v36  ;;  %2465 = vmatprep.subr.bf16.mxu1 %v8950_v37  ;;  %v7511_v36 = vcombine.high %v77_v29, %v81_v31  ;;  %v9020_v37 = vld [vmem:[%s13268_s1 + $0x2a0] ss:$16 sps:$4 sm:$0xff]  }
  0x25   :  { %v113_v17 = vld [vmem:[%s13267_s0 + $0x1e0] sm:$0xff] }
  0x27   :  { %2014 = vmatpush1.bf16.msra.mxu0 %v8952_v38  ;;  %2466 = vmatpush1.bf16.msra.mxu1 %v8953_v39  ;;  %v9023_v38 = vld [vmem:[%s13268_s1 + $0x2a8] ss:$16 sps:$4 sm:$0xff]   ;;  %v9028_v39 = vld [vmem:[%s13268_s1 + $0x2c4] ss:$16 sps:$4 sm:$0xff]  }
  0x28   :  { %2015 = vmatprep.subr.bf16.mxu0 %v8954_v40  ;;  %2467 = vmatprep.subr.bf16.mxu1 %v8956_v41  ;;  %v9031_v40 = vld [vmem:[%s13268_s1 + $0x2cc] ss:$16 sps:$4 sm:$0xff]   ;;  %v9026_v41 = vld [vmem:[%s13268_s1 + $0x2c0] ss:$16 sps:$4 sm:$0xff]  }
  0x2b   :  { %2016 = vmatpush1.bf16.msra.mxu0 %v8958_v42  ;;  %2468 = vmatpush1.bf16.msra.mxu1 %v8959_v43  ;;  %v9029_v42 = vld [vmem:[%s13268_s1 + $0x2c8] ss:$16 sps:$4 sm:$0xff]   ;;  %v7510_v43 = vcombine.low %v77_v29, %v81_v31  ;;  %v9085_v31 = vld [vmem:[%s13268_s1 + $0x3ec] ss:$16 sps:$4 sm:$0xff]  }
  0x2c   :  { %2017 = vmatprep.subr.bf16.mxu0 %v8960_v44  ;;  %2469 = vmatprep.subr.bf16.mxu1 %v8962_v45  ;;  %v85_v44 = vld [vmem:[%s13267_s0 + $0x100] sm:$0xff]  ;;  %v9077_v29 = vld [vmem:[%s13268_s1 + $0x3c8] ss:$16 sps:$4 sm:$0xff]  }
  0x2d   :  { %v89_v45 = vld [vmem:[%s13267_s0 + $0x120] sm:$0xff] }
  0x2f   :  { %2018 = vmatpush1.bf16.msra.mxu0 %v8964_v48  ;;  %2470 = vmatpush1.bf16.msra.mxu1 %v8965_v49  ;;  %v7519_v48 = vcombine.high %v85_v44, %v89_v45  ;;  %v9032_v49 = vld [vmem:[%s13268_s1 + $0x2e0] ss:$16 sps:$4 sm:$0xff]  }
  0x30   :  { %2019 = vmatprep.subr.bf16.mxu0 %v8966_v51  ;;  %2471 = vmatprep.subr.bf16.mxu1 %v8968_v52  ;;  %v9040_v51 = vld [vmem:[%s13268_s1 + $0x304] ss:$16 sps:$4 sm:$0xff]   ;;  %v9043_v52 = vld [vmem:[%s13268_s1 + $0x30c] ss:$16 sps:$4 sm:$0xff]  }
  0x33   :  { %2020 = vmatpush1.bf16.msra.mxu0 %v8970_v53  ;;  %2472 = vmatpush1.bf16.msra.mxu1 %v8971_v54  ;;  %v93_v53 = vld [vmem:[%s13267_s0 + $0x140] sm:$0xff]  ;;  %v7518_v54 = vcombine.low %v85_v44, %v89_v45 }
  0x34   :  { %2021 = vmatprep.subr.bf16.mxu0 %v8972_v55  ;;  %2473 = vmatprep.subr.bf16.mxu1 %v8974_v56  ;;  %v97_v55 = vld [vmem:[%s13267_s0 + $0x160] sm:$0xff] }
  0x35   :  { %v9038_v56 = vld [vmem:[%s13268_s1 + $0x300] ss:$16 sps:$4 sm:$0xff]  }
  0x36   :  { %v9092_v45 = vld [vmem:[%s13268_s1 + $0x420] ss:$16 sps:$4 sm:$0xff]  }
  0x37   :  { %2022 = vmatpush1.bf16.msra.mxu0 %v8976_v57  ;;  %2474 = vmatpush1.bf16.msra.mxu1 %v8977_v58  ;;  %v9041_v57 = vld [vmem:[%s13268_s1 + $0x308] ss:$16 sps:$4 sm:$0xff]   ;;  %v9046_v58 = vld [vmem:[%s13268_s1 + $0x324] ss:$16 sps:$4 sm:$0xff]  }
  0x38   :  { %2023 = vmatprep.subr.bf16.mxu0 %v8978_v59  ;;  %2475 = vmatprep.subr.bf16.mxu1 %v8980_v60  ;;  %v9049_v59 = vld [vmem:[%s13268_s1 + $0x32c] ss:$16 sps:$4 sm:$0xff]   ;;  %v7527_v60 = vcombine.high %v93_v53, %v97_v55 }
  0x3b   :  { %2024 = vmatpush1.bf16.msra.mxu0 %v8982_v61  ;;  %2476 = vmatpush1.bf16.msra.mxu1 %v8983_v62  ;;  %v9044_v61 = vld [vmem:[%s13268_s1 + $0x320] ss:$16 sps:$4 sm:$0xff]   ;;  %v9047_v62 = vld [vmem:[%s13268_s1 + $0x328] ss:$16 sps:$4 sm:$0xff]  }
  0x3c   :  { %2025 = vmatprep.subr.bf16.mxu0 %v8984_v63  ;;  %2477 = vmatprep.subr.bf16.mxu1 %v8986_v0  ;;  %v9052_v63 = vld [vmem:[%s13268_s1 + $0x344] ss:$16 sps:$4 sm:$0xff]   ;;  %v9055_v0 = vld [vmem:[%s13268_s1 + $0x34c] ss:$16 sps:$4 sm:$0xff]  }
  0x3f   :  { %2026 = vmatpush1.bf16.msra.mxu0 %v8988_v1  ;;  %2478 = vmatpush1.bf16.msra.mxu1 %v8989_v2  ;;  %v101_v1 = vld [vmem:[%s13267_s0 + $0x180] sm:$0xff]  ;;  %v7526_v2 = vcombine.low %v93_v53, %v97_v55  ;;  %v74_v53 = vld [vmem:[%s13267_s0 + $0xa8] sm:$0xff] }
  0x40   :  { %2108 = vmatprep.subr.bf16.mxu0 %v8992_v3  ;;  %2560 = vmatprep.subr.bf16.mxu1 %v8995_v4  ;;  %v105_v3 = vld [vmem:[%s13267_s0 + $0x1a0] sm:$0xff]  ;;  %v9109_v55 = vld [vmem:[%s13268_s1 + $0x46c] ss:$16 sps:$4 sm:$0xff]  }
  0x41   :  { %v9050_v4 = vld [vmem:[%s13268_s1 + $0x340] ss:$16 sps:$4 sm:$0xff]   ;;  %v7535_v8 = vcombine.high %v101_v1, %v105_v3 }
  0x42   :  { %2028 = vmatmul.mubr.bf16.vlgmr.msra.gmra.mrb[0].mxu0 %v7486_v7  ;;  %2480 = vmatmul.mubr.bf16.vlgmr.msra.gmra.mrb[0].mxu1 %v7486_v7  ;;  %v9061_v7 = vld [vmem:[%s13268_s1 + $0x36c] ss:$16 sps:$4 sm:$0xff]  }
  0x43   :  { %2109 = vmatpush1.bf16.msra.mxu0 %v8990_v5  ;;  %2561 = vmatpush1.bf16.msra.mxu1 %v8993_v6  ;;  %v9053_v5 = vld [vmem:[%s13268_s1 + $0x348] ss:$16 sps:$4 sm:$0xff]   ;;  %v9058_v6 = vld [vmem:[%s13268_s1 + $0x364] ss:$16 sps:$4 sm:$0xff]  }
  0x44   :  { %2110 = vmatprep.subr.bf16.mxu0 %v8998_v10  ;;  %2562 = vmatprep.subr.bf16.mxu1 %v9001_v11  ;;  %v9059_v10 = vld [vmem:[%s13268_s1 + $0x368] ss:$16 sps:$4 sm:$0xff]   ;;  %v9064_v11 = vld [vmem:[%s13268_s1 + $0x384] ss:$16 sps:$4 sm:$0xff]  }
  0x45   :  { %2037 = vmatprep.mubr.bf16.mxu0 %v7495_v12  ;;  %2489 = vmatprep.mubr.bf16.mxu1 %v7495_v12  ;;  %v9067_v12 = vld [vmem:[%s13268_s1 + $0x38c] ss:$16 sps:$4 sm:$0xff]  }
  0x47   :  { %2111 = vmatpush1.bf16.msra.mxu0 %v8996_v13  ;;  %2563 = vmatpush1.bf16.msra.mxu1 %v8999_v14  ;;  %v9062_v13 = vld [vmem:[%s13268_s1 + $0x380] ss:$16 sps:$4 sm:$0xff]   ;;  %v9065_v14 = vld [vmem:[%s13268_s1 + $0x388] ss:$16 sps:$4 sm:$0xff]  }
  0x48   :  { %2112 = vmatprep.subr.bf16.mxu0 %v9004_v15  ;;  %2564 = vmatprep.subr.bf16.mxu1 %v9007_v16  ;;  %v7534_v15 = vcombine.low %v101_v1, %v105_v3  ;;  %v109_v16 = vld [vmem:[%s13267_s0 + $0x1c0] sm:$0xff]  ;;  %v9113_v1 = vld [vmem:[%s13268_s1 + $0x488] ss:$16 sps:$4 sm:$0xff]   ;;  %v9121_v3 = vld [vmem:[%s13268_s1 + $0x4ac] ss:$16 sps:$4 sm:$0xff]  }
  0x4a   :  { %2038 = vmatmul.mubr.bf16.gmra.mrb[4].mxu0 %v7494_v18  ;;  %2490 = vmatmul.mubr.bf16.gmra.mrb[4].mxu1 %v7494_v18  ;;  %v9070_v18 = vld [vmem:[%s13268_s1 + $0x3a4] ss:$16 sps:$4 sm:$0xff]  }
  0x4b   :  { %2113 = vmatpush1.bf16.msra.mxu0 %v9002_v20  ;;  %2565 = vmatpush1.bf16.msra.mxu1 %v9005_v21  ;;  %v7543_v20 = vcombine.high %v109_v16, %v113_v17  ;;  %v9068_v21 = vld [vmem:[%s13268_s1 + $0x3a0] ss:$16 sps:$4 sm:$0xff]  }
  0x4c   :  { %2114 = vmatprep.subr.bf16.mxu0 %v9010_v22  ;;  %2566 = vmatprep.subr.bf16.mxu1 %v9013_v23  ;;  %v9071_v22 = vld [vmem:[%s13268_s1 + $0x3a8] ss:$16 sps:$4 sm:$0xff]   ;;  %v9076_v23 = vld [vmem:[%s13268_s1 + $0x3c4] ss:$16 sps:$4 sm:$0xff]  }
  0x4d   :  { %2047 = vmatprep.mubr.bf16.mxu0 %v7503_v24  ;;  %2499 = vmatprep.mubr.bf16.mxu1 %v7503_v24  ;;  %v9079_v24 = vld [vmem:[%s13268_s1 + $0x3cc] ss:$16 sps:$4 sm:$0xff]  }
  0x4f   :  { %2115 = vmatpush1.bf16.msra.mxu0 %v9008_v25  ;;  %2567 = vmatpush1.bf16.msra.mxu1 %v9011_v26  ;;  %v54_v25 = vld [vmem:[%s13267_s0 + $0x8] sm:$0xff]  ;;  %v7542_v26 = vcombine.low %v109_v16, %v113_v17  ;;  %v9128_v17 = vld [vmem:[%s13268_s1 + $0x4e0] ss:$16 sps:$4 sm:$0xff]  }
  0x50   :  { %2116 = vmatprep.subr.bf16.mxu0 %v9016_v27  ;;  %2568 = vmatprep.subr.bf16.mxu1 %v9019_v28  ;;  %v58_v27 = vld [vmem:[%s13267_s0 + $0x28] sm:$0xff]  ;;  %v9074_v28 = vld [vmem:[%s13268_s1 + $0x3c0] ss:$16 sps:$4 sm:$0xff]  }
  0x52   :  { %2048 = vmatmul.mubr.bf16.gmra.mrb[8].mxu0 %v7502_v30  ;;  %2500 = vmatmul.mubr.bf16.gmra.mrb[8].mxu1 %v7502_v30  ;;  %v9082_v30 = vld [vmem:[%s13268_s1 + $0x3e4] ss:$16 sps:$4 sm:$0xff]  }
  0x53   :  { %2117 = vmatpush1.bf16.msra.mxu0 %v9014_v32  ;;  %2569 = vmatpush1.bf16.msra.mxu1 %v9017_v33  ;;  %v7489_v32 = vcombine.high %v54_v25, %v58_v27  ;;  %v9080_v33 = vld [vmem:[%s13268_s1 + $0x3e0] ss:$16 sps:$4 sm:$0xff]  }
  0x54   :  { %2118 = vmatprep.subr.bf16.mxu0 %v9022_v34  ;;  %2570 = vmatprep.subr.bf16.mxu1 %v9025_v35  ;;  %v9083_v34 = vld [vmem:[%s13268_s1 + $0x3e8] ss:$16 sps:$4 sm:$0xff]   ;;  %v9088_v35 = vld [vmem:[%s13268_s1 + $0x404] ss:$16 sps:$4 sm:$0xff]  }
  0x55   :  { %2057 = vmatprep.mubr.bf16.mxu0 %v7511_v36  ;;  %2509 = vmatprep.mubr.bf16.mxu1 %v7511_v36  ;;  %v9091_v36 = vld [vmem:[%s13268_s1 + $0x40c] ss:$16 sps:$4 sm:$0xff]  }
  0x57   :  { %2119 = vmatpush1.bf16.msra.mxu0 %v9020_v37  ;;  %2571 = vmatpush1.bf16.msra.mxu1 %v9023_v38  ;;  %v62_v37 = vld [vmem:[%s13267_s0 + $0x48] sm:$0xff]  ;;  %v7488_v38 = vcombine.low %v54_v25, %v58_v27 }
  0x58   :  { %2120 = vmatprep.subr.bf16.mxu0 %v9028_v39  ;;  %2572 = vmatprep.subr.bf16.mxu1 %v9031_v40  ;;  %v66_v39 = vld [vmem:[%s13267_s0 + $0x68] sm:$0xff]  ;;  %v9086_v40 = vld [vmem:[%s13268_s1 + $0x400] ss:$16 sps:$4 sm:$0xff]  }
  0x59   :  { %v7497_v44 = vcombine.high %v62_v37, %v66_v39  ;;  %v98_v25 = vld [vmem:[%s13267_s0 + $0x168] sm:$0xff] }
  0x5a   :  { %2058 = vmatmul.mubr.bf16.gmra.mrb[12].mxu0 %v7510_v43  ;;  %2510 = vmatmul.mubr.bf16.gmra.mrb[12].mxu1 %v7510_v43  ;;  %v9097_v43 = vld [vmem:[%s13268_s1 + $0x42c] ss:$16 sps:$4 sm:$0xff]  }
  0x5b   :  { %2121 = vmatpush1.bf16.msra.mxu0 %v9026_v41  ;;  %2573 = vmatpush1.bf16.msra.mxu1 %v9029_v42  ;;  %v9089_v41 = vld [vmem:[%s13268_s1 + $0x408] ss:$16 sps:$4 sm:$0xff]   ;;  %v9094_v42 = vld [vmem:[%s13268_s1 + $0x424] ss:$16 sps:$4 sm:$0xff]   ;;  %v9145_v27 = vld [vmem:[%s13268_s1 + $0x52c] ss:$16 sps:$4 sm:$0xff]  }
  0x5c   :  { %2122 = vmatprep.subr.bf16.mxu0 %v9034_v46  ;;  %2574 = vmatprep.subr.bf16.mxu1 %v9037_v47  ;;  %v9095_v46 = vld [vmem:[%s13268_s1 + $0x428] ss:$16 sps:$4 sm:$0xff]   ;;  %v9100_v47 = vld [vmem:[%s13268_s1 + $0x444] ss:$16 sps:$4 sm:$0xff]  }
  0x5d   :  { %2067 = vmatprep.mubr.bf16.mxu0 %v7519_v48  ;;  %2519 = vmatprep.mubr.bf16.mxu1 %v7519_v48  ;;  %v9103_v48 = vld [vmem:[%s13268_s1 + $0x44c] ss:$16 sps:$4 sm:$0xff]  }
  0x5f   :  { %2123 = vmatpush1.bf16.msra.mxu0 %v9032_v49  ;;  %2575 = vmatpush1.bf16.msra.mxu1 %v9035_v50  ;;  %v9098_v49 = vld [vmem:[%s13268_s1 + $0x440] ss:$16 sps:$4 sm:$0xff]   ;;  %v9101_v50 = vld [vmem:[%s13268_s1 + $0x448] ss:$16 sps:$4 sm:$0xff]  }
  0x60   :  { %2124 = vmatprep.subr.bf16.mxu0 %v9040_v51  ;;  %2576 = vmatprep.subr.bf16.mxu1 %v9043_v52  ;;  %v7496_v51 = vcombine.low %v62_v37, %v66_v39  ;;  %v70_v52 = vld [vmem:[%s13267_s0 + $0x88] sm:$0xff] }
  0x61   :  { %v9149_v37 = vld [vmem:[%s13268_s1 + $0x548] ss:$16 sps:$4 sm:$0xff]   ;;  %v9157_v39 = vld [vmem:[%s13268_s1 + $0x56c] ss:$16 sps:$4 sm:$0xff]  }
  0x62   :  { %2068 = vmatmul.mubr.bf16.gmra.mrb[16].mxu0 %v7518_v54  ;;  %2520 = vmatmul.mubr.bf16.gmra.mrb[16].mxu1 %v7518_v54  ;;  %v9106_v54 = vld [vmem:[%s13268_s1 + $0x464] ss:$16 sps:$4 sm:$0xff]  }
  0x63   :  { %2125 = vmatpush1.bf16.msra.mxu0 %v9038_v56  ;;  %2577 = vmatpush1.bf16.msra.mxu1 %v9041_v57  ;;  %v7505_v56 = vcombine.high %v70_v52, %v74_v53  ;;  %v9104_v57 = vld [vmem:[%s13268_s1 + $0x460] ss:$16 sps:$4 sm:$0xff]  }
  0x64   :  { %2126 = vmatprep.subr.bf16.mxu0 %v9046_v58  ;;  %2578 = vmatprep.subr.bf16.mxu1 %v9049_v59  ;;  %v9107_v58 = vld [vmem:[%s13268_s1 + $0x468] ss:$16 sps:$4 sm:$0xff]   ;;  %v9112_v59 = vld [vmem:[%s13268_s1 + $0x484] ss:$16 sps:$4 sm:$0xff]  }
  0x65   :  { %2077 = vmatprep.mubr.bf16.mxu0 %v7527_v60  ;;  %2529 = vmatprep.mubr.bf16.mxu1 %v7527_v60  ;;  %v9115_v60 = vld [vmem:[%s13268_s1 + $0x48c] ss:$16 sps:$4 sm:$0xff]  }
  0x67   :  { %2127 = vmatpush1.bf16.msra.mxu0 %v9044_v61  ;;  %2579 = vmatpush1.bf16.msra.mxu1 %v9047_v62  ;;  %v78_v61 = vld [vmem:[%s13267_s0 + $0xc8] sm:$0xff]  ;;  %v7504_v62 = vcombine.low %v70_v52, %v74_v53  ;;  %v9164_v53 = vld [vmem:[%s13268_s1 + $0x5a0] ss:$16 sps:$4 sm:$0xff]  }
  0x68   :  { %2128 = vmatprep.subr.bf16.mxu0 %v9052_v63  ;;  %2580 = vmatprep.subr.bf16.mxu1 %v9055_v0  ;;  %v82_v63 = vld [vmem:[%s13267_s0 + $0xe8] sm:$0xff]  ;;  %v9110_v0 = vld [vmem:[%s13268_s1 + $0x480] ss:$16 sps:$4 sm:$0xff]  }
  0x6a   :  { %2078 = vmatmul.mubr.bf16.gmra.mrb[20].mxu0 %v7526_v2  ;;  %2530 = vmatmul.mubr.bf16.gmra.mrb[20].mxu1 %v7526_v2  ;;  %v9118_v2 = vld [vmem:[%s13268_s1 + $0x4a4] ss:$16 sps:$4 sm:$0xff]  }
  0x6b   :  { %2129 = vmatpush1.bf16.msra.mxu0 %v9050_v4  ;;  %2581 = vmatpush1.bf16.msra.mxu1 %v9053_v5  ;;  %v7513_v4 = vcombine.high %v78_v61, %v82_v63  ;;  %v9116_v5 = vld [vmem:[%s13268_s1 + $0x4a0] ss:$16 sps:$4 sm:$0xff]  }
  0x6c   :  { %2130 = vmatprep.subr.bf16.mxu0 %v9058_v6  ;;  %2582 = vmatprep.subr.bf16.mxu1 %v9061_v7  ;;  %v9119_v6 = vld [vmem:[%s13268_s1 + $0x4a8] ss:$16 sps:$4 sm:$0xff]   ;;  %v9124_v7 = vld [vmem:[%s13268_s1 + $0x4c4] ss:$16 sps:$4 sm:$0xff]  }
  0x6d   :  { %2087 = vmatprep.mubr.bf16.mxu0 %v7535_v8  ;;  %2539 = vmatprep.mubr.bf16.mxu1 %v7535_v8  ;;  %v9127_v8 = vld [vmem:[%s13268_s1 + $0x4cc] ss:$16 sps:$4 sm:$0xff]  }
  0x6f   :  { %2131 = vmatpush1.bf16.msra.mxu0 %v9056_v9  ;;  %2583 = vmatpush1.bf16.msra.mxu1 %v9059_v10  ;;  %v86_v9 = vld [vmem:[%s13267_s0 + $0x108] sm:$0xff]  ;;  %v7512_v10 = vcombine.low %v78_v61, %v82_v63  ;;  %v59_v61 = vld [vmem:[%s13267_s0 + $0x30] sm:$0xff] }
  0x70   :  { %2132 = vmatprep.subr.bf16.mxu0 %v9064_v11  ;;  %2584 = vmatprep.subr.bf16.mxu1 %v9067_v12  ;;  %v90_v11 = vld [vmem:[%s13267_s0 + $0x128] sm:$0xff]  ;;  %v9122_v12 = vld [vmem:[%s13268_s1 + $0x4c0] ss:$16 sps:$4 sm:$0xff]  }
  0x71   :  { %v7521_v16 = vcombine.high %v86_v9, %v90_v11  ;;  %v9181_v63 = vld [vmem:[%s13268_s1 + $0x5ec] ss:$16 sps:$4 sm:$0xff]  }
  0x72   :  { %2088 = vmatmul.mubr.bf16.gmra.mrb[24].mxu0 %v7534_v15  ;;  %2540 = vmatmul.mubr.bf16.gmra.mrb[24].mxu1 %v7534_v15  ;;  %v9133_v15 = vld [vmem:[%s13268_s1 + $0x4ec] ss:$16 sps:$4 sm:$0xff]  }
  0x73   :  { %2133 = vmatpush1.bf16.msra.mxu0 %v9062_v13  ;;  %2585 = vmatpush1.bf16.msra.mxu1 %v9065_v14  ;;  %v9125_v13 = vld [vmem:[%s13268_s1 + $0x4c8] ss:$16 sps:$4 sm:$0xff]   ;;  %v9130_v14 = vld [vmem:[%s13268_s1 + $0x4e4] ss:$16 sps:$4 sm:$0xff]  }
  0x74   :  { %2134 = vmatprep.subr.bf16.mxu0 %v9070_v18  ;;  %2586 = vmatprep.subr.bf16.mxu1 %v9073_v19  ;;  %v9131_v18 = vld [vmem:[%s13268_s1 + $0x4e8] ss:$16 sps:$4 sm:$0xff]   ;;  %v9136_v19 = vld [vmem:[%s13268_s1 + $0x504] ss:$16 sps:$4 sm:$0xff]  }
  0x75   :  { %2097 = vmatprep.mubr.bf16.mxu0 %v7543_v20  ;;  %2549 = vmatprep.mubr.bf16.mxu1 %v7543_v20  ;;  %v9139_v20 = vld [vmem:[%s13268_s1 + $0x50c] ss:$16 sps:$4 sm:$0xff]  }
  0x77   :  { %2135 = vmatpush1.bf16.msra.mxu0 %v9068_v21  ;;  %2587 = vmatpush1.bf16.msra.mxu1 %v9071_v22  ;;  %v9134_v21 = vld [vmem:[%s13268_s1 + $0x500] ss:$16 sps:$4 sm:$0xff]   ;;  %v9137_v22 = vld [vmem:[%s13268_s1 + $0x508] ss:$16 sps:$4 sm:$0xff]  }
  0x78   :  { %2136 = vmatprep.subr.bf16.mxu0 %v9076_v23  ;;  %2588 = vmatprep.subr.bf16.mxu1 %v9079_v24  ;;  %v7520_v23 = vcombine.low %v86_v9, %v90_v11  ;;  %v94_v24 = vld [vmem:[%s13267_s0 + $0x148] sm:$0xff]  ;;  %v67_v9 = vld [vmem:[%s13267_s0 + $0x70] sm:$0xff] }
  0x79   :  { %v9193_v11 = vld [vmem:[%s13268_s1 + $0x62c] ss:$16 sps:$4 sm:$0xff]  }
  0x7a   :  { %2098 = vmatmul.mubr.bf16.gmra.mrb[28].mxu0 %v7542_v26  ;;  %2550 = vmatmul.mubr.bf16.gmra.mrb[28].mxu1 %v7542_v26  ;;  %v9142_v26 = vld [vmem:[%s13268_s1 + $0x524] ss:$16 sps:$4 sm:$0xff]  }
  0x7b   :  { %2137 = vmatpush1.bf16.msra.mxu0 %v9074_v28  ;;  %2589 = vmatpush1.bf16.msra.mxu1 %v9077_v29  ;;  %v7529_v28 = vcombine.high %v94_v24, %v98_v25  ;;  %v9140_v29 = vld [vmem:[%s13268_s1 + $0x520] ss:$16 sps:$4 sm:$0xff]  }
  0x7c   :  { %2138 = vmatprep.subr.bf16.mxu0 %v9082_v30  ;;  %2590 = vmatprep.subr.bf16.mxu1 %v9085_v31  ;;  %v9143_v30 = vld [vmem:[%s13268_s1 + $0x528] ss:$16 sps:$4 sm:$0xff]   ;;  %v9148_v31 = vld [vmem:[%s13268_s1 + $0x544] ss:$16 sps:$4 sm:$0xff]  }
  0x7d   :  { %2140 = vmatprep.mubr.bf16.mxu0 %v7489_v32  ;;  %2592 = vmatprep.mubr.bf16.mxu1 %v7489_v32  ;;  %v9151_v32 = vld [vmem:[%s13268_s1 + $0x54c] ss:$16 sps:$4 sm:$0xff]  }
  0x7f   :  { %2139 = vmatpush1.bf16.msra.mxu0 %v9080_v33  ;;  %2591 = vmatpush1.bf16.msra.mxu1 %v9083_v34  ;;  %v102_v33 = vld [vmem:[%s13267_s0 + $0x188] sm:$0xff]  ;;  %v7528_v34 = vcombine.low %v94_v24, %v98_v25  ;;  %v9200_v25 = vld [vmem:[%s13268_s1 + $0x660] ss:$16 sps:$4 sm:$0xff]  }
  0x80   :  { %2221 = vmatprep.subr.bf16.mxu0 %v9088_v35  ;;  %2673 = vmatprep.subr.bf16.mxu1 %v9091_v36  ;;  %v106_v35 = vld [vmem:[%s13267_s0 + $0x1a8] sm:$0xff]  ;;  %v9146_v36 = vld [vmem:[%s13268_s1 + $0x540] ss:$16 sps:$4 sm:$0xff]  }
  0x82   :  { %2141 = vmatmul.mubr.bf16.vlgmr.msra.gmra.mrb[0].mxu0 %v7488_v38  ;;  %2593 = vmatmul.mubr.bf16.vlgmr.msra.gmra.mrb[0].mxu1 %v7488_v38  ;;  %v9154_v38 = vld [vmem:[%s13268_s1 + $0x564] ss:$16 sps:$4 sm:$0xff]  }
  0x83   :  { %2222 = vmatpush1.bf16.msra.mxu0 %v9086_v40  ;;  %2674 = vmatpush1.bf16.msra.mxu1 %v9089_v41  ;;  %v7537_v40 = vcombine.high %v102_v33, %v106_v35  ;;  %v9152_v41 = vld [vmem:[%s13268_s1 + $0x560] ss:$16 sps:$4 sm:$0xff]  }
  0x84   :  { %2223 = vmatprep.subr.bf16.mxu0 %v9094_v42  ;;  %2675 = vmatprep.subr.bf16.mxu1 %v9097_v43  ;;  %v9155_v42 = vld [vmem:[%s13268_s1 + $0x568] ss:$16 sps:$4 sm:$0xff]   ;;  %v9160_v43 = vld [vmem:[%s13268_s1 + $0x584] ss:$16 sps:$4 sm:$0xff]  }
  0x85   :  { %2150 = vmatprep.mubr.bf16.mxu0 %v7497_v44  ;;  %2602 = vmatprep.mubr.bf16.mxu1 %v7497_v44  ;;  %v9163_v44 = vld [vmem:[%s13268_s1 + $0x58c] ss:$16 sps:$4 sm:$0xff]  }
  0x87   :  { %2224 = vmatpush1.bf16.msra.mxu0 %v9092_v45  ;;  %2676 = vmatpush1.bf16.msra.mxu1 %v9095_v46  ;;  %v110_v45 = vld [vmem:[%s13267_s0 + $0x1c8] sm:$0xff]  ;;  %v7536_v46 = vcombine.low %v102_v33, %v106_v35  ;;  %v83_v33 = vld [vmem:[%s13267_s0 + $0xf0] sm:$0xff] }
  0x88   :  { %2225 = vmatprep.subr.bf16.mxu0 %v9100_v47  ;;  %2677 = vmatprep.subr.bf16.mxu1 %v9103_v48  ;;  %v114_v47 = vld [vmem:[%s13267_s0 + $0x1e8] sm:$0xff]  ;;  %v9158_v48 = vld [vmem:[%s13268_s1 + $0x580] ss:$16 sps:$4 sm:$0xff]  }
  0x89   :  { %v7545_v52 = vcombine.high %v110_v45, %v114_v47  ;;  %v9217_v35 = vld [vmem:[%s13268_s1 + $0x6ac] ss:$16 sps:$4 sm:$0xff]  }
  0x8a   :  { %2151 = vmatmul.mubr.bf16.gmra.mrb[4].mxu0 %v7496_v51  ;;  %2603 = vmatmul.mubr.bf16.gmra.mrb[4].mxu1 %v7496_v51  ;;  %v9169_v51 = vld [vmem:[%s13268_s1 + $0x5ac] ss:$16 sps:$4 sm:$0xff]  }
  0x8b   :  { %2226 = vmatpush1.bf16.msra.mxu0 %v9098_v49  ;;  %2678 = vmatpush1.bf16.msra.mxu1 %v9101_v50  ;;  %v9161_v49 = vld [vmem:[%s13268_s1 + $0x588] ss:$16 sps:$4 sm:$0xff]   ;;  %v9166_v50 = vld [vmem:[%s13268_s1 + $0x5a4] ss:$16 sps:$4 sm:$0xff]  }
  0x8c   :  { %2227 = vmatprep.subr.bf16.mxu0 %v9106_v54  ;;  %2679 = vmatprep.subr.bf16.mxu1 %v9109_v55  ;;  %v9167_v54 = vld [vmem:[%s13268_s1 + $0x5a8] ss:$16 sps:$4 sm:$0xff]   ;;  %v9172_v55 = vld [vmem:[%s13268_s1 + $0x5c4] ss:$16 sps:$4 sm:$0xff]  }
  0x8d   :  { %2160 = vmatprep.mubr.bf16.mxu0 %v7505_v56  ;;  %2612 = vmatprep.mubr.bf16.mxu1 %v7505_v56  ;;  %v9175_v56 = vld [vmem:[%s13268_s1 + $0x5cc] ss:$16 sps:$4 sm:$0xff]  }
  0x8f   :  { %2228 = vmatpush1.bf16.msra.mxu0 %v9104_v57  ;;  %2680 = vmatpush1.bf16.msra.mxu1 %v9107_v58  ;;  %v9170_v57 = vld [vmem:[%s13268_s1 + $0x5c0] ss:$16 sps:$4 sm:$0xff]   ;;  %v9173_v58 = vld [vmem:[%s13268_s1 + $0x5c8] ss:$16 sps:$4 sm:$0xff]  }
  0x90   :  { %2229 = vmatprep.subr.bf16.mxu0 %v9112_v59  ;;  %2681 = vmatprep.subr.bf16.mxu1 %v9115_v60  ;;  %v7544_v59 = vcombine.low %v110_v45, %v114_v47  ;;  %v55_v60 = vld [vmem:[%s13267_s0 + $0x10] sm:$0xff]  ;;  %v9229_v47 = vld [vmem:[%s13268_s1 + $0x6ec] ss:$16 sps:$4 sm:$0xff]  }
  0x91   :  { %v91_v45 = vld [vmem:[%s13267_s0 + $0x130] sm:$0xff] }
  0x92   :  { %2161 = vmatmul.mubr.bf16.gmra.mrb[8].mxu0 %v7504_v62  ;;  %2613 = vmatmul.mubr.bf16.gmra.mrb[8].mxu1 %v7504_v62  ;;  %v9178_v62 = vld [vmem:[%s13268_s1 + $0x5e4] ss:$16 sps:$4 sm:$0xff]  }
  0x93   :  { %2230 = vmatpush1.bf16.msra.mxu0 %v9110_v0  ;;  %2682 = vmatpush1.bf16.msra.mxu1 %v9113_v1  ;;  %v7491_v0 = vcombine.high %v55_v60, %v59_v61  ;;  %v9176_v1 = vld [vmem:[%s13268_s1 + $0x5e0] ss:$16 sps:$4 sm:$0xff]  }
  0x94   :  { %2231 = vmatprep.subr.bf16.mxu0 %v9118_v2  ;;  %2683 = vmatprep.subr.bf16.mxu1 %v9121_v3  ;;  %v9179_v2 = vld [vmem:[%s13268_s1 + $0x5e8] ss:$16 sps:$4 sm:$0xff]   ;;  %v9184_v3 = vld [vmem:[%s13268_s1 + $0x604] ss:$16 sps:$4 sm:$0xff]  }
  0x95   :  { %2170 = vmatprep.mubr.bf16.mxu0 %v7513_v4  ;;  %2622 = vmatprep.mubr.bf16.mxu1 %v7513_v4  ;;  %v9187_v4 = vld [vmem:[%s13268_s1 + $0x60c] ss:$16 sps:$4 sm:$0xff]  }
  0x97   :  { %2232 = vmatpush1.bf16.msra.mxu0 %v9116_v5  ;;  %2684 = vmatpush1.bf16.msra.mxu1 %v9119_v6  ;;  %v9182_v5 = vld [vmem:[%s13268_s1 + $0x600] ss:$16 sps:$4 sm:$0xff]   ;;  %v7490_v6 = vcombine.low %v55_v60, %v59_v61 }
  0x98   :  { %2233 = vmatprep.subr.bf16.mxu0 %v9124_v7  ;;  %2685 = vmatprep.subr.bf16.mxu1 %v9127_v8  ;;  %v9185_v7 = vld [vmem:[%s13268_s1 + $0x608] ss:$16 sps:$4 sm:$0xff]   ;;  %v63_v8 = vld [vmem:[%s13267_s0 + $0x50] sm:$0xff] }
  0x99   :  { %v9236_v60 = vld [vmem:[%s13268_s1 + $0x720] ss:$16 sps:$4 sm:$0xff]  }
  0x9a   :  { %2171 = vmatmul.mubr.bf16.gmra.mrb[12].mxu0 %v7512_v10  ;;  %2623 = vmatmul.mubr.bf16.gmra.mrb[12].mxu1 %v7512_v10  ;;  %v9190_v10 = vld [vmem:[%s13268_s1 + $0x624] ss:$16 sps:$4 sm:$0xff]  }
  0x9b   :  { %2234 = vmatpush1.bf16.msra.mxu0 %v9122_v12  ;;  %2686 = vmatpush1.bf16.msra.mxu1 %v9125_v13  ;;  %v7499_v12 = vcombine.high %v63_v8, %v67_v9  ;;  %v9188_v13 = vld [vmem:[%s13268_s1 + $0x620] ss:$16 sps:$4 sm:$0xff]  }
  0x9c   :  { %2235 = vmatprep.subr.bf16.mxu0 %v9130_v14  ;;  %2687 = vmatprep.subr.bf16.mxu1 %v9133_v15  ;;  %v9191_v14 = vld [vmem:[%s13268_s1 + $0x628] ss:$16 sps:$4 sm:$0xff]   ;;  %v9196_v15 = vld [vmem:[%s13268_s1 + $0x644] ss:$16 sps:$4 sm:$0xff]  }
  0x9d   :  { %2180 = vmatprep.mubr.bf16.mxu0 %v7521_v16  ;;  %2632 = vmatprep.mubr.bf16.mxu1 %v7521_v16  ;;  %v9199_v16 = vld [vmem:[%s13268_s1 + $0x64c] ss:$16 sps:$4 sm:$0xff]  }
  0x9f   :  { %2236 = vmatpush1.bf16.msra.mxu0 %v9128_v17  ;;  %2688 = vmatpush1.bf16.msra.mxu1 %v9131_v18  ;;  %v9194_v17 = vld [vmem:[%s13268_s1 + $0x640] ss:$16 sps:$4 sm:$0xff]   ;;  %v9197_v18 = vld [vmem:[%s13268_s1 + $0x648] ss:$16 sps:$4 sm:$0xff]  }
  0xa0   :  { %2237 = vmatprep.subr.bf16.mxu0 %v9136_v19  ;;  %2689 = vmatprep.subr.bf16.mxu1 %v9139_v20  ;;  %v7498_v19 = vcombine.low %v63_v8, %v67_v9  ;;  %v71_v20 = vld [vmem:[%s13267_s0 + $0x90] sm:$0xff]  ;;  %v9251_v9 = vld [vmem:[%s13268_s1 + $0x768] ss:$16 sps:$4 sm:$0xff]  }
  0xa1   :  { %v9248_v8 = vld [vmem:[%s13268_s1 + $0x760] ss:$16 sps:$4 sm:$0xff]  }
  0xa2   :  { %2181 = vmatmul.mubr.bf16.gmra.mrb[16].mxu0 %v7520_v23  ;;  %2633 = vmatmul.mubr.bf16.gmra.mrb[16].mxu1 %v7520_v23  ;;  %v9205_v23 = vld [vmem:[%s13268_s1 + $0x66c] ss:$16 sps:$4 sm:$0xff]  }
  0xa3   :  { %2238 = vmatpush1.bf16.msra.mxu0 %v9134_v21  ;;  %2690 = vmatpush1.bf16.msra.mxu1 %v9137_v22  ;;  %v75_v21 = vld [vmem:[%s13267_s0 + $0xb0] sm:$0xff] }
  0xa4   :  { %2239 = vmatprep.subr.bf16.mxu0 %v9142_v26  ;;  %2691 = vmatprep.subr.bf16.mxu1 %v9145_v27  ;;  %v9202_v22 = vld [vmem:[%s13268_s1 + $0x664] ss:$16 sps:$4 sm:$0xff]   ;;  %v7507_v24 = vcombine.high %v71_v20, %v75_v21  ;;  %v9203_v26 = vld [vmem:[%s13268_s1 + $0x668] ss:$16 sps:$4 sm:$0xff]  }
  0xa5   :  { %2190 = vmatprep.mubr.bf16.mxu0 %v7529_v28  ;;  %2642 = vmatprep.mubr.bf16.mxu1 %v7529_v28  ;;  %v9208_v27 = vld [vmem:[%s13268_s1 + $0x684] ss:$16 sps:$4 sm:$0xff]   ;;  %v9211_v28 = vld [vmem:[%s13268_s1 + $0x68c] ss:$16 sps:$4 sm:$0xff]  }
  0xa7   :  { %2240 = vmatpush1.bf16.msra.mxu0 %v9140_v29  ;;  %2692 = vmatpush1.bf16.msra.mxu1 %v9143_v30  ;;  %v9206_v29 = vld [vmem:[%s13268_s1 + $0x680] ss:$16 sps:$4 sm:$0xff]   ;;  %v9209_v30 = vld [vmem:[%s13268_s1 + $0x688] ss:$16 sps:$4 sm:$0xff]  }
  0xa8   :  { %2241 = vmatprep.subr.bf16.mxu0 %v9148_v31  ;;  %2693 = vmatprep.subr.bf16.mxu1 %v9151_v32  ;;  %v7506_v31 = vcombine.low %v71_v20, %v75_v21  ;;  %v79_v32 = vld [vmem:[%s13267_s0 + $0xd0] sm:$0xff]  ;;  %v9263_v21 = vld [vmem:[%s13268_s1 + $0x7a8] ss:$16 sps:$4 sm:$0xff]  }
  0xa9   :  { %v9260_v20 = vld [vmem:[%s13268_s1 + $0x7a0] ss:$16 sps:$4 sm:$0xff]  }
  0xaa   :  { %2191 = vmatmul.mubr.bf16.gmra.mrb[20].mxu0 %v7528_v34  ;;  %2643 = vmatmul.mubr.bf16.gmra.mrb[20].mxu1 %v7528_v34  ;;  %v9214_v34 = vld [vmem:[%s13268_s1 + $0x6a4] ss:$16 sps:$4 sm:$0xff]  }
  0xab   :  { %2242 = vmatpush1.bf16.msra.mxu0 %v9146_v36  ;;  %2694 = vmatpush1.bf16.msra.mxu1 %v9149_v37  ;;  %v7515_v36 = vcombine.high %v79_v32, %v83_v33  ;;  %v9212_v37 = vld [vmem:[%s13268_s1 + $0x6a0] ss:$16 sps:$4 sm:$0xff]  }
  0xac   :  { %2243 = vmatprep.subr.bf16.mxu0 %v9154_v38  ;;  %2695 = vmatprep.subr.bf16.mxu1 %v9157_v39  ;;  %v9215_v38 = vld [vmem:[%s13268_s1 + $0x6a8] ss:$16 sps:$4 sm:$0xff]   ;;  %v9220_v39 = vld [vmem:[%s13268_s1 + $0x6c4] ss:$16 sps:$4 sm:$0xff]  }
  0xad   :  { %2200 = vmatprep.mubr.bf16.mxu0 %v7537_v40  ;;  %2652 = vmatprep.mubr.bf16.mxu1 %v7537_v40  ;;  %v9223_v40 = vld [vmem:[%s13268_s1 + $0x6cc] ss:$16 sps:$4 sm:$0xff]  }
  0xaf   :  { %2244 = vmatpush1.bf16.msra.mxu0 %v9152_v41  ;;  %2696 = vmatpush1.bf16.msra.mxu1 %v9155_v42  ;;  %v9218_v41 = vld [vmem:[%s13268_s1 + $0x6c0] ss:$16 sps:$4 sm:$0xff]   ;;  %v9221_v42 = vld [vmem:[%s13268_s1 + $0x6c8] ss:$16 sps:$4 sm:$0xff]  }
  0xb0   :  { %2245 = vmatprep.subr.bf16.mxu0 %v9160_v43  ;;  %2697 = vmatprep.subr.bf16.mxu1 %v9163_v44  ;;  %v7514_v43 = vcombine.low %v79_v32, %v83_v33  ;;  %v87_v44 = vld [vmem:[%s13267_s0 + $0x110] sm:$0xff]  ;;  %v9275_v33 = vld [vmem:[%s13268_s1 + $0x7e8] ss:$16 sps:$4 sm:$0xff]  }
  0xb1   :  { %v9272_v32 = vld [vmem:[%s13268_s1 + $0x7e0] ss:$16 sps:$4 sm:$0xff]  }
  0xb2   :  { %2201 = vmatmul.mubr.bf16.gmra.mrb[24].mxu0 %v7536_v46  ;;  %2653 = vmatmul.mubr.bf16.gmra.mrb[24].mxu1 %v7536_v46  ;;  %v9226_v46 = vld [vmem:[%s13268_s1 + $0x6e4] ss:$16 sps:$4 sm:$0xff]  }
  0xb3   :  { %2246 = vmatpush1.bf16.msra.mxu0 %v9158_v48  ;;  %2698 = vmatpush1.bf16.msra.mxu1 %v9161_v49  ;;  %v7523_v48 = vcombine.high %v87_v44, %v91_v45  ;;  %v9224_v49 = vld [vmem:[%s13268_s1 + $0x6e0] ss:$16 sps:$4 sm:$0xff]  }
  0xb4   :  { %2247 = vmatprep.subr.bf16.mxu0 %v9166_v50  ;;  %2699 = vmatprep.subr.bf16.mxu1 %v9169_v51  ;;  %v9227_v50 = vld [vmem:[%s13268_s1 + $0x6e8] ss:$16 sps:$4 sm:$0xff]   ;;  %v9232_v51 = vld [vmem:[%s13268_s1 + $0x704] ss:$16 sps:$4 sm:$0xff]  }
  0xb5   :  { %2210 = vmatprep.mubr.bf16.mxu0 %v7545_v52  ;;  %2662 = vmatprep.mubr.bf16.mxu1 %v7545_v52  ;;  %v9235_v52 = vld [vmem:[%s13268_s1 + $0x70c] ss:$16 sps:$4 sm:$0xff]  }
  0xb7   :  { %2248 = vmatpush1.bf16.msra.mxu0 %v9164_v53  ;;  %2700 = vmatpush1.bf16.msra.mxu1 %v9167_v54  ;;  %v9230_v53 = vld [vmem:[%s13268_s1 + $0x700] ss:$16 sps:$4 sm:$0xff]   ;;  %v9233_v54 = vld [vmem:[%s13268_s1 + $0x708] ss:$16 sps:$4 sm:$0xff]  }
  0xb8   :  { %2249 = vmatprep.subr.bf16.mxu0 %v9172_v55  ;;  %2701 = vmatprep.subr.bf16.mxu1 %v9175_v56  ;;  %v7522_v55 = vcombine.low %v87_v44, %v91_v45  ;;  %v95_v56 = vld [vmem:[%s13267_s0 + $0x150] sm:$0xff]  ;;  %v9289_v44 = vld [vmem:[%s13270_s3 + $0x2c] ss:$16 sps:$4 sm:$0xff]  }
  0xb9   :  { %v72_v45 = vld [vmem:[%s13267_s0 + $0x98] sm:$0xff] }
  0xba   :  { %2211 = vmatmul.mubr.bf16.gmra.mrb[28].mxu0 %v7544_v59  ;;  %2663 = vmatmul.mubr.bf16.gmra.mrb[28].mxu1 %v7544_v59  ;;  %v9241_v59 = vld [vmem:[%s13268_s1 + $0x72c] ss:$16 sps:$4 sm:$0xff]  }
  0xbb   :  { %2250 = vmatpush1.bf16.msra.mxu0 %v9170_v57  ;;  %2702 = vmatpush1.bf16.msra.mxu1 %v9173_v58  ;;  %v99_v57 = vld [vmem:[%s13267_s0 + $0x170] sm:$0xff] }
  0xbc   :  { %2251 = vmatprep.subr.bf16.mxu0 %v9178_v62  ;;  %2703 = vmatprep.subr.bf16.mxu1 %v9181_v63  ;;  %v9238_v58 = vld [vmem:[%s13268_s1 + $0x724] ss:$16 sps:$4 sm:$0xff]   ;;  %v7531_v61 = vcombine.high %v95_v56, %v99_v57  ;;  %v9239_v62 = vld [vmem:[%s13268_s1 + $0x728] ss:$16 sps:$4 sm:$0xff]  }
  0xbd   :  { %2253 = vmatprep.mubr.bf16.mxu0 %v7491_v0  ;;  %2705 = vmatprep.mubr.bf16.mxu1 %v7491_v0  ;;  %v9244_v63 = vld [vmem:[%s13268_s1 + $0x744] ss:$16 sps:$4 sm:$0xff]   ;;  %v9247_v0 = vld [vmem:[%s13268_s1 + $0x74c] ss:$16 sps:$4 sm:$0xff]  }
  0xbf   :  { %2252 = vmatpush1.bf16.msra.mxu0 %v9176_v1  ;;  %2704 = vmatpush1.bf16.msra.mxu1 %v9179_v2  ;;  %v103_v1 = vld [vmem:[%s13267_s0 + $0x190] sm:$0xff] }
  0xc0   :  { %2334 = vmatprep.subr.bf16.mxu0 %v9184_v3  ;;  %2786 = vmatprep.subr.bf16.mxu1 %v9187_v4  ;;  %v107_v2 = vld [vmem:[%s13267_s0 + $0x1b0] sm:$0xff]  ;;  %v9245_v4 = vld [vmem:[%s13268_s1 + $0x748] ss:$16 sps:$4 sm:$0xff]  }
  0xc1   :  { %v9242_v3 = vld [vmem:[%s13268_s1 + $0x740] ss:$16 sps:$4 sm:$0xff]  }
  0xc2   :  { %2254 = vmatmul.mubr.bf16.vlgmr.msra.gmra.mrb[0].mxu0 %v7490_v6  ;;  %2706 = vmatmul.mubr.bf16.vlgmr.msra.gmra.mrb[0].mxu1 %v7490_v6  ;;  %v9250_v6 = vld [vmem:[%s13268_s1 + $0x764] ss:$16 sps:$4 sm:$0xff]  }
  0xc3   :  { %2335 = vmatpush1.bf16.msra.mxu0 %v9182_v5  ;;  %2787 = vmatpush1.bf16.msra.mxu1 %v9185_v7  ;;  %v7530_v5 = vcombine.low %v95_v56, %v99_v57  ;;  %v9253_v7 = vld [vmem:[%s13268_s1 + $0x76c] ss:$16 sps:$4 sm:$0xff]  }
  0xc4   :  { %2336 = vmatprep.subr.bf16.mxu0 %v9190_v10  ;;  %2788 = vmatprep.subr.bf16.mxu1 %v9193_v11  ;;  %v7539_v10 = vcombine.high %v103_v1, %v107_v2  ;;  %v9256_v11 = vld [vmem:[%s13268_s1 + $0x784] ss:$16 sps:$4 sm:$0xff]   ;;  %v9301_v56 = vld [vmem:[%s13270_s3 + $0x6c] ss:$16 sps:$4 sm:$0xff]  }
  0xc5   :  { %2263 = vmatprep.mubr.bf16.mxu0 %v7499_v12  ;;  %2715 = vmatprep.mubr.bf16.mxu1 %v7499_v12  ;;  %v9259_v12 = vld [vmem:[%s13268_s1 + $0x78c] ss:$16 sps:$4 sm:$0xff]  }
  0xc6   :  { %v80_v57 = vld [vmem:[%s13267_s0 + $0xd8] sm:$0xff] }
  0xc7   :  { %2337 = vmatpush1.bf16.msra.mxu0 %v9188_v13  ;;  %2789 = vmatpush1.bf16.msra.mxu1 %v9191_v14  ;;  %v111_v13 = vld [vmem:[%s13267_s0 + $0x1d0] sm:$0xff] }
  0xc8   :  { %2338 = vmatprep.subr.bf16.mxu0 %v9196_v15  ;;  %2790 = vmatprep.subr.bf16.mxu1 %v9199_v16  ;;  %v115_v14 = vld [vmem:[%s13267_s0 + $0x1f0] sm:$0xff]  ;;  %v9257_v16 = vld [vmem:[%s13268_s1 + $0x788] ss:$16 sps:$4 sm:$0xff]  }
  0xc9   :  { %v9254_v15 = vld [vmem:[%s13268_s1 + $0x780] ss:$16 sps:$4 sm:$0xff]  }
  0xca   :  { %2264 = vmatmul.mubr.bf16.gmra.mrb[4].mxu0 %v7498_v19  ;;  %2716 = vmatmul.mubr.bf16.gmra.mrb[4].mxu1 %v7498_v19  ;;  %v9265_v19 = vld [vmem:[%s13268_s1 + $0x7ac] ss:$16 sps:$4 sm:$0xff]  }
  0xcb   :  { %2339 = vmatpush1.bf16.msra.mxu0 %v9194_v17  ;;  %2791 = vmatpush1.bf16.msra.mxu1 %v9197_v18  ;;  %v7538_v17 = vcombine.low %v103_v1, %v107_v2  ;;  %v9262_v18 = vld [vmem:[%s13268_s1 + $0x7a4] ss:$16 sps:$4 sm:$0xff]   ;;  %v9305_v1 = vld [vmem:[%s13270_s3 + $0x88] ss:$16 sps:$4 sm:$0xff]  }
  0xcc   :  { %2340 = vmatprep.subr.bf16.mxu0 %v9202_v22  ;;  %2792 = vmatprep.subr.bf16.mxu1 %v9205_v23  ;;  %v7547_v22 = vcombine.high %v111_v13, %v115_v14  ;;  %v9268_v23 = vld [vmem:[%s13268_s1 + $0x7c4] ss:$16 sps:$4 sm:$0xff]  }
  0xcd   :  { %2273 = vmatprep.mubr.bf16.mxu0 %v7507_v24  ;;  %2725 = vmatprep.mubr.bf16.mxu1 %v7507_v24  ;;  %v9271_v24 = vld [vmem:[%s13268_s1 + $0x7cc] ss:$16 sps:$4 sm:$0xff]  }
  0xcf   :  { %2341 = vmatpush1.bf16.msra.mxu0 %v9200_v25  ;;  %2793 = vmatpush1.bf16.msra.mxu1 %v9203_v26  ;;  %v56_v25 = vld [vmem:[%s13267_s0 + $0x18] sm:$0xff] }
  0xd0   :  { %2342 = vmatprep.subr.bf16.mxu0 %v9208_v27  ;;  %2794 = vmatprep.subr.bf16.mxu1 %v9211_v28  ;;  %v60_v26 = vld [vmem:[%s13267_s0 + $0x38] sm:$0xff]  ;;  %v9266_v27 = vld [vmem:[%s13268_s1 + $0x7c0] ss:$16 sps:$4 sm:$0xff]  }
  0xd1   :  { %v9269_v28 = vld [vmem:[%s13268_s1 + $0x7c8] ss:$16 sps:$4 sm:$0xff]  }
  0xd2   :  { %2274 = vmatmul.mubr.bf16.gmra.mrb[8].mxu0 %v7506_v31  ;;  %2726 = vmatmul.mubr.bf16.gmra.mrb[8].mxu1 %v7506_v31  ;;  %v9277_v31 = vld [vmem:[%s13268_s1 + $0x7ec] ss:$16 sps:$4 sm:$0xff]  }
  0xd3   :  { %2343 = vmatpush1.bf16.msra.mxu0 %v9206_v29  ;;  %2795 = vmatpush1.bf16.msra.mxu1 %v9209_v30  ;;  %v7546_v29 = vcombine.low %v111_v13, %v115_v14  ;;  %v9274_v30 = vld [vmem:[%s13268_s1 + $0x7e4] ss:$16 sps:$4 sm:$0xff]   ;;  %v9317_v13 = vld [vmem:[%s13270_s3 + $0xc8] ss:$16 sps:$4 sm:$0xff]  }
  0xd4   :  { %2344 = vmatprep.subr.bf16.mxu0 %v9214_v34  ;;  %2796 = vmatprep.subr.bf16.mxu1 %v9217_v35  ;;  %v7493_v34 = vcombine.high %v56_v25, %v60_v26  ;;  %v64_v35 = vld [vmem:[%s13267_s0 + $0x58] sm:$0xff] }
  0xd5   :  { %2283 = vmatprep.mubr.bf16.mxu0 %v7515_v36  ;;  %2735 = vmatprep.mubr.bf16.mxu1 %v7515_v36  ;;  %v68_v36 = vld [vmem:[%s13267_s0 + $0x78] sm:$0xff] }
  0xd7   :  { %2345 = vmatpush1.bf16.msra.mxu0 %v9212_v37  ;;  %2797 = vmatpush1.bf16.msra.mxu1 %v9215_v38  ;;  %v9280_v37 = vld [vmem:[%s13270_s3 + $0x4] ss:$16 sps:$4 sm:$0xff]   ;;  %v9283_v38 = vld [vmem:[%s13270_s3 + $0xc] ss:$16 sps:$4 sm:$0xff]  }
  0xd8   :  { %2346 = vmatprep.subr.bf16.mxu0 %v9220_v39  ;;  %2798 = vmatprep.subr.bf16.mxu1 %v9223_v40  ;;  %v7492_v39 = vcombine.low %v56_v25, %v60_v26  ;;  %v9278_v40 = vld [vmem:[%s13270_s3] ss:$16 sps:$4 sm:$0xff]   ;;  %v9329_v25 = vld [vmem:[%s13270_s3 + $0x108] ss:$16 sps:$4 sm:$0xff]  }
  0xda   :  { %2284 = vmatmul.mubr.bf16.gmra.mrb[12].mxu0 %v7514_v43  ;;  %2736 = vmatmul.mubr.bf16.gmra.mrb[12].mxu1 %v7514_v43  ;;  %v9286_v43 = vld [vmem:[%s13270_s3 + $0x24] ss:$16 sps:$4 sm:$0xff]  }
  0xdb   :  { %2347 = vmatpush1.bf16.msra.mxu0 %v9218_v41  ;;  %2799 = vmatpush1.bf16.msra.mxu1 %v9221_v42  ;;  %v9281_v41 = vld [vmem:[%s13270_s3 + $0x8] ss:$16 sps:$4 sm:$0xff]   ;;  %v7501_v42 = vcombine.high %v64_v35, %v68_v36 }
  0xdc   :  { %2348 = vmatprep.subr.bf16.mxu0 %v9226_v46  ;;  %2800 = vmatprep.subr.bf16.mxu1 %v9229_v47  ;;  %v76_v46 = vld [vmem:[%s13267_s0 + $0xb8] sm:$0xff]  ;;  %v9284_v47 = vld [vmem:[%s13270_s3 + $0x20] ss:$16 sps:$4 sm:$0xff]  }
  0xdd   :  { %2293 = vmatprep.mubr.bf16.mxu0 %v7523_v48  ;;  %2745 = vmatprep.mubr.bf16.mxu1 %v7523_v48  ;;  %v9287_v48 = vld [vmem:[%s13270_s3 + $0x28] ss:$16 sps:$4 sm:$0xff]  }
  0xdf   :  { %2349 = vmatpush1.bf16.msra.mxu0 %v9224_v49  ;;  %2801 = vmatpush1.bf16.msra.mxu1 %v9227_v50  ;;  %v9292_v49 = vld [vmem:[%s13270_s3 + $0x44] ss:$16 sps:$4 sm:$0xff]   ;;  %v9295_v50 = vld [vmem:[%s13270_s3 + $0x4c] ss:$16 sps:$4 sm:$0xff]  }
  0xe0   :  { %2350 = vmatprep.subr.bf16.mxu0 %v9232_v51  ;;  %2802 = vmatprep.subr.bf16.mxu1 %v9235_v52  ;;  %v7500_v51 = vcombine.low %v64_v35, %v68_v36  ;;  %v9290_v52 = vld [vmem:[%s13270_s3 + $0x40] ss:$16 sps:$4 sm:$0xff]  }
  0xe1   :  { %v9338_v36 = vld [vmem:[%s13270_s3 + $0x140] ss:$16 sps:$4 sm:$0xff]  }
  0xe2   :  { %2294 = vmatmul.mubr.bf16.gmra.mrb[16].mxu0 %v7522_v55  ;;  %2746 = vmatmul.mubr.bf16.gmra.mrb[16].mxu1 %v7522_v55  ;;  %v9298_v55 = vld [vmem:[%s13270_s3 + $0x64] ss:$16 sps:$4 sm:$0xff]  }
  0xe3   :  { %2351 = vmatpush1.bf16.msra.mxu0 %v9230_v53  ;;  %2803 = vmatpush1.bf16.msra.mxu1 %v9233_v54  ;;  %v9293_v53 = vld [vmem:[%s13270_s3 + $0x48] ss:$16 sps:$4 sm:$0xff]   ;;  %v7509_v54 = vcombine.high %v72_v45, %v76_v46 }
  0xe4   :  { %2352 = vmatprep.subr.bf16.mxu0 %v9238_v58  ;;  %2804 = vmatprep.subr.bf16.mxu1 %v9241_v59  ;;  %v84_v58 = vld [vmem:[%s13267_s0 + $0xf8] sm:$0xff]  ;;  %v9296_v59 = vld [vmem:[%s13270_s3 + $0x60] ss:$16 sps:$4 sm:$0xff]  }
  0xe5   :  { %2303 = vmatprep.mubr.bf16.mxu0 %v7531_v61  ;;  %2755 = vmatprep.mubr.bf16.mxu1 %v7531_v61  ;;  %v9304_v61 = vld [vmem:[%s13270_s3 + $0x84] ss:$16 sps:$4 sm:$0xff]   ;;  %v7517_v2 = vcombine.high %v80_v57, %v84_v58 }
  0xe7   :  { %2353 = vmatpush1.bf16.msra.mxu0 %v9236_v60  ;;  %2805 = vmatpush1.bf16.msra.mxu1 %v9239_v62  ;;  %v9299_v60 = vld [vmem:[%s13270_s3 + $0x68] ss:$16 sps:$4 sm:$0xff]   ;;  %v9307_v62 = vld [vmem:[%s13270_s3 + $0x8c] ss:$16 sps:$4 sm:$0xff]  }
  0xe8   :  { %2354 = vmatprep.subr.bf16.mxu0 %v9244_v63  ;;  %2806 = vmatprep.subr.bf16.mxu1 %v9247_v0  ;;  %v7508_v63 = vcombine.low %v72_v45, %v76_v46  ;;  %v9302_v0 = vld [vmem:[%s13270_s3 + $0x80] ss:$16 sps:$4 sm:$0xff]   ;;  %v9352_v45 = vld [vmem:[%s13270_s3 + $0x184] ss:$16 sps:$4 sm:$0xff]   ;;  %v9355_v46 = vld [vmem:[%s13270_s3 + $0x18c] ss:$16 sps:$4 sm:$0xff]  }
  0xea   :  { %2304 = vmatmul.mubr.bf16.gmra.mrb[20].mxu0 %v7530_v5  ;;  %2756 = vmatmul.mubr.bf16.gmra.mrb[20].mxu1 %v7530_v5  ;;  %v88_v5 = vld [vmem:[%s13267_s0 + $0x118] sm:$0xff] }
  0xeb   :  { %2355 = vmatpush1.bf16.msra.mxu0 %v9242_v3  ;;  %2807 = vmatpush1.bf16.msra.mxu1 %v9245_v4  ;;  %v9310_v3 = vld [vmem:[%s13270_s3 + $0xa4] ss:$16 sps:$4 sm:$0xff]   ;;  %v9313_v4 = vld [vmem:[%s13270_s3 + $0xac] ss:$16 sps:$4 sm:$0xff]  }
  0xec   :  { %2356 = vmatprep.subr.bf16.mxu0 %v9250_v6  ;;  %2808 = vmatprep.subr.bf16.mxu1 %v9253_v7  ;;  %v92_v6 = vld [vmem:[%s13267_s0 + $0x138] sm:$0xff]  ;;  %v9308_v7 = vld [vmem:[%s13270_s3 + $0xa0] ss:$16 sps:$4 sm:$0xff]  }
  0xed   :  { %2313 = vmatprep.mubr.bf16.mxu0 %v7539_v10  ;;  %2765 = vmatprep.mubr.bf16.mxu1 %v7539_v10  ;;  %v9319_v10 = vld [vmem:[%s13270_s3 + $0xcc] ss:$16 sps:$4 sm:$0xff]   ;;  %v7525_v14 = vcombine.high %v88_v5, %v92_v6 }
  0xef   :  { %2357 = vmatpush1.bf16.msra.mxu0 %v9248_v8  ;;  %2809 = vmatpush1.bf16.msra.mxu1 %v9251_v9  ;;  %v9311_v8 = vld [vmem:[%s13270_s3 + $0xa8] ss:$16 sps:$4 sm:$0xff]   ;;  %v9316_v9 = vld [vmem:[%s13270_s3 + $0xc4] ss:$16 sps:$4 sm:$0xff]  }
  0xf0   :  { %2358 = vmatprep.subr.bf16.mxu0 %v9256_v11  ;;  %2810 = vmatprep.subr.bf16.mxu1 %v9259_v12  ;;  %v7516_v11 = vcombine.low %v80_v57, %v84_v58  ;;  %v9314_v12 = vld [vmem:[%s13270_s3 + $0xc0] ss:$16 sps:$4 sm:$0xff]   ;;  %v9367_v57 = vld [vmem:[%s13270_s3 + $0x1cc] ss:$16 sps:$4 sm:$0xff]  }
  0xf1   :  { %v9362_v58 = vld [vmem:[%s13270_s3 + $0x1c0] ss:$16 sps:$4 sm:$0xff]  }
  0xf2   :  { %2314 = vmatmul.mubr.bf16.gmra.mrb[24].mxu0 %v7538_v17  ;;  %2766 = vmatmul.mubr.bf16.gmra.mrb[24].mxu1 %v7538_v17  ;;  %v96_v17 = vld [vmem:[%s13267_s0 + $0x158] sm:$0xff] }
  0xf3   :  { %2359 = vmatpush1.bf16.msra.mxu0 %v9254_v15  ;;  %2811 = vmatpush1.bf16.msra.mxu1 %v9257_v16  ;;  %v9322_v15 = vld [vmem:[%s13270_s3 + $0xe4] ss:$16 sps:$4 sm:$0xff]   ;;  %v9325_v16 = vld [vmem:[%s13270_s3 + $0xec] ss:$16 sps:$4 sm:$0xff]  }
  0xf4   :  { %2360 = vmatprep.subr.bf16.mxu0 %v9262_v18  ;;  %2812 = vmatprep.subr.bf16.mxu1 %v9265_v19  ;;  %v100_v18 = vld [vmem:[%s13267_s0 + $0x178] sm:$0xff]  ;;  %v9320_v19 = vld [vmem:[%s13270_s3 + $0xe0] ss:$16 sps:$4 sm:$0xff]  }
  0xf5   :  { %2323 = vmatprep.mubr.bf16.mxu0 %v7547_v22  ;;  %2775 = vmatprep.mubr.bf16.mxu1 %v7547_v22  ;;  %v9331_v22 = vld [vmem:[%s13270_s3 + $0x10c] ss:$16 sps:$4 sm:$0xff]   ;;  %v7533_v26 = vcombine.high %v96_v17, %v100_v18  ;;  %v7532_v35 = vcombine.low %v96_v17, %v100_v18 }
  0xf7   :  { %2361 = vmatpush1.bf16.msra.mxu0 %v9260_v20  ;;  %2813 = vmatpush1.bf16.msra.mxu1 %v9263_v21  ;;  %v9323_v20 = vld [vmem:[%s13270_s3 + $0xe8] ss:$16 sps:$4 sm:$0xff]   ;;  %v9328_v21 = vld [vmem:[%s13270_s3 + $0x104] ss:$16 sps:$4 sm:$0xff]  }
  0xf8   :  { %2362 = vmatprep.subr.bf16.mxu0 %v9268_v23  ;;  %2814 = vmatprep.subr.bf16.mxu1 %v9271_v24  ;;  %v7524_v23 = vcombine.low %v88_v5, %v92_v6  ;;  %v9326_v24 = vld [vmem:[%s13270_s3 + $0x100] ss:$16 sps:$4 sm:$0xff]  }
  0xfa   :  { %2324 = vmatmul.mubr.bf16.gmra.mrb[28].mxu0 %v7546_v29  ;;  %2776 = vmatmul.mubr.bf16.gmra.mrb[28].mxu1 %v7546_v29  ;;  %v104_v29 = vld [vmem:[%s13267_s0 + $0x198] sm:$0xff] }
  0xfb   :  { %2363 = vmatpush1.bf16.msra.mxu0 %v9266_v27  ;;  %2815 = vmatpush1.bf16.msra.mxu1 %v9269_v28  ;;  %v9334_v27 = vld [vmem:[%s13270_s3 + $0x124] ss:$16 sps:$4 sm:$0xff]   ;;  %v9337_v28 = vld [vmem:[%s13270_s3 + $0x12c] ss:$16 sps:$4 sm:$0xff]  }
  0xfc   :  { %2364 = vmatprep.subr.bf16.mxu0 %v9274_v30  ;;  %2816 = vmatprep.subr.bf16.mxu1 %v9277_v31  ;;  %v108_v30 = vld [vmem:[%s13267_s0 + $0x1b8] sm:$0xff]  ;;  %v9332_v31 = vld [vmem:[%s13270_s3 + $0x120] ss:$16 sps:$4 sm:$0xff]  }
  0xfd   :  { %2366 = vmatprep.mubr.bf16.mxu0 %v7493_v34  ;;  %2818 = vmatprep.mubr.bf16.mxu1 %v7493_v34  ;;  %v9343_v34 = vld [vmem:[%s13270_s3 + $0x14c] ss:$16 sps:$4 sm:$0xff]  }
  0xff   :  { %2365 = vmatpush1.bf16.msra.mxu0 %v9272_v32  ;;  %2817 = vmatpush1.bf16.msra.mxu1 %v9275_v33  ;;  %v9335_v32 = vld [vmem:[%s13270_s3 + $0x128] ss:$16 sps:$4 sm:$0xff]   ;;  %v9340_v33 = vld [vmem:[%s13270_s3 + $0x144] ss:$16 sps:$4 sm:$0xff]  }
 0x100   :  { %3785 = vmatprep.subr.bf16.mxu0 %v9280_v37  ;;  %4011 = vmatprep.subr.bf16.mxu1 %v9283_v38  ;;  %v9341_v37 = vld [vmem:[%s13270_s3 + $0x148] ss:$16 sps:$4 sm:$0xff]   ;;  %v7541_v38 = vcombine.high %v104_v29, %v108_v30 }
 0x102   :  { %2367 = vmatmul.mubr.bf16.vlgmr.msra.gmra.mrb[0].mxu0 %v7492_v39  ;;  %2819 = vmatmul.mubr.bf16.vlgmr.msra.gmra.mrb[0].mxu1 %v7492_v39  ;;  %v9346_v39 = vld [vmem:[%s13270_s3 + $0x164] ss:$16 sps:$4 sm:$0xff]  }
 0x103   :  { %2376 = vmatprep.mubr.bf16.mxu0 %v7501_v42  ;;  %2828 = vmatprep.mubr.bf16.mxu1 %v7501_v42  ;;  %v116_v42 = vld [vmem:[%s13267_s0 + $0x1f8] sm:$0xff] }
 0x104   :  { %3786 = vmatpush1.bf16.msra.mxu0 %v9278_v40  ;;  %4012 = vmatpush1.bf16.msra.mxu1 %v9281_v41  ;;  %v9349_v40 = vld [vmem:[%s13270_s3 + $0x16c] ss:$16 sps:$4 sm:$0xff]  }
 0x105   :  { %3787 = vmatprep.subr.bf16.mxu0 %v9286_v43  ;;  %4013 = vmatprep.subr.bf16.mxu1 %v9289_v44  ;;  %v112_v41 = vld [vmem:[%s13267_s0 + $0x1d8] sm:$0xff]  ;;  %v9344_v43 = vld [vmem:[%s13270_s3 + $0x160] ss:$16 sps:$4 sm:$0xff]  }
 0x106   :  { %v9347_v44 = vld [vmem:[%s13270_s3 + $0x168] ss:$16 sps:$4 sm:$0xff]  }
 0x108   :  { %3788 = vmatpush1.bf16.msra.mxu0 %v9284_v47  ;;  %4014 = vmatpush1.bf16.msra.mxu1 %v9287_v48  ;;  %v7540_v47 = vcombine.low %v104_v29, %v108_v30  ;;  %v9350_v48 = vld [vmem:[%s13270_s3 + $0x180] ss:$16 sps:$4 sm:$0xff]  }
 0x109   :  { %3789 = vmatprep.subr.bf16.mxu0 %v9292_v49  ;;  %4015 = vmatprep.subr.bf16.mxu1 %v9295_v50  ;;  %v9353_v49 = vld [vmem:[%s13270_s3 + $0x188] ss:$16 sps:$4 sm:$0xff]   ;;  %v7549_v50 = vcombine.high %v112_v41, %v116_v42 }
 0x10a   :  { %2377 = vmatmul.mubr.bf16.gmra.mrb[4].mxu0 %v7500_v51  ;;  %2829 = vmatmul.mubr.bf16.gmra.mrb[4].mxu1 %v7500_v51  ;;  %v9358_v51 = vld [vmem:[%s13270_s3 + $0x1a4] ss:$16 sps:$4 sm:$0xff]  }
 0x10b   :  { %2386 = vmatprep.mubr.bf16.mxu0 %v7509_v54  ;;  %2838 = vmatprep.mubr.bf16.mxu1 %v7509_v54  ;;  %v9359_v54 = vld [vmem:[%s13270_s3 + $0x1a8] ss:$16 sps:$4 sm:$0xff]  }
 0x10c   :  { %3790 = vmatpush1.bf16.msra.mxu0 %v9290_v52  ;;  %4016 = vmatpush1.bf16.msra.mxu1 %v9293_v53  ;;  %v9361_v52 = vld [vmem:[%s13270_s3 + $0x1ac] ss:$16 sps:$4 sm:$0xff]   ;;  %v9356_v53 = vld [vmem:[%s13270_s3 + $0x1a0] ss:$16 sps:$4 sm:$0xff]  }
 0x10d   :  { %3791 = vmatprep.subr.bf16.mxu0 %v9298_v55  ;;  %4017 = vmatprep.subr.bf16.mxu1 %v9301_v56  ;;  %v7548_v55 = vcombine.low %v112_v41, %v116_v42  ;;  %v9364_v56 = vld [vmem:[%s13270_s3 + $0x1c4] ss:$16 sps:$4 sm:$0xff]  }
 0x110   :  { %3792 = vmatpush1.bf16.msra.mxu0 %v9296_v59  ;;  %4018 = vmatpush1.bf16.msra.mxu1 %v9299_v60  ;;  %v9365_v59 = vld [vmem:[%s13270_s3 + $0x1c8] ss:$16 sps:$4 sm:$0xff]   ;;  %v9370_v60 = vld [vmem:[%s13270_s3 + $0x1e4] ss:$16 sps:$4 sm:$0xff]  }
 0x111   :  { %3793 = vmatprep.subr.bf16.mxu0 %v9304_v61  ;;  %4019 = vmatprep.subr.bf16.mxu1 %v9307_v62  ;;  %v9373_v61 = vld [vmem:[%s13270_s3 + $0x1ec] ss:$16 sps:$4 sm:$0xff]   ;;  %v9368_v62 = vld [vmem:[%s13270_s3 + $0x1e0] ss:$16 sps:$4 sm:$0xff]  }
 0x112   :  { %2387 = vmatmul.mubr.bf16.gmra.mrb[8].mxu0 %v7508_v63  ;;  %2839 = vmatmul.mubr.bf16.gmra.mrb[8].mxu1 %v7508_v63  ;;  %v9371_v63 = vld [vmem:[%s13270_s3 + $0x1e8] ss:$16 sps:$4 sm:$0xff]  }
 0x113   :  { %2396 = vmatprep.mubr.bf16.mxu0 %v7517_v2  ;;  %2848 = vmatprep.mubr.bf16.mxu1 %v7517_v2 }
 0x114   :  { %3794 = vmatpush1.bf16.msra.mxu0 %v9302_v0  ;;  %4020 = vmatpush1.bf16.msra.mxu1 %v9305_v1  ;;  %v9376_v0 = vld [vmem:[%s13270_s3 + $0x204] ss:$16 sps:$4 sm:$0xff]   ;;  %v9379_v1 = vld [vmem:[%s13270_s3 + $0x20c] ss:$16 sps:$4 sm:$0xff]  }
 0x115   :  { %3795 = vmatprep.subr.bf16.mxu0 %v9310_v3  ;;  %4021 = vmatprep.subr.bf16.mxu1 %v9313_v4 }
 0x118   :  { %3796 = vmatpush1.bf16.msra.mxu0 %v9308_v7  ;;  %4022 = vmatpush1.bf16.msra.mxu1 %v9311_v8 }
 0x119   :  { %3797 = vmatprep.subr.bf16.mxu0 %v9316_v9  ;;  %4023 = vmatprep.subr.bf16.mxu1 %v9319_v10 }
 0x11a   :  { %2397 = vmatmul.mubr.bf16.gmra.mrb[12].mxu0 %v7516_v11  ;;  %2849 = vmatmul.mubr.bf16.gmra.mrb[12].mxu1 %v7516_v11 }
 0x11b   :  { %2406 = vmatprep.mubr.bf16.mxu0 %v7525_v14  ;;  %2858 = vmatprep.mubr.bf16.mxu1 %v7525_v14 }
 0x11c   :  { %3798 = vmatpush1.bf16.msra.mxu0 %v9314_v12  ;;  %4024 = vmatpush1.bf16.msra.mxu1 %v9317_v13 }
 0x11d   :  { %3799 = vmatprep.subr.bf16.mxu0 %v9322_v15  ;;  %4025 = vmatprep.subr.bf16.mxu1 %v9325_v16 }
 0x120   :  { %3800 = vmatpush1.bf16.msra.mxu0 %v9320_v19  ;;  %4026 = vmatpush1.bf16.msra.mxu1 %v9323_v20 }
 0x121   :  { %3801 = vmatprep.subr.bf16.mxu0 %v9328_v21  ;;  %4027 = vmatprep.subr.bf16.mxu1 %v9331_v22 }
 0x122   :  { %2407 = vmatmul.mubr.bf16.gmra.mrb[16].mxu0 %v7524_v23  ;;  %2859 = vmatmul.mubr.bf16.gmra.mrb[16].mxu1 %v7524_v23 }
 0x123   :  { %2416 = vmatprep.mubr.bf16.mxu0 %v7533_v26  ;;  %2868 = vmatprep.mubr.bf16.mxu1 %v7533_v26 }
 0x124   :  { %3802 = vmatpush1.bf16.msra.mxu0 %v9326_v24  ;;  %4028 = vmatpush1.bf16.msra.mxu1 %v9329_v25 }
 0x125   :  { %3803 = vmatprep.subr.bf16.mxu0 %v9334_v27  ;;  %4029 = vmatprep.subr.bf16.mxu1 %v9337_v28 }
 0x128   :  { %3804 = vmatpush1.bf16.msra.mxu0 %v9332_v31  ;;  %4030 = vmatpush1.bf16.msra.mxu1 %v9335_v32 }
 0x129   :  { %3805 = vmatprep.subr.bf16.mxu0 %v9340_v33  ;;  %4031 = vmatprep.subr.bf16.mxu1 %v9343_v34 }
 0x12a   :  { %2417 = vmatmul.mubr.bf16.gmra.mrb[20].mxu0 %v7532_v35  ;;  %2869 = vmatmul.mubr.bf16.gmra.mrb[20].mxu1 %v7532_v35 }
 0x12b   :  { %2426 = vmatprep.mubr.bf16.mxu0 %v7541_v38  ;;  %2878 = vmatprep.mubr.bf16.mxu1 %v7541_v38 }
 0x12c   :  { %3806 = vmatpush1.bf16.msra.mxu0 %v9338_v36  ;;  %4032 = vmatpush1.bf16.msra.mxu1 %v9341_v37 }
 0x12d   :  { %3807 = vmatprep.subr.bf16.mxu0 %v9346_v39  ;;  %4033 = vmatprep.subr.bf16.mxu1 %v9349_v40 }
 0x130   :  { %3808 = vmatpush1.bf16.msra.mxu0 %v9344_v43  ;;  %4034 = vmatpush1.bf16.msra.mxu1 %v9347_v44 }
 0x131   :  { %3809 = vmatprep.subr.bf16.mxu0 %v9352_v45  ;;  %4035 = vmatprep.subr.bf16.mxu1 %v9355_v46 }
 0x132   :  { %2427 = vmatmul.mubr.bf16.gmra.mrb[24].mxu0 %v7540_v47  ;;  %2879 = vmatmul.mubr.bf16.gmra.mrb[24].mxu1 %v7540_v47 }
 0x133   :  { %2436 = vmatprep.mubr.bf16.mxu0 %v7549_v50  ;;  %2888 = vmatprep.mubr.bf16.mxu1 %v7549_v50 }
 0x134   :  { %3810 = vmatpush1.bf16.msra.mxu0 %v9350_v48  ;;  %4036 = vmatpush1.bf16.msra.mxu1 %v9353_v49 }
 0x135   :  { %3811 = vmatprep.subr.bf16.mxu0 %v9358_v51  ;;  %4037 = vmatprep.subr.bf16.mxu1 %v9361_v52 }
 0x138   :  { %3812 = vmatpush1.bf16.msra.mxu0 %v9356_v53  ;;  %4038 = vmatpush1.bf16.msra.mxu1 %v9359_v54 }
 0x139   :  { %3813 = vmatprep.subr.bf16.mxu0 %v9364_v56  ;;  %4039 = vmatprep.subr.bf16.mxu1 %v9367_v57 }
 0x13a   :  { %2437 = vmatmul.mubr.bf16.gmra.mrb[28].mxu0 %v7548_v55  ;;  %2889 = vmatmul.mubr.bf16.gmra.mrb[28].mxu1 %v7548_v55 }
 0x13c   :  { %3814 = vmatpush1.bf16.msra.mxu0 %v9362_v58  ;;  %4040 = vmatpush1.bf16.msra.mxu1 %v9365_v59 }
 0x13d   :  { %3815 = vmatprep.subr.bf16.mxu0 %v9370_v60  ;;  %4041 = vmatprep.subr.bf16.mxu1 %v9373_v61 }
 0x140   :  { %3816 = vmatpush1.bf16.msra.mxu0 %v9368_v62  ;;  %4042 = vmatpush1.bf16.msra.mxu1 %v9371_v63 }
 0x141   :  { %3898 = vmatprep.subr.bf16.mxu0 %v9376_v0  ;;  %4124 = vmatprep.subr.bf16.mxu1 %v9379_v1 }
 0x142   :  { %20 = vsyncpa [#allocation8], 0  ;;  %v13281_v2 = vlaneseq  ;;  %v373_v6 = vld [vmem:[%s13269_s2] sm:$0xf]  ;;  %v9377_v44 = vld [vmem:[%s13270_s3 + $0x208] ss:$16 sps:$4 sm:$0xff]  }
 0x143   :  { %v9374_v43 = vld [vmem:[%s13270_s3 + $0x200] ss:$16 sps:$4 sm:$0xff]   ;;  %v9382_v49 = vld [vmem:[%s13270_s3 + $0x224] ss:$16 sps:$4 sm:$0xff]   ;;  %v9385_v50 = vld [vmem:[%s13270_s3 + $0x22c] ss:$16 sps:$4 sm:$0xff]  }
 0x144   :  { %v11394_v3 = vshrl.u32 %v13281_v2, 7  ;;  %v9380_v61 = vld [vmem:[%s13270_s3 + $0x220] ss:$16 sps:$4 sm:$0xff]   ;;  %v9383_v62 = vld [vmem:[%s13270_s3 + $0x228] ss:$16 sps:$4 sm:$0xff]   ;;  %vm10160_vm0 = vmmov 0  }
 0x145   :  { %v9388_v63 = vld [vmem:[%s13270_s3 + $0x244] ss:$16 sps:$4 sm:$0xff]   ;;  %vm6937_vm2 = vcmask 1042432   ;;  %vm48_vm3 = vcmask 2048  }
 0x146   :  { %13303 = vst [vmem:[#allocation11_spill] sm:$0xff] %v11394_v3  ;;  %v11397_v4 = vsub.s32 0, %v11394_v3  ;;  %v11400_v5 = vsub.s32 2, %v11394_v3  ;;  %v11406_v7 = vsub.s32 1, %v11394_v3  ;;  %v11409_v8 = vsub.s32 3, %v11394_v3 }
 0x148   :  { %v11412_v9 = vrot.slane %v373_v6, %v11397_v4  ;;  %v11415_v10 = vrot.slane %v373_v6, %v11400_v5  ;;  %v11418_v11 = vrot.slane %v373_v6, %v11406_v7  ;;  %v11421_v12 = vrot.slane %v373_v6, %v11409_v8 }
 0x1d5   :  { %v2368_v13 = vpop.f32.mrb[0].mxu0  ;;  %v2820_v14 = vpop.f32.mrb[0].mxu1 }
 0x1d6   :  { %v8304_v15 = vadd.f32 %v2368_v13, %v11412_v9  ;;  %v8336_v16 = vadd.f32 %v2820_v14, %v11415_v10  ;;  %v2370_v17 = vpop.f32.mrb[1].mxu0  ;;  %v2822_v18 = vpop.f32.mrb[1].mxu1  ;;  %v9391_v14 = vld [vmem:[%s13270_s3 + $0x24c] ss:$16 sps:$4 sm:$0xff]  }
 0x1d7   :  { %v8305_v19 = vadd.f32 %v2370_v17, %v11418_v11  ;;  %v8337_v20 = vadd.f32 %v2822_v18, %v11421_v12  ;;  %v2372_v21 = vpop.f32.mrb[2].mxu0  ;;  %v2824_v22 = vpop.f32.mrb[2].mxu1 }
 0x1d8   :  { %v8306_v23 = vadd.f32 %v2372_v21, %v11412_v9  ;;  %v8338_v24 = vadd.f32 %v2824_v22, %v11415_v10  ;;  %v2374_v25 = vpop.f32.mrb[3].mxu0  ;;  %v2826_v26 = vpop.f32.mrb[3].mxu1  ;;  %v2899_v29 = vmax.f32 %v8304_v15, 0.0  ;;  %v2901_v30 = vmax.f32 %v8336_v16, 0.0 }
 0x1d9   :  { %v8307_v27 = vadd.f32 %v2374_v25, %v11418_v11  ;;  %v8339_v28 = vadd.f32 %v2826_v26, %v11421_v12  ;;  %v2900_v33 = vmax.f32 %v8305_v19, 0.0  ;;  %v2902_v34 = vmax.f32 %v8337_v20, 0.0  ;;  %v9386_v25 = vld [vmem:[%s13270_s3 + $0x240] ss:$16 sps:$4 sm:$0xff]   ;;  %v9389_v26 = vld [vmem:[%s13270_s3 + $0x248] ss:$16 sps:$4 sm:$0xff]  }
 0x1da   :  { %v2903_v31 = vmax.f32 %v8306_v23, 0.0  ;;  %v2905_v32 = vmax.f32 %v8338_v24, 0.0 }
 0x1db   :  { %v2904_v35 = vmax.f32 %v8307_v27, 0.0  ;;  %v2906_v36 = vmax.f32 %v8339_v28, 0.0 }
 0x1dc   :  { %v2963_v37 = vpack.c.bf16 %v2903_v31, %v2899_v29  ;;  %v11431_v38 = vpack.c.bf16 %v2905_v32, %v2901_v30  ;;  %v9394_v31 = vld [vmem:[%s13270_s3 + $0x264] ss:$16 sps:$4 sm:$0xff]   ;;  %v9397_v32 = vld [vmem:[%s13270_s3 + $0x26c] ss:$16 sps:$4 sm:$0xff]  }
 0x1dd   :  { %v2964_v39 = vpack.c.bf16 %v2904_v35, %v2900_v33  ;;  %v11433_v40 = vpack.c.bf16 %v2906_v36, %v2902_v34  ;;  %v2378_v41 = vpop.f32.mrb[4].mxu0  ;;  %v2830_v42 = vpop.f32.mrb[4].mxu1 }
 0x1de   :  { %v8308_v45 = vadd.f32 %v2378_v41, %v11412_v9  ;;  %v8340_v46 = vadd.f32 %v2830_v42, %v11415_v10  ;;  %v2380_v47 = vpop.f32.mrb[5].mxu0  ;;  %v2832_v48 = vpop.f32.mrb[5].mxu1 }
 0x1df   :  { %v8309_v51 = vadd.f32 %v2380_v47, %v11418_v11  ;;  %v8341_v52 = vadd.f32 %v2832_v48, %v11421_v12  ;;  %v2382_v53 = vpop.f32.mrb[6].mxu0  ;;  %v2834_v54 = vpop.f32.mrb[6].mxu1  ;;  %3817 = vmatprep.mubr.bf16.mxu0 %v2964_v39  ;;  %4043 = vmatprep.mubr.bf16.mxu1 %v2964_v39  ;;  %v9400_v47 = vld [vmem:[%s13270_s3 + $0x284] ss:$16 sps:$4 sm:$0xff]  }
 0x1e0   :  { %v8310_v55 = vadd.f32 %v2382_v53, %v11412_v9  ;;  %v8342_v56 = vadd.f32 %v2834_v54, %v11415_v10  ;;  %v2384_v57 = vpop.f32.mrb[7].mxu0  ;;  %v2836_v58 = vpop.f32.mrb[7].mxu1  ;;  %3818 = vmatmul.mubr.bf16.vlgmr.msra.gmra.mrb[32].mxu0 %v2963_v37  ;;  %4044 = vmatmul.mubr.bf16.vlgmr.msra.gmra.mrb[32].mxu1 %v2963_v37  ;;  %v2907_v0 = vmax.f32 %v8308_v45, 0.0  ;;  %v2909_v1 = vmax.f32 %v8340_v46, 0.0  ;;  %v9392_v45 = vld [vmem:[%s13270_s3 + $0x260] ss:$16 sps:$4 sm:$0xff]  }
 0x1e1   :  { %v8311_v59 = vadd.f32 %v2384_v57, %v11418_v11  ;;  %v8343_v60 = vadd.f32 %v2836_v58, %v11421_v12  ;;  %3899 = vmatpush1.bf16.msra.mxu0 %v9374_v43  ;;  %4125 = vmatpush1.bf16.msra.mxu1 %v9377_v44  ;;  %v2908_v15 = vmax.f32 %v8309_v51, 0.0  ;;  %v2910_v16 = vmax.f32 %v8341_v52, 0.0  ;;  %v9395_v46 = vld [vmem:[%s13270_s3 + $0x268] ss:$16 sps:$4 sm:$0xff]   ;;  %v9403_v52 = vld [vmem:[%s13270_s3 + $0x28c] ss:$16 sps:$4 sm:$0xff]  }
 0x1e2   :  { %v2911_v6 = vmax.f32 %v8310_v55, 0.0  ;;  %v2913_v13 = vmax.f32 %v8342_v56, 0.0  ;;  %3900 = vmatprep.subr.bf16.mxu0 %v9382_v49  ;;  %4126 = vmatprep.subr.bf16.mxu1 %v9385_v50 }
 0x1e3   :  { %v2912_v17 = vmax.f32 %v8311_v59, 0.0  ;;  %v2914_v18 = vmax.f32 %v8343_v60, 0.0 }
 0x1e4   :  { %v2967_v19 = vpack.c.bf16 %v2911_v6, %v2907_v0  ;;  %v11467_v20 = vpack.c.bf16 %v2913_v13, %v2909_v1  ;;  %v9401_v0 = vld [vmem:[%s13270_s3 + $0x288] ss:$16 sps:$4 sm:$0xff]  }
 0x1e5   :  { %v2968_v21 = vpack.c.bf16 %v2912_v17, %v2908_v15  ;;  %v11469_v22 = vpack.c.bf16 %v2914_v18, %v2910_v16  ;;  %v2388_v23 = vpop.f32.mrb[8].mxu0  ;;  %v2840_v24 = vpop.f32.mrb[8].mxu1  ;;  %3901 = vmatpush1.bf16.msra.mxu0 %v9380_v61  ;;  %4127 = vmatpush1.bf16.msra.mxu1 %v9383_v62  ;;  %v9406_v15 = vld [vmem:[%s13270_s3 + $0x2a4] ss:$16 sps:$4 sm:$0xff]   ;;  %v9409_v16 = vld [vmem:[%s13270_s3 + $0x2ac] ss:$16 sps:$4 sm:$0xff]  }
 0x1e6   :  { %v8312_v27 = vadd.f32 %v2388_v23, %v11412_v9  ;;  %v8344_v28 = vadd.f32 %v2840_v24, %v11415_v10  ;;  %v2390_v29 = vpop.f32.mrb[9].mxu0  ;;  %v2842_v30 = vpop.f32.mrb[9].mxu1  ;;  %3902 = vmatprep.subr.bf16.mxu0 %v9388_v63  ;;  %4128 = vmatprep.subr.bf16.mxu1 %v9391_v14  ;;  %v9398_v63 = vld [vmem:[%s13270_s3 + $0x280] ss:$16 sps:$4 sm:$0xff]  }
 0x1e7   :  { %v8313_v33 = vadd.f32 %v2390_v29, %v11418_v11  ;;  %v8345_v34 = vadd.f32 %v2842_v30, %v11421_v12  ;;  %v2392_v35 = vpop.f32.mrb[10].mxu0  ;;  %v2844_v36 = vpop.f32.mrb[10].mxu1  ;;  %3827 = vmatprep.mubr.bf16.mxu0 %v2968_v21  ;;  %4053 = vmatprep.mubr.bf16.mxu1 %v2968_v21  ;;  %v9404_v29 = vld [vmem:[%s13270_s3 + $0x2a0] ss:$16 sps:$4 sm:$0xff]   ;;  %v9407_v30 = vld [vmem:[%s13270_s3 + $0x2a8] ss:$16 sps:$4 sm:$0xff]  }
 0x1e8   :  { %v8314_v37 = vadd.f32 %v2392_v35, %v11412_v9  ;;  %v8346_v39 = vadd.f32 %v2844_v36, %v11415_v10  ;;  %v2394_v41 = vpop.f32.mrb[11].mxu0  ;;  %v2846_v42 = vpop.f32.mrb[11].mxu1  ;;  %3828 = vmatmul.mubr.bf16.gmra.mrb[36].mxu0 %v2967_v19  ;;  %4054 = vmatmul.mubr.bf16.gmra.mrb[36].mxu1 %v2967_v19  ;;  %v2915_v48 = vmax.f32 %v8312_v27, 0.0  ;;  %v2917_v49 = vmax.f32 %v8344_v28, 0.0  ;;  %v9415_v36 = vld [vmem:[%s13270_s3 + $0x2cc] ss:$16 sps:$4 sm:$0xff]  }
 0x1e9   :  { %v8315_v43 = vadd.f32 %v2394_v41, %v11418_v11  ;;  %v8347_v44 = vadd.f32 %v2846_v42, %v11421_v12  ;;  %3903 = vmatpush1.bf16.msra.mxu0 %v9386_v25  ;;  %4129 = vmatpush1.bf16.msra.mxu1 %v9389_v26  ;;  %v2916_v53 = vmax.f32 %v8313_v33, 0.0  ;;  %v2918_v54 = vmax.f32 %v8345_v34, 0.0 }
 0x1ea   :  { %v2919_v50 = vmax.f32 %v8314_v37, 0.0  ;;  %v2921_v51 = vmax.f32 %v8346_v39, 0.0  ;;  %3904 = vmatprep.subr.bf16.mxu0 %v9394_v31  ;;  %4130 = vmatprep.subr.bf16.mxu1 %v9397_v32  ;;  %v9412_v31 = vld [vmem:[%s13270_s3 + $0x2c4] ss:$16 sps:$4 sm:$0xff]  }
 0x1eb   :  { %v2920_v55 = vmax.f32 %v8315_v43, 0.0  ;;  %v2922_v56 = vmax.f32 %v8347_v44, 0.0 }
 0x1ec   :  { %v2971_v57 = vpack.c.bf16 %v2919_v50, %v2915_v48  ;;  %v11503_v58 = vpack.c.bf16 %v2921_v51, %v2917_v49  ;;  %v9410_v49 = vld [vmem:[%s13270_s3 + $0x2c0] ss:$16 sps:$4 sm:$0xff]   ;;  %v9413_v50 = vld [vmem:[%s13270_s3 + $0x2c8] ss:$16 sps:$4 sm:$0xff]  }
 0x1ed   :  { %v2972_v59 = vpack.c.bf16 %v2920_v55, %v2916_v53  ;;  %v11505_v60 = vpack.c.bf16 %v2922_v56, %v2918_v54  ;;  %v2398_v61 = vpop.f32.mrb[12].mxu0  ;;  %v2850_v62 = vpop.f32.mrb[12].mxu1  ;;  %3905 = vmatpush1.bf16.msra.mxu0 %v9392_v45  ;;  %4131 = vmatpush1.bf16.msra.mxu1 %v9395_v46  ;;  %v9418_v55 = vld [vmem:[%s13270_s3 + $0x2e4] ss:$16 sps:$4 sm:$0xff]   ;;  %v9421_v56 = vld [vmem:[%s13270_s3 + $0x2ec] ss:$16 sps:$4 sm:$0xff]  }
 0x1ee   :  { %v8316_v1 = vadd.f32 %v2398_v61, %v11412_v9  ;;  %v8348_v6 = vadd.f32 %v2850_v62, %v11415_v10  ;;  %v2400_v13 = vpop.f32.mrb[13].mxu0  ;;  %v2852_v14 = vpop.f32.mrb[13].mxu1  ;;  %3906 = vmatprep.subr.bf16.mxu0 %v9400_v47  ;;  %4132 = vmatprep.subr.bf16.mxu1 %v9403_v52 }
 0x1ef   :  { %v8317_v17 = vadd.f32 %v2400_v13, %v11418_v11  ;;  %v8349_v18 = vadd.f32 %v2852_v14, %v11421_v12  ;;  %v2402_v19 = vpop.f32.mrb[14].mxu0  ;;  %v2854_v21 = vpop.f32.mrb[14].mxu1  ;;  %3837 = vmatprep.mubr.bf16.mxu0 %v2972_v59  ;;  %4063 = vmatprep.mubr.bf16.mxu1 %v2972_v59 }
 0x1f0   :  { %v8318_v23 = vadd.f32 %v2402_v19, %v11412_v9  ;;  %v8350_v24 = vadd.f32 %v2854_v21, %v11415_v10  ;;  %v2404_v25 = vpop.f32.mrb[15].mxu0  ;;  %v2856_v26 = vpop.f32.mrb[15].mxu1  ;;  %3838 = vmatmul.mubr.bf16.gmra.mrb[40].mxu0 %v2971_v57  ;;  %4064 = vmatmul.mubr.bf16.gmra.mrb[40].mxu1 %v2971_v57  ;;  %v2923_v32 = vmax.f32 %v8316_v1, 0.0  ;;  %v2925_v33 = vmax.f32 %v8348_v6, 0.0 }
 0x1f1   :  { %v8319_v27 = vadd.f32 %v2404_v25, %v11418_v11  ;;  %v8351_v28 = vadd.f32 %v2856_v26, %v11421_v12  ;;  %3907 = vmatpush1.bf16.msra.mxu0 %v9398_v63  ;;  %4133 = vmatpush1.bf16.msra.mxu1 %v9401_v0  ;;  %v2924_v37 = vmax.f32 %v8317_v17, 0.0  ;;  %v2926_v39 = vmax.f32 %v8349_v18, 0.0  ;;  %v9424_v17 = vld [vmem:[%s13270_s3 + $0x304] ss:$16 sps:$4 sm:$0xff]  }
 0x1f2   :  { %v2927_v34 = vmax.f32 %v8318_v23, 0.0  ;;  %v2929_v35 = vmax.f32 %v8350_v24, 0.0  ;;  %3908 = vmatprep.subr.bf16.mxu0 %v9406_v15  ;;  %4134 = vmatprep.subr.bf16.mxu1 %v9409_v16  ;;  %v9416_v15 = vld [vmem:[%s13270_s3 + $0x2e0] ss:$16 sps:$4 sm:$0xff]   ;;  %v9419_v16 = vld [vmem:[%s13270_s3 + $0x2e8] ss:$16 sps:$4 sm:$0xff]  }
 0x1f3   :  { %v2928_v41 = vmax.f32 %v8319_v27, 0.0  ;;  %v2930_v42 = vmax.f32 %v8351_v28, 0.0  ;;  %v9427_v24 = vld [vmem:[%s13270_s3 + $0x30c] ss:$16 sps:$4 sm:$0xff]  }
 0x1f4   :  { %v2975_v43 = vpack.c.bf16 %v2927_v34, %v2923_v32  ;;  %v11539_v44 = vpack.c.bf16 %v2929_v35, %v2925_v33  ;;  %v9422_v35 = vld [vmem:[%s13270_s3 + $0x300] ss:$16 sps:$4 sm:$0xff]  }
 0x1f5   :  { %v2976_v45 = vpack.c.bf16 %v2928_v41, %v2924_v37  ;;  %v11541_v46 = vpack.c.bf16 %v2930_v42, %v2926_v39  ;;  %v2408_v47 = vpop.f32.mrb[16].mxu0  ;;  %v2860_v48 = vpop.f32.mrb[16].mxu1  ;;  %3909 = vmatpush1.bf16.msra.mxu0 %v9404_v29  ;;  %4135 = vmatpush1.bf16.msra.mxu1 %v9407_v30 }
 0x1f6   :  { %v8320_v51 = vadd.f32 %v2408_v47, %v11412_v9  ;;  %v8352_v52 = vadd.f32 %v2860_v48, %v11415_v10  ;;  %v2410_v53 = vpop.f32.mrb[17].mxu0  ;;  %v2862_v54 = vpop.f32.mrb[17].mxu1  ;;  %3910 = vmatprep.subr.bf16.mxu0 %v9412_v31  ;;  %4136 = vmatprep.subr.bf16.mxu1 %v9415_v36  ;;  %v9425_v36 = vld [vmem:[%s13270_s3 + $0x308] ss:$16 sps:$4 sm:$0xff]  }
 0x1f7   :  { %v8321_v57 = vadd.f32 %v2410_v53, %v11418_v11  ;;  %v8353_v59 = vadd.f32 %v2862_v54, %v11421_v12  ;;  %v2412_v61 = vpop.f32.mrb[18].mxu0  ;;  %v2864_v62 = vpop.f32.mrb[18].mxu1  ;;  %3847 = vmatprep.mubr.bf16.mxu0 %v2976_v45  ;;  %4073 = vmatprep.mubr.bf16.mxu1 %v2976_v45  ;;  %v9433_v45 = vld [vmem:[%s13270_s3 + $0x32c] ss:$16 sps:$4 sm:$0xff]  }
 0x1f8   :  { %v8322_v63 = vadd.f32 %v2412_v61, %v11412_v9  ;;  %v8354_v0 = vadd.f32 %v2864_v62, %v11415_v10  ;;  %v2414_v1 = vpop.f32.mrb[19].mxu0  ;;  %v2866_v6 = vpop.f32.mrb[19].mxu1  ;;  %3848 = vmatmul.mubr.bf16.gmra.mrb[44].mxu0 %v2975_v43  ;;  %4074 = vmatmul.mubr.bf16.gmra.mrb[44].mxu1 %v2975_v43  ;;  %v2931_v18 = vmax.f32 %v8320_v51, 0.0  ;;  %v2933_v19 = vmax.f32 %v8352_v52, 0.0  ;;  %v9430_v43 = vld [vmem:[%s13270_s3 + $0x324] ss:$16 sps:$4 sm:$0xff]  }
 0x1f9   :  { %v8323_v13 = vadd.f32 %v2414_v1, %v11418_v11  ;;  %v8355_v14 = vadd.f32 %v2866_v6, %v11421_v12  ;;  %3911 = vmatpush1.bf16.msra.mxu0 %v9410_v49  ;;  %4137 = vmatpush1.bf16.msra.mxu1 %v9413_v50  ;;  %v2932_v25 = vmax.f32 %v8321_v57, 0.0  ;;  %v2934_v26 = vmax.f32 %v8353_v59, 0.0  ;;  %v9428_v57 = vld [vmem:[%s13270_s3 + $0x320] ss:$16 sps:$4 sm:$0xff]   ;;  %v9431_v59 = vld [vmem:[%s13270_s3 + $0x328] ss:$16 sps:$4 sm:$0xff]  }
 0x1fa   :  { %v2935_v21 = vmax.f32 %v8322_v63, 0.0  ;;  %v2937_v23 = vmax.f32 %v8354_v0, 0.0  ;;  %3912 = vmatprep.subr.bf16.mxu0 %v9418_v55  ;;  %4138 = vmatprep.subr.bf16.mxu1 %v9421_v56  ;;  %v9436_v61 = vld [vmem:[%s13270_s3 + $0x344] ss:$16 sps:$4 sm:$0xff]   ;;  %v9439_v6 = vld [vmem:[%s13270_s3 + $0x34c] ss:$16 sps:$4 sm:$0xff]  }
 0x1fb   :  { %v2936_v27 = vmax.f32 %v8323_v13, 0.0  ;;  %v2938_v28 = vmax.f32 %v8355_v14, 0.0 }
 0x1fc   :  { %v2979_v29 = vpack.c.bf16 %v2935_v21, %v2931_v18  ;;  %v11575_v30 = vpack.c.bf16 %v2937_v23, %v2933_v19 }
 0x1fd   :  { %v2980_v31 = vpack.c.bf16 %v2936_v27, %v2932_v25  ;;  %v11577_v32 = vpack.c.bf16 %v2938_v28, %v2934_v26  ;;  %v2418_v33 = vpop.f32.mrb[20].mxu0  ;;  %v2870_v34 = vpop.f32.mrb[20].mxu1  ;;  %3913 = vmatpush1.bf16.msra.mxu0 %v9416_v15  ;;  %4139 = vmatpush1.bf16.msra.mxu1 %v9419_v16  ;;  %v9434_v25 = vld [vmem:[%s13270_s3 + $0x340] ss:$16 sps:$4 sm:$0xff]   ;;  %v9437_v26 = vld [vmem:[%s13270_s3 + $0x348] ss:$16 sps:$4 sm:$0xff]  }
 0x1fe   :  { %v8324_v37 = vadd.f32 %v2418_v33, %v11412_v9  ;;  %v8356_v39 = vadd.f32 %v2870_v34, %v11415_v10  ;;  %v2420_v41 = vpop.f32.mrb[21].mxu0  ;;  %v2872_v42 = vpop.f32.mrb[21].mxu1  ;;  %3914 = vmatprep.subr.bf16.mxu0 %v9424_v17  ;;  %4140 = vmatprep.subr.bf16.mxu1 %v9427_v24  ;;  %v9442_v33 = vld [vmem:[%s13270_s3 + $0x364] ss:$16 sps:$4 sm:$0xff]   ;;  %v9445_v34 = vld [vmem:[%s13270_s3 + $0x36c] ss:$16 sps:$4 sm:$0xff]  }
 0x1ff   :  { %v8325_v47 = vadd.f32 %v2420_v41, %v11418_v11  ;;  %v8357_v48 = vadd.f32 %v2872_v42, %v11421_v12  ;;  %v2422_v49 = vpop.f32.mrb[22].mxu0  ;;  %v2874_v50 = vpop.f32.mrb[22].mxu1  ;;  %3857 = vmatprep.mubr.bf16.mxu0 %v2980_v31  ;;  %4083 = vmatprep.mubr.bf16.mxu1 %v2980_v31 }
 0x200   :  { %v8326_v51 = vadd.f32 %v2422_v49, %v11412_v9  ;;  %v8358_v52 = vadd.f32 %v2874_v50, %v11415_v10  ;;  %v2424_v53 = vpop.f32.mrb[23].mxu0  ;;  %v2876_v54 = vpop.f32.mrb[23].mxu1  ;;  %3858 = vmatmul.mubr.bf16.gmra.mrb[48].mxu0 %v2979_v29  ;;  %4084 = vmatmul.mubr.bf16.gmra.mrb[48].mxu1 %v2979_v29  ;;  %v2939_v62 = vmax.f32 %v8324_v37, 0.0  ;;  %v2941_v63 = vmax.f32 %v8356_v39, 0.0  ;;  %v9440_v49 = vld [vmem:[%s13270_s3 + $0x360] ss:$16 sps:$4 sm:$0xff]  }
 0x201   :  { %v8327_v55 = vadd.f32 %v2424_v53, %v11418_v11  ;;  %v8359_v56 = vadd.f32 %v2876_v54, %v11421_v12  ;;  %3915 = vmatpush1.bf16.msra.mxu0 %v9422_v35  ;;  %4141 = vmatpush1.bf16.msra.mxu1 %v9425_v36  ;;  %v2940_v13 = vmax.f32 %v8325_v47, 0.0  ;;  %v2942_v14 = vmax.f32 %v8357_v48, 0.0  ;;  %v9443_v50 = vld [vmem:[%s13270_s3 + $0x368] ss:$16 sps:$4 sm:$0xff]  }
 0x202   :  { %v2943_v0 = vmax.f32 %v8326_v51, 0.0  ;;  %v2945_v1 = vmax.f32 %v8358_v52, 0.0  ;;  %3916 = vmatprep.subr.bf16.mxu0 %v9430_v43  ;;  %4142 = vmatprep.subr.bf16.mxu1 %v9433_v45  ;;  %v9448_v51 = vld [vmem:[%s13270_s3 + $0x384] ss:$16 sps:$4 sm:$0xff]  }
 0x203   :  { %v2944_v15 = vmax.f32 %v8327_v55, 0.0  ;;  %v2946_v16 = vmax.f32 %v8359_v56, 0.0  ;;  %v9451_v56 = vld [vmem:[%s13270_s3 + $0x38c] ss:$16 sps:$4 sm:$0xff]  }
 0x204   :  { %v2983_v17 = vpack.c.bf16 %v2943_v0, %v2939_v62  ;;  %v11611_v18 = vpack.c.bf16 %v2945_v1, %v2941_v63 }
 0x205   :  { %v2984_v19 = vpack.c.bf16 %v2944_v15, %v2940_v13  ;;  %v11613_v21 = vpack.c.bf16 %v2946_v16, %v2942_v14  ;;  %v2428_v23 = vpop.f32.mrb[24].mxu0  ;;  %v2880_v24 = vpop.f32.mrb[24].mxu1  ;;  %3917 = vmatpush1.bf16.msra.mxu0 %v9428_v57  ;;  %4143 = vmatpush1.bf16.msra.mxu1 %v9431_v59  ;;  %v9446_v15 = vld [vmem:[%s13270_s3 + $0x380] ss:$16 sps:$4 sm:$0xff]   ;;  %v9449_v16 = vld [vmem:[%s13270_s3 + $0x388] ss:$16 sps:$4 sm:$0xff]  }
 0x206   :  { %v8328_v27 = vadd.f32 %v2428_v23, %v11412_v9  ;;  %v8360_v28 = vadd.f32 %v2880_v24, %v11415_v10  ;;  %v2430_v29 = vpop.f32.mrb[25].mxu0  ;;  %v2882_v31 = vpop.f32.mrb[25].mxu1  ;;  %3918 = vmatprep.subr.bf16.mxu0 %v9436_v61  ;;  %4144 = vmatprep.subr.bf16.mxu1 %v9439_v6 }
 0x207   :  { %v8329_v35 = vadd.f32 %v2430_v29, %v11418_v11  ;;  %v8361_v36 = vadd.f32 %v2882_v31, %v11421_v12  ;;  %v2432_v37 = vpop.f32.mrb[26].mxu0  ;;  %v2884_v39 = vpop.f32.mrb[26].mxu1  ;;  %3867 = vmatprep.mubr.bf16.mxu0 %v2984_v19  ;;  %4093 = vmatprep.mubr.bf16.mxu1 %v2984_v19 }
 0x208   :  { %v8330_v41 = vadd.f32 %v2432_v37, %v11412_v9  ;;  %v8362_v42 = vadd.f32 %v2884_v39, %v11415_v10  ;;  %v2434_v43 = vpop.f32.mrb[27].mxu0  ;;  %v2886_v45 = vpop.f32.mrb[27].mxu1  ;;  %3868 = vmatmul.mubr.bf16.gmra.mrb[52].mxu0 %v2983_v17  ;;  %4094 = vmatmul.mubr.bf16.gmra.mrb[52].mxu1 %v2983_v17  ;;  %v2947_v52 = vmax.f32 %v8328_v27, 0.0  ;;  %v2949_v53 = vmax.f32 %v8360_v28, 0.0 }
 0x209   :  { %v8331_v47 = vadd.f32 %v2434_v43, %v11418_v11  ;;  %v8363_v48 = vadd.f32 %v2886_v45, %v11421_v12  ;;  %3919 = vmatpush1.bf16.msra.mxu0 %v9434_v25  ;;  %4145 = vmatpush1.bf16.msra.mxu1 %v9437_v26  ;;  %v2948_v57 = vmax.f32 %v8329_v35, 0.0  ;;  %v2950_v59 = vmax.f32 %v8361_v36, 0.0  ;;  %v9454_v25 = vld [vmem:[%s13270_s3 + $0x3a4] ss:$16 sps:$4 sm:$0xff]   ;;  %v9457_v26 = vld [vmem:[%s13270_s3 + $0x3ac] ss:$16 sps:$4 sm:$0xff]  }
 0x20a   :  { %v2951_v54 = vmax.f32 %v8330_v41, 0.0  ;;  %v2953_v55 = vmax.f32 %v8362_v42, 0.0  ;;  %3920 = vmatprep.subr.bf16.mxu0 %v9442_v33  ;;  %4146 = vmatprep.subr.bf16.mxu1 %v9445_v34  ;;  %v9452_v41 = vld [vmem:[%s13270_s3 + $0x3a0] ss:$16 sps:$4 sm:$0xff]  }
 0x20b   :  { %v2952_v61 = vmax.f32 %v8331_v47, 0.0  ;;  %v2954_v62 = vmax.f32 %v8363_v48, 0.0 }
 0x20c   :  { %v2987_v63 = vpack.c.bf16 %v2951_v54, %v2947_v52  ;;  %v11647_v0 = vpack.c.bf16 %v2953_v55, %v2949_v53  ;;  %v9458_v55 = vld [vmem:[%s13270_s3 + $0x3c0] ss:$16 sps:$4 sm:$0xff]  }
 0x20d   :  { %v2988_v1 = vpack.c.bf16 %v2952_v61, %v2948_v57  ;;  %v11649_v6 = vpack.c.bf16 %v2954_v62, %v2950_v59  ;;  %v2438_v13 = vpop.f32.mrb[28].mxu0  ;;  %v2890_v14 = vpop.f32.mrb[28].mxu1  ;;  %3921 = vmatpush1.bf16.msra.mxu0 %v9440_v49  ;;  %4147 = vmatpush1.bf16.msra.mxu1 %v9443_v50  ;;  %v9466_v57 = vld [vmem:[%s13270_s3 + $0x3e4] ss:$16 sps:$4 sm:$0xff]   ;;  %v9469_v59 = vld [vmem:[%s13270_s3 + $0x3ec] ss:$16 sps:$4 sm:$0xff]  }
 0x20e   :  { %v8332_v17 = vadd.f32 %v2438_v13, %v11412_v9  ;;  %v8364_v19 = vadd.f32 %v2890_v14, %v11415_v10  ;;  %v2440_v23 = vpop.f32.mrb[29].mxu0  ;;  %v2892_v24 = vpop.f32.mrb[29].mxu1  ;;  %3922 = vmatprep.subr.bf16.mxu0 %v9448_v51  ;;  %4148 = vmatprep.subr.bf16.mxu1 %v9451_v56  ;;  %v9461_v56 = vld [vmem:[%s13270_s3 + $0x3c8] ss:$16 sps:$4 sm:$0xff]   ;;  %v9464_v61 = vld [vmem:[%s13270_s3 + $0x3e0] ss:$16 sps:$4 sm:$0xff]  }
 0x20f   :  { %v8333_v27 = vadd.f32 %v2440_v23, %v11418_v11  ;;  %v8365_v28 = vadd.f32 %v2892_v24, %v11421_v12  ;;  %v2442_v29 = vpop.f32.mrb[30].mxu0  ;;  %v2894_v31 = vpop.f32.mrb[30].mxu1  ;;  %3877 = vmatprep.mubr.bf16.mxu0 %v2988_v1  ;;  %4103 = vmatprep.mubr.bf16.mxu1 %v2988_v1  ;;  %v9467_v62 = vld [vmem:[%s13270_s3 + $0x3e8] ss:$16 sps:$4 sm:$0xff]   ;;  %v9475_v1 = vld [vmem:[%s13272_s5 + $0xc] ss:$24 sps:$4 sm:$0xff]  }
 0x210   :  { %v8334_v33 = vadd.f32 %v2442_v29, %v11412_v9  ;;  %v8366_v34 = vadd.f32 %v2894_v31, %v11415_v10  ;;  %v2444_v35 = vpop.f32.mrb[31].mxu0  ;;  %v2896_v36 = vpop.f32.mrb[31].mxu1  ;;  %3878 = vmatmul.mubr.bf16.gmra.mrb[56].mxu0 %v2987_v63  ;;  %4104 = vmatmul.mubr.bf16.gmra.mrb[56].mxu1 %v2987_v63  ;;  %v9455_v9 = vld [vmem:[%s13270_s3 + $0x3a8] ss:$16 sps:$4 sm:$0xff]   ;;  %v9460_v10 = vld [vmem:[%s13270_s3 + $0x3c4] ss:$16 sps:$4 sm:$0xff]  }
 0x211   :  { %v8335_v37 = vadd.f32 %v2444_v35, %v11418_v11  ;;  %v8367_v39 = vadd.f32 %v2896_v36, %v11421_v12  ;;  %3923 = vmatpush1.bf16.msra.mxu0 %v9446_v15  ;;  %4149 = vmatpush1.bf16.msra.mxu1 %v9449_v16  ;;  %v2955_v42 = vmax.f32 %v8332_v17, 0.0  ;;  %v2957_v43 = vmax.f32 %v8364_v19, 0.0  ;;  %v9463_v12 = vld [vmem:[%s13270_s3 + $0x3cc] ss:$16 sps:$4 sm:$0xff]   ;;  %v9473_v13 = vld [vmem:[%s13272_s5 + $0x8] ss:$24 sps:$4 sm:$0xff]  }
 0x212   :  { %v2959_v45 = vmax.f32 %v8334_v33, 0.0  ;;  %v2961_v11 = vmax.f32 %v8366_v34, 0.0  ;;  %3924 = vmatprep.subr.bf16.mxu0 %v9454_v25  ;;  %4150 = vmatprep.subr.bf16.mxu1 %v9457_v26  ;;  %v2956_v47 = vmax.f32 %v8333_v27, 0.0  ;;  %v2958_v48 = vmax.f32 %v8365_v28, 0.0  ;;  %v9472_v63 = vld [vmem:[%s13272_s5 + $0x4] ss:$24 sps:$4 sm:$0xff]  }
 0x213   :  { %v2960_v49 = vmax.f32 %v8335_v37, 0.0  ;;  %v2962_v50 = vmax.f32 %v8367_v39, 0.0  ;;  %v9478_v14 = vld [vmem:[%s13272_s5 + $0x34] ss:$24 sps:$4 sm:$0xff]   ;;  %v9476_v16 = vld [vmem:[%s13272_s5 + $0x30] ss:$24 sps:$4 sm:$0xff]  }
 0x214   :  { %v2991_v51 = vpack.c.bf16 %v2959_v45, %v2955_v42  ;;  %v11683_v52 = vpack.c.bf16 %v2961_v11, %v2957_v43  ;;  %v9481_v15 = vld [vmem:[%s13272_s5 + $0x3c] ss:$24 sps:$4 sm:$0xff]   ;;  %v9479_v17 = vld [vmem:[%s13272_s5 + $0x38] ss:$24 sps:$4 sm:$0xff]   ;;  %v9485_v23 = vld [vmem:[%s13272_s5 + $0x68] ss:$24 sps:$4 sm:$0xff]  }
 0x215   :  { %v2992_v53 = vpack.c.bf16 %v2960_v49, %v2956_v47  ;;  %v11685_v54 = vpack.c.bf16 %v2962_v50, %v2958_v48  ;;  %3925 = vmatpush1.bf16.msra.mxu0 %v9452_v41  ;;  %4151 = vmatpush1.bf16.msra.mxu1 %v9455_v9  ;;  %v9484_v19 = vld [vmem:[%s13272_s5 + $0x64] ss:$24 sps:$4 sm:$0xff]   ;;  %v9490_v24 = vld [vmem:[%s13272_s5 + $0x94] ss:$24 sps:$4 sm:$0xff]   ;;  %v9488_v26 = vld [vmem:[%s13272_s5 + $0x90] ss:$24 sps:$4 sm:$0xff]  }
 0x216   :  { %3926 = vmatprep.subr.bf16.mxu0 %v9460_v10  ;;  %4152 = vmatprep.subr.bf16.mxu1 %v9463_v12  ;;  %v9493_v25 = vld [vmem:[%s13272_s5 + $0x9c] ss:$24 sps:$4 sm:$0xff]   ;;  %v9491_v27 = vld [vmem:[%s13272_s5 + $0x98] ss:$24 sps:$4 sm:$0xff]   ;;  %v9497_v29 = vld [vmem:[%s13272_s5 + $0xc8] ss:$24 sps:$4 sm:$0xff]  }
 0x217   :  { %3887 = vmatprep.mubr.bf16.mxu0 %v2992_v53  ;;  %4113 = vmatprep.mubr.bf16.mxu1 %v2992_v53  ;;  %v9496_v28 = vld [vmem:[%s13272_s5 + $0xc4] ss:$24 sps:$4 sm:$0xff]   ;;  %v9502_v31 = vld [vmem:[%s13272_s5 + $0xf4] ss:$24 sps:$4 sm:$0xff]   ;;  %v9500_v34 = vld [vmem:[%s13272_s5 + $0xf0] ss:$24 sps:$4 sm:$0xff]  }
 0x218   :  { %3888 = vmatmul.mubr.bf16.gmra.mrb[60].mxu0 %v2991_v51  ;;  %4114 = vmatmul.mubr.bf16.gmra.mrb[60].mxu1 %v2991_v51  ;;  %v9505_v33 = vld [vmem:[%s13272_s5 + $0xfc] ss:$24 sps:$4 sm:$0xff]   ;;  %v9503_v35 = vld [vmem:[%s13272_s5 + $0xf8] ss:$24 sps:$4 sm:$0xff]   ;;  %v9509_v37 = vld [vmem:[%s13272_s5 + $0x128] ss:$24 sps:$4 sm:$0xff]  }
 0x219   :  { %3927 = vmatpush1.bf16.msra.mxu0 %v9458_v55  ;;  %3930 = vmatprep.mubr.bf16.mxu0 %v11433_v40  ;;  %v9508_v36 = vld [vmem:[%s13272_s5 + $0x124] ss:$24 sps:$4 sm:$0xff]   ;;  %v9514_v39 = vld [vmem:[%s13272_s5 + $0x154] ss:$24 sps:$4 sm:$0xff]   ;;  %v9512_v9 = vld [vmem:[%s13272_s5 + $0x150] ss:$24 sps:$4 sm:$0xff]  }
 0x21a   :  { %4153 = vmatpush1.bf16.msra.mxu1 %v9461_v56  ;;  %4156 = vmatprep.mubr.bf16.mxu1 %v11433_v40  ;;  %v9470_v40 = vld [vmem:[%s13272_s5] ss:$24 sps:$4 sm:$0xff]   ;;  %v9517_v41 = vld [vmem:[%s13272_s5 + $0x15c] ss:$24 sps:$4 sm:$0xff]   ;;  %v9524_v12 = vld [vmem:[%s13272_s5 + $0x1b0] ss:$24 sps:$4 sm:$0xff]  }
 0x21b   :  { %3928 = vmatprep.subr.bf16.mxu0 %v9466_v57  ;;  %4154 = vmatprep.subr.bf16.mxu1 %v9469_v59  ;;  %v9515_v10 = vld [vmem:[%s13272_s5 + $0x158] ss:$24 sps:$4 sm:$0xff]   ;;  %v9520_v42 = vld [vmem:[%s13272_s5 + $0x184] ss:$24 sps:$4 sm:$0xff]   ;;  %v9521_v43 = vld [vmem:[%s13272_s5 + $0x188] ss:$24 sps:$4 sm:$0xff]  }
 0x21c   :  { %v9526_v45 = vld [vmem:[%s13272_s5 + $0x1b4] ss:$24 sps:$4 sm:$0xff]   ;;  %v9527_v47 = vld [vmem:[%s13272_s5 + $0x1b8] ss:$24 sps:$4 sm:$0xff]   ;;  %v9532_v48 = vld [vmem:[%s13272_s5 + $0x1e4] ss:$24 sps:$4 sm:$0xff]  }
 0x21d   :  { %3929 = vmatpush1.bf16.msra.mxu0 %v9464_v61  ;;  %v9529_v11 = vld [vmem:[%s13272_s5 + $0x1bc] ss:$24 sps:$4 sm:$0xff]   ;;  %v9533_v49 = vld [vmem:[%s13272_s5 + $0x1e8] ss:$24 sps:$4 sm:$0xff]   ;;  %v9539_v55 = vld [vmem:[%s13272_s5 + $0x218] ss:$24 sps:$4 sm:$0xff]  }
 0x21e   :  { %4155 = vmatpush1.bf16.msra.mxu1 %v9467_v62  ;;  %5517 = vmatprep.subr.bf16.mxu0 %v9472_v63  ;;  %v9538_v50 = vld [vmem:[%s13272_s5 + $0x214] ss:$24 sps:$4 sm:$0xff]   ;;  %v9536_v53 = vld [vmem:[%s13272_s5 + $0x210] ss:$24 sps:$4 sm:$0xff]   ;;  %v9544_v56 = vld [vmem:[%s13272_s5 + $0x244] ss:$24 sps:$4 sm:$0xff]  }
 0x21f   :  { %5743 = vmatprep.subr.bf16.mxu1 %v9475_v1  ;;  %v9541_v51 = vld [vmem:[%s13272_s5 + $0x21c] ss:$24 sps:$4 sm:$0xff]   ;;  %v9545_v57 = vld [vmem:[%s13272_s5 + $0x248] ss:$24 sps:$4 sm:$0xff]   ;;  %v9551_v63 = vld [vmem:[%s13272_s5 + $0x278] ss:$24 sps:$4 sm:$0xff]  }
 0x220   :  { %3931 = vmatmul.mubr.bf16.vlgmr.msra.gmra.mrb[32].mxu0 %v11431_v38  ;;  %v9550_v59 = vld [vmem:[%s13272_s5 + $0x274] ss:$24 sps:$4 sm:$0xff]   ;;  %v9548_v62 = vld [vmem:[%s13272_s5 + $0x270] ss:$24 sps:$4 sm:$0xff]   ;;  %s10164_s3 = smov [#allocation7]  }
 0x221   :  { %4157 = vmatmul.mubr.bf16.vlgmr.msra.gmra.mrb[32].mxu1 %v11431_v38  ;;  %3940 = vmatprep.mubr.bf16.mxu0 %v11469_v22  ;;  %v9487_v38 = vld [vmem:[%s13272_s5 + $0x6c] ss:$24 sps:$4 sm:$0xff]   ;;  %v9553_v61 = vld [vmem:[%s13272_s5 + $0x27c] ss:$24 sps:$4 sm:$0xff]   ;;  %s7470_s1 = sshll.u32 %s10164_s3, 4  ;;  %s7471_s1 = int_to_ptr.vmem [resolvable:$true] %s7470_s1 }
 0x222   :  { %4166 = vmatprep.mubr.bf16.mxu1 %v11469_v22  ;;  %5518 = vmatpush1.bf16.msra.mxu0 %v9470_v40  ;;  %v9482_v22 = vld [vmem:[%s13272_s5 + $0x60] ss:$24 sps:$4 sm:$0xff]   ;;  %v9559_v1 = vld [vmem:[%s13272_s5 + $0x2ac] ss:$24 sps:$4 sm:$0xff]  }
 0x223   :  { %5744 = vmatpush1.bf16.msra.mxu1 %v9473_v13  ;;  %5519 = vmatprep.subr.bf16.mxu0 %v9478_v14  ;;  %v9557_v40 = vld [vmem:[%s13272_s5 + $0x2a8] ss:$24 sps:$4 sm:$0xff]   ;;  %v9565_v14 = vld [vmem:[%s13272_s5 + $0x2dc] ss:$24 sps:$4 sm:$0xff]  }
 0x224   :  { %5745 = vmatprep.subr.bf16.mxu1 %v9481_v15  ;;  %v9560_v13 = vld [vmem:[%s13272_s5 + $0x2d0] ss:$24 sps:$4 sm:$0xff]  }
 0x225   :  { %v9563_v15 = vld [vmem:[%s13272_s5 + $0x2d8] ss:$24 sps:$4 sm:$0xff]  }
 0x226   :  { %5520 = vmatpush1.bf16.msra.mxu0 %v9476_v16  ;;  %v9568_v16 = vld [vmem:[%s13272_s5 + $0x304] ss:$24 sps:$4 sm:$0xff]  }
 0x227   :  { %5746 = vmatpush1.bf16.msra.mxu1 %v9479_v17  ;;  %5521 = vmatprep.subr.bf16.mxu0 %v9484_v19  ;;  %v9571_v17 = vld [vmem:[%s13272_s5 + $0x30c] ss:$24 sps:$4 sm:$0xff]   ;;  %v3123_v19 = vld [vmem:[%s13271_s4] sm:$0xf] }
 0x228   :  { %3941 = vmatmul.mubr.bf16.gmra.mrb[36].mxu0 %v11467_v20  ;;  %5747 = vmatprep.subr.bf16.mxu1 %v9487_v38  ;;  %v11939_v38 = vrot.slane %v3123_v19, %v11397_v4 }
 0x229   :  { %4167 = vmatmul.mubr.bf16.gmra.mrb[36].mxu1 %v11467_v20  ;;  %3950 = vmatprep.mubr.bf16.mxu0 %v11505_v60  ;;  %v9499_v20 = vld [vmem:[%s13272_s5 + $0xcc] ss:$24 sps:$4 sm:$0xff]  }
 0x22a   :  { %4176 = vmatprep.mubr.bf16.mxu1 %v11505_v60  ;;  %5522 = vmatpush1.bf16.msra.mxu0 %v9482_v22  ;;  %v9494_v60 = vld [vmem:[%s13272_s5 + $0xc0] ss:$24 sps:$4 sm:$0xff]   ;;  %v11942_v22 = vrot.slane %v3123_v19, %v11400_v5 }
 0x22b   :  { %5748 = vmatpush1.bf16.msra.mxu1 %v9485_v23  ;;  %5523 = vmatprep.subr.bf16.mxu0 %v9490_v24  ;;  %v11945_v23 = vrot.slane %v3123_v19, %v11406_v7  ;;  %v11948_v24 = vrot.slane %v3123_v19, %v11409_v8  ;;  %v9583_v19 = vld [vmem:[%s13272_s5 + $0x36c] ss:$24 sps:$4 sm:$0xff]  }
 0x22c   :  { %5749 = vmatprep.subr.bf16.mxu1 %v9493_v25 }
 0x22e   :  { %5524 = vmatpush1.bf16.msra.mxu0 %v9488_v26 }
 0x22f   :  { %5750 = vmatpush1.bf16.msra.mxu1 %v9491_v27  ;;  %5525 = vmatprep.subr.bf16.mxu0 %v9496_v28 }
 0x230   :  { %3951 = vmatmul.mubr.bf16.gmra.mrb[40].mxu0 %v11503_v58  ;;  %5751 = vmatprep.subr.bf16.mxu1 %v9499_v20 }
 0x231   :  { %4177 = vmatmul.mubr.bf16.gmra.mrb[40].mxu1 %v11503_v58  ;;  %3960 = vmatprep.mubr.bf16.mxu0 %v11541_v46  ;;  %v9511_v58 = vld [vmem:[%s13272_s5 + $0x12c] ss:$24 sps:$4 sm:$0xff]  }
 0x232   :  { %4186 = vmatprep.mubr.bf16.mxu1 %v11541_v46  ;;  %5526 = vmatpush1.bf16.msra.mxu0 %v9494_v60  ;;  %v9506_v46 = vld [vmem:[%s13272_s5 + $0x120] ss:$24 sps:$4 sm:$0xff]  }
 0x233   :  { %5752 = vmatpush1.bf16.msra.mxu1 %v9497_v29  ;;  %5527 = vmatprep.subr.bf16.mxu0 %v9502_v31 }
 0x234   :  { %5753 = vmatprep.subr.bf16.mxu1 %v9505_v33 }
 0x236   :  { %5528 = vmatpush1.bf16.msra.mxu0 %v9500_v34 }
 0x237   :  { %5754 = vmatpush1.bf16.msra.mxu1 %v9503_v35  ;;  %5529 = vmatprep.subr.bf16.mxu0 %v9508_v36 }
 0x238   :  { %3961 = vmatmul.mubr.bf16.gmra.mrb[44].mxu0 %v11539_v44  ;;  %5755 = vmatprep.subr.bf16.mxu1 %v9511_v58 }
 0x239   :  { %4187 = vmatmul.mubr.bf16.gmra.mrb[44].mxu1 %v11539_v44  ;;  %3970 = vmatprep.mubr.bf16.mxu0 %v11577_v32  ;;  %v9523_v44 = vld [vmem:[%s13272_s5 + $0x18c] ss:$24 sps:$4 sm:$0xff]  }
 0x23a   :  { %4196 = vmatprep.mubr.bf16.mxu1 %v11577_v32  ;;  %5530 = vmatpush1.bf16.msra.mxu0 %v9506_v46  ;;  %v9518_v32 = vld [vmem:[%s13272_s5 + $0x180] ss:$24 sps:$4 sm:$0xff]  }
 0x23b   :  { %5756 = vmatpush1.bf16.msra.mxu1 %v9509_v37  ;;  %5531 = vmatprep.subr.bf16.mxu0 %v9514_v39 }
 0x23c   :  { %5757 = vmatprep.subr.bf16.mxu1 %v9517_v41 }
 0x23e   :  { %5532 = vmatpush1.bf16.msra.mxu0 %v9512_v9 }
 0x23f   :  { %5758 = vmatpush1.bf16.msra.mxu1 %v9515_v10  ;;  %5533 = vmatprep.subr.bf16.mxu0 %v9520_v42 }
 0x240   :  { %3971 = vmatmul.mubr.bf16.gmra.mrb[48].mxu0 %v11575_v30  ;;  %5759 = vmatprep.subr.bf16.mxu1 %v9523_v44 }
 0x241   :  { %4197 = vmatmul.mubr.bf16.gmra.mrb[48].mxu1 %v11575_v30  ;;  %3980 = vmatprep.mubr.bf16.mxu0 %v11613_v21  ;;  %v9535_v30 = vld [vmem:[%s13272_s5 + $0x1ec] ss:$24 sps:$4 sm:$0xff]  }
 0x242   :  { %4206 = vmatprep.mubr.bf16.mxu1 %v11613_v21  ;;  %5534 = vmatpush1.bf16.msra.mxu0 %v9518_v32  ;;  %v9530_v21 = vld [vmem:[%s13272_s5 + $0x1e0] ss:$24 sps:$4 sm:$0xff]  }
 0x243   :  { %5760 = vmatpush1.bf16.msra.mxu1 %v9521_v43  ;;  %5535 = vmatprep.subr.bf16.mxu0 %v9526_v45 }
 0x244   :  { %5761 = vmatprep.subr.bf16.mxu1 %v9529_v11 }
 0x246   :  { %5536 = vmatpush1.bf16.msra.mxu0 %v9524_v12 }
 0x247   :  { %5762 = vmatpush1.bf16.msra.mxu1 %v9527_v47  ;;  %5537 = vmatprep.subr.bf16.mxu0 %v9532_v48 }
 0x248   :  { %3981 = vmatmul.mubr.bf16.gmra.mrb[52].mxu0 %v11611_v18  ;;  %5763 = vmatprep.subr.bf16.mxu1 %v9535_v30  ;;  %v9566_v30 = vld [vmem:[%s13272_s5 + $0x300] ss:$24 sps:$4 sm:$0xff]  }
 0x249   :  { %4207 = vmatmul.mubr.bf16.gmra.mrb[52].mxu1 %v11611_v18  ;;  %3990 = vmatprep.mubr.bf16.mxu0 %v11649_v6  ;;  %v9547_v18 = vld [vmem:[%s13272_s5 + $0x24c] ss:$24 sps:$4 sm:$0xff]  }
 0x24a   :  { %4216 = vmatprep.mubr.bf16.mxu1 %v11649_v6  ;;  %5538 = vmatpush1.bf16.msra.mxu0 %v9530_v21  ;;  %v9542_v6 = vld [vmem:[%s13272_s5 + $0x240] ss:$24 sps:$4 sm:$0xff]  }
 0x24b   :  { %5764 = vmatpush1.bf16.msra.mxu1 %v9533_v49  ;;  %5539 = vmatprep.subr.bf16.mxu0 %v9538_v50  ;;  %v9569_v21 = vld [vmem:[%s13272_s5 + $0x308] ss:$24 sps:$4 sm:$0xff]  }
 0x24c   :  { %5765 = vmatprep.subr.bf16.mxu1 %v9541_v51 }
 0x24e   :  { %5540 = vmatpush1.bf16.msra.mxu0 %v9536_v53 }
 0x24f   :  { %5766 = vmatpush1.bf16.msra.mxu1 %v9539_v55  ;;  %5541 = vmatprep.subr.bf16.mxu0 %v9544_v56  ;;  %v9574_v55 = vld [vmem:[%s13272_s5 + $0x334] ss:$24 sps:$4 sm:$0xff]  }
 0x250   :  { %3991 = vmatmul.mubr.bf16.gmra.mrb[56].mxu0 %v11647_v0  ;;  %5767 = vmatprep.subr.bf16.mxu1 %v9547_v18  ;;  %v9577_v56 = vld [vmem:[%s13272_s5 + $0x33c] ss:$24 sps:$4 sm:$0xff]  }
 0x251   :  { %4217 = vmatmul.mubr.bf16.gmra.mrb[56].mxu1 %v11647_v0  ;;  %4000 = vmatprep.mubr.bf16.mxu0 %v11685_v54  ;;  %v9556_v0 = vld [vmem:[%s13272_s5 + $0x2a4] ss:$24 sps:$4 sm:$0xff]  }
 0x252   :  { %4226 = vmatprep.mubr.bf16.mxu1 %v11685_v54  ;;  %5542 = vmatpush1.bf16.msra.mxu0 %v9542_v6  ;;  %v9554_v54 = vld [vmem:[%s13272_s5 + $0x2a0] ss:$24 sps:$4 sm:$0xff]  }
 0x253   :  { %5768 = vmatpush1.bf16.msra.mxu1 %v9545_v57  ;;  %5543 = vmatprep.subr.bf16.mxu0 %v9550_v59 }
 0x254   :  { %5769 = vmatprep.subr.bf16.mxu1 %v9553_v61 }
 0x256   :  { %5544 = vmatpush1.bf16.msra.mxu0 %v9548_v62 }
 0x257   :  { %5770 = vmatpush1.bf16.msra.mxu1 %v9551_v63  ;;  %5545 = vmatprep.subr.bf16.mxu0 %v9556_v0 }
 0x258   :  { %4001 = vmatmul.mubr.bf16.gmra.mrb[60].mxu0 %v11683_v52  ;;  %5771 = vmatprep.subr.bf16.mxu1 %v9559_v1 }
 0x259   :  { %4227 = vmatmul.mubr.bf16.gmra.mrb[60].mxu1 %v11683_v52  ;;  %v9562_v52 = vld [vmem:[%s13272_s5 + $0x2d4] ss:$24 sps:$4 sm:$0xff]  }
 0x25a   :  { %5546 = vmatpush1.bf16.msra.mxu0 %v9554_v54 }
 0x25b   :  { %5772 = vmatpush1.bf16.msra.mxu1 %v9557_v40  ;;  %5547 = vmatprep.subr.bf16.mxu0 %v9562_v52  ;;  %v9572_v52 = vld [vmem:[%s13272_s5 + $0x330] ss:$24 sps:$4 sm:$0xff]  }
 0x25c   :  { %5773 = vmatprep.subr.bf16.mxu1 %v9565_v14 }
 0x25e   :  { %5548 = vmatpush1.bf16.msra.mxu0 %v9560_v13  ;;  %v9575_v13 = vld [vmem:[%s13272_s5 + $0x338] ss:$24 sps:$4 sm:$0xff]  }
 0x25f   :  { %5774 = vmatpush1.bf16.msra.mxu1 %v9563_v15  ;;  %5630 = vmatprep.subr.bf16.mxu0 %v9568_v16 }
 0x260   :  { %5856 = vmatprep.subr.bf16.mxu1 %v9571_v17  ;;  %v9580_v17 = vld [vmem:[%s13272_s5 + $0x364] ss:$24 sps:$4 sm:$0xff]  }
 0x2f3   :  { %v3932_v25 = vpop.f32.mrb[32].mxu0 }
 0x2f4   :  { %v8368_v26 = vadd.f32 %v3932_v25, %v11939_v38  ;;  %v4158_v27 = vpop.f32.mrb[32].mxu1  ;;  %v3934_v28 = vpop.f32.mrb[33].mxu0 }
 0x2f5   :  { %v8400_v20 = vadd.f32 %v4158_v27, %v11942_v22  ;;  %v8369_v60 = vadd.f32 %v3934_v28, %v11945_v23  ;;  %v4160_v29 = vpop.f32.mrb[33].mxu1  ;;  %v3936_v31 = vpop.f32.mrb[34].mxu0 }
 0x2f6   :  { %v8401_v33 = vadd.f32 %v4160_v29, %v11948_v24  ;;  %v8370_v34 = vadd.f32 %v3936_v31, %v11939_v38  ;;  %v4162_v35 = vpop.f32.mrb[34].mxu1  ;;  %v3938_v36 = vpop.f32.mrb[35].mxu0  ;;  %v4237_v39 = vmax.f32 %v8368_v26, 0.0 }
 0x2f7   :  { %v8402_v58 = vadd.f32 %v4162_v35, %v11942_v22  ;;  %v8371_v46 = vadd.f32 %v3938_v36, %v11945_v23  ;;  %v4164_v37 = vpop.f32.mrb[35].mxu1  ;;  %v4239_v10 = vmax.f32 %v8400_v20, 0.0  ;;  %v4238_v42 = vmax.f32 %v8369_v60, 0.0  ;;  %v9578_v35 = vld [vmem:[%s13272_s5 + $0x360] ss:$24 sps:$4 sm:$0xff]  }
 0x2f8   :  { %v4241_v41 = vmax.f32 %v8370_v34, 0.0  ;;  %v8403_v9 = vadd.f32 %v4164_v37, %v11948_v24  ;;  %v4240_v43 = vmax.f32 %v8401_v33, 0.0  ;;  %v9581_v36 = vld [vmem:[%s13272_s5 + $0x368] ss:$24 sps:$4 sm:$0xff]  }
 0x2f9   :  { %v4243_v44 = vmax.f32 %v8402_v58, 0.0  ;;  %v4242_v32 = vmax.f32 %v8371_v46, 0.0 }
 0x2fa   :  { %v11958_v45 = vpack.c.bf16 %v4241_v41, %v4237_v39  ;;  %v4244_v11 = vmax.f32 %v8403_v9, 0.0  ;;  %v9586_v41 = vld [vmem:[%s13272_s5 + $0x394] ss:$24 sps:$4 sm:$0xff]  }
 0x2fb   :  { %v11960_v12 = vpack.c.bf16 %v4243_v44, %v4239_v10  ;;  %v11962_v47 = vpack.c.bf16 %v4242_v32, %v4238_v42  ;;  %v3942_v48 = vpop.f32.mrb[36].mxu0  ;;  %v9589_v9 = vld [vmem:[%s13272_s5 + $0x39c] ss:$24 sps:$4 sm:$0xff]  }
 0x2fc   :  { %13304 = vst [vmem:[#allocation12_spill] sm:$0xff] %v11958_v45  ;;  %v11970_v49 = vpack.c.bf16 %v4244_v11, %v4240_v43  ;;  %v8372_v50 = vadd.f32 %v3942_v48, %v11939_v38  ;;  %v4168_v51 = vpop.f32.mrb[36].mxu1  ;;  %v3944_v53 = vpop.f32.mrb[37].mxu0 }
 0x2fd   :  { %13305 = vst [vmem:[#allocation13_spill] sm:$0xff] %v11962_v47  ;;  %v8404_v18 = vadd.f32 %v4168_v51, %v11942_v22  ;;  %v8373_v6 = vadd.f32 %v3944_v53, %v11945_v23  ;;  %v4170_v57 = vpop.f32.mrb[37].mxu1  ;;  %v3946_v59 = vpop.f32.mrb[38].mxu0  ;;  %5549 = vmatprep.mubr.bf16.mxu0 %v11962_v47  ;;  %5775 = vmatprep.mubr.bf16.mxu1 %v11962_v47  ;;  %v9584_v53 = vld [vmem:[%s13272_s5 + $0x390] ss:$24 sps:$4 sm:$0xff]  }
 0x2fe   :  { %v8405_v61 = vadd.f32 %v4170_v57, %v11948_v24  ;;  %v8374_v62 = vadd.f32 %v3946_v59, %v11939_v38  ;;  %v4172_v63 = vpop.f32.mrb[38].mxu1  ;;  %v3948_v0 = vpop.f32.mrb[39].mxu0  ;;  %5550 = vmatmul.mubr.bf16.vlgmr.msra.gmra.mrb[64].mxu0 %v11958_v45  ;;  %5776 = vmatmul.mubr.bf16.vlgmr.msra.gmra.mrb[64].mxu1 %v11958_v45  ;;  %v4245_v14 = vmax.f32 %v8372_v50, 0.0  ;;  %v9592_v57 = vld [vmem:[%s13272_s5 + $0x3c4] ss:$24 sps:$4 sm:$0xff]  }
 0x2ff   :  { %v8406_v54 = vadd.f32 %v4172_v63, %v11942_v22  ;;  %v8375_v1 = vadd.f32 %v3948_v0, %v11945_v23  ;;  %v4174_v40 = vpop.f32.mrb[39].mxu1  ;;  %5631 = vmatpush1.bf16.msra.mxu0 %v9566_v30  ;;  %5857 = vmatpush1.bf16.msra.mxu1 %v9569_v21  ;;  %v4247_v25 = vmax.f32 %v8404_v18, 0.0  ;;  %v4246_v26 = vmax.f32 %v8373_v6, 0.0  ;;  %v9595_v59 = vld [vmem:[%s13272_s5 + $0x3cc] ss:$24 sps:$4 sm:$0xff]  }
 0x300   :  { %v4249_v15 = vmax.f32 %v8374_v62, 0.0  ;;  %v8407_v16 = vadd.f32 %v4174_v40, %v11948_v24  ;;  %5632 = vmatprep.subr.bf16.mxu0 %v9574_v55  ;;  %5858 = vmatprep.subr.bf16.mxu1 %v9577_v56  ;;  %v4248_v20 = vmax.f32 %v8405_v61, 0.0  ;;  %v9587_v55 = vld [vmem:[%s13272_s5 + $0x398] ss:$24 sps:$4 sm:$0xff]  }
 0x301   :  { %v4251_v27 = vmax.f32 %v8406_v54, 0.0  ;;  %v4250_v28 = vmax.f32 %v8375_v1, 0.0 }
 0x302   :  { %v12002_v60 = vpack.c.bf16 %v4249_v15, %v4245_v14  ;;  %v4252_v29 = vmax.f32 %v8407_v16, 0.0  ;;  %v9590_v15 = vld [vmem:[%s13272_s5 + $0x3c0] ss:$24 sps:$4 sm:$0xff]  }
 0x303   :  { %v12004_v31 = vpack.c.bf16 %v4251_v27, %v4247_v25  ;;  %v12006_v33 = vpack.c.bf16 %v4250_v28, %v4246_v26  ;;  %5633 = vmatpush1.bf16.msra.mxu0 %v9572_v52  ;;  %v3952_v34 = vpop.f32.mrb[40].mxu0  ;;  %5859 = vmatpush1.bf16.msra.mxu1 %v9575_v13  ;;  %v9593_v16 = vld [vmem:[%s13272_s5 + $0x3c8] ss:$24 sps:$4 sm:$0xff]   ;;  %v9598_v27 = vld [vmem:[%s13272_s5 + $0x3f4] ss:$24 sps:$4 sm:$0xff]  }
 0x304   :  { %13306 = vst [vmem:[#allocation14_spill] sm:$0xff] %v12002_v60  ;;  %v12014_v58 = vpack.c.bf16 %v4252_v29, %v4248_v20  ;;  %v8376_v46 = vadd.f32 %v3952_v34, %v11939_v38  ;;  %v4178_v37 = vpop.f32.mrb[40].mxu1  ;;  %v3954_v39 = vpop.f32.mrb[41].mxu0  ;;  %5634 = vmatprep.subr.bf16.mxu0 %v9580_v17  ;;  %5860 = vmatprep.subr.bf16.mxu1 %v9583_v19  ;;  %v9601_v28 = vld [vmem:[%s13272_s5 + $0x3fc] ss:$24 sps:$4 sm:$0xff]  }
 0x305   :  { %13307 = vst [vmem:[#allocation15_spill] sm:$0xff] %v12006_v33  ;;  %v8408_v10 = vadd.f32 %v4178_v37, %v11942_v22  ;;  %v8377_v42 = vadd.f32 %v3954_v39, %v11945_v23  ;;  %v4180_v44 = vpop.f32.mrb[41].mxu1  ;;  %v3956_v32 = vpop.f32.mrb[42].mxu0  ;;  %5559 = vmatprep.mubr.bf16.mxu0 %v12006_v33  ;;  %5785 = vmatprep.mubr.bf16.mxu1 %v12006_v33 }
 0x306   :  { %v8409_v43 = vadd.f32 %v4180_v44, %v11948_v24  ;;  %v8378_v11 = vadd.f32 %v3956_v32, %v11939_v38  ;;  %v4182_v48 = vpop.f32.mrb[42].mxu1  ;;  %v3958_v30 = vpop.f32.mrb[43].mxu0  ;;  %5560 = vmatmul.mubr.bf16.gmra.mrb[68].mxu0 %v12002_v60  ;;  %5786 = vmatmul.mubr.bf16.gmra.mrb[68].mxu1 %v12002_v60  ;;  %v4253_v56 = vmax.f32 %v8376_v46, 0.0  ;;  %v9599_v44 = vld [vmem:[%s13272_s5 + $0x3f8] ss:$24 sps:$4 sm:$0xff]  }
 0x307   :  { %v8410_v21 = vadd.f32 %v4182_v48, %v11942_v22  ;;  %v8379_v50 = vadd.f32 %v3958_v30, %v11945_v23  ;;  %v4184_v51 = vpop.f32.mrb[43].mxu1  ;;  %5635 = vmatpush1.bf16.msra.mxu0 %v9578_v35  ;;  %5861 = vmatpush1.bf16.msra.mxu1 %v9581_v36  ;;  %v4255_v61 = vmax.f32 %v8408_v10, 0.0  ;;  %v4254_v62 = vmax.f32 %v8377_v42, 0.0  ;;  %v9596_v42 = vld [vmem:[%s13272_s5 + $0x3f0] ss:$24 sps:$4 sm:$0xff]  }
 0x308   :  { %v4257_v18 = vmax.f32 %v8378_v11, 0.0  ;;  %v8411_v6 = vadd.f32 %v4184_v51, %v11948_v24  ;;  %5636 = vmatprep.subr.bf16.mxu0 %v9586_v41  ;;  %5862 = vmatprep.subr.bf16.mxu1 %v9589_v9  ;;  %v4256_v54 = vmax.f32 %v8409_v43, 0.0  ;;  %v9604_v48 = vld [vmem:[%s13272_s5 + $0x424] ss:$24 sps:$4 sm:$0xff]  }
 0x309   :  { %v4259_v63 = vmax.f32 %v8410_v21, 0.0  ;;  %v4258_v0 = vmax.f32 %v8379_v50, 0.0  ;;  %v9607_v30 = vld [vmem:[%s13272_s5 + $0x42c] ss:$24 sps:$4 sm:$0xff]  }
 0x30a   :  { %v12046_v1 = vpack.c.bf16 %v4257_v18, %v4253_v56  ;;  %v4260_v40 = vmax.f32 %v8411_v6, 0.0 }
 0x30b   :  { %v12048_v52 = vpack.c.bf16 %v4259_v63, %v4255_v61  ;;  %v12050_v13 = vpack.c.bf16 %v4258_v0, %v4254_v62  ;;  %5637 = vmatpush1.bf16.msra.mxu0 %v9584_v53  ;;  %v3962_v14 = vpop.f32.mrb[44].mxu0  ;;  %5863 = vmatpush1.bf16.msra.mxu1 %v9587_v55  ;;  %v9602_v61 = vld [vmem:[%s13272_s5 + $0x420] ss:$24 sps:$4 sm:$0xff]  }
 0x30c   :  { %13308 = vst [vmem:[#allocation16_spill] sm:$0xff] %v12046_v1  ;;  %v12058_v17 = vpack.c.bf16 %v4260_v40, %v4256_v54  ;;  %v8380_v19 = vadd.f32 %v3962_v14, %v11939_v38  ;;  %v4188_v25 = vpop.f32.mrb[44].mxu1  ;;  %v3964_v26 = vpop.f32.mrb[45].mxu0  ;;  %5638 = vmatprep.subr.bf16.mxu0 %v9592_v57  ;;  %5864 = vmatprep.subr.bf16.mxu1 %v9595_v59  ;;  %v9605_v62 = vld [vmem:[%s13272_s5 + $0x428] ss:$24 sps:$4 sm:$0xff]  }
 0x30d   :  { %13309 = vst [vmem:[#allocation17_spill] sm:$0xff] %v12050_v13  ;;  %v8412_v20 = vadd.f32 %v4188_v25, %v11942_v22  ;;  %v8381_v29 = vadd.f32 %v3964_v26, %v11945_v23  ;;  %v4190_v34 = vpop.f32.mrb[45].mxu1  ;;  %v3966_v35 = vpop.f32.mrb[46].mxu0  ;;  %5569 = vmatprep.mubr.bf16.mxu0 %v12050_v13  ;;  %5795 = vmatprep.mubr.bf16.mxu1 %v12050_v13  ;;  %v9610_v14 = vld [vmem:[%s13272_s5 + $0x454] ss:$24 sps:$4 sm:$0xff]  }
 0x30e   :  { %v8413_v36 = vadd.f32 %v4190_v34, %v11948_v24  ;;  %v8382_v46 = vadd.f32 %v3966_v35, %v11939_v38  ;;  %v4192_v37 = vpop.f32.mrb[46].mxu1  ;;  %v3968_v39 = vpop.f32.mrb[47].mxu0  ;;  %5570 = vmatmul.mubr.bf16.gmra.mrb[72].mxu0 %v12046_v1  ;;  %5796 = vmatmul.mubr.bf16.gmra.mrb[72].mxu1 %v12046_v1  ;;  %v4261_v32 = vmax.f32 %v8380_v19, 0.0 }
 0x30f   :  { %v8414_v41 = vadd.f32 %v4192_v37, %v11942_v22  ;;  %v8383_v9 = vadd.f32 %v3968_v39, %v11945_v23  ;;  %v4194_v10 = vpop.f32.mrb[47].mxu1  ;;  %5639 = vmatpush1.bf16.msra.mxu0 %v9590_v15  ;;  %5865 = vmatpush1.bf16.msra.mxu1 %v9593_v16  ;;  %v4263_v21 = vmax.f32 %v8412_v20, 0.0  ;;  %v4262_v50 = vmax.f32 %v8381_v29, 0.0  ;;  %v9613_v15 = vld [vmem:[%s13272_s5 + $0x45c] ss:$24 sps:$4 sm:$0xff]  }
 0x310   :  { %v4265_v43 = vmax.f32 %v8382_v46, 0.0  ;;  %v8415_v11 = vadd.f32 %v4194_v10, %v11948_v24  ;;  %5640 = vmatprep.subr.bf16.mxu0 %v9598_v27  ;;  %5866 = vmatprep.subr.bf16.mxu1 %v9601_v28  ;;  %v4264_v55 = vmax.f32 %v8413_v36, 0.0  ;;  %v9608_v46 = vld [vmem:[%s13272_s5 + $0x450] ss:$24 sps:$4 sm:$0xff]   ;;  %v9616_v10 = vld [vmem:[%s13272_s5 + $0x484] ss:$24 sps:$4 sm:$0xff]  }
 0x311   :  { %v4267_v51 = vmax.f32 %v8414_v41, 0.0  ;;  %v4266_v53 = vmax.f32 %v8383_v9, 0.0  ;;  %v9611_v37 = vld [vmem:[%s13272_s5 + $0x458] ss:$24 sps:$4 sm:$0xff]  }
 0x312   :  { %v12090_v56 = vpack.c.bf16 %v4265_v43, %v4261_v32  ;;  %v4268_v18 = vmax.f32 %v8415_v11, 0.0 }
 0x313   :  { %v12092_v6 = vpack.c.bf16 %v4267_v51, %v4263_v21  ;;  %v12094_v57 = vpack.c.bf16 %v4266_v53, %v4262_v50  ;;  %5641 = vmatpush1.bf16.msra.mxu0 %v9596_v42  ;;  %v3972_v59 = vpop.f32.mrb[48].mxu0  ;;  %5867 = vmatpush1.bf16.msra.mxu1 %v9599_v44  ;;  %v9619_v42 = vld [vmem:[%s13272_s5 + $0x48c] ss:$24 sps:$4 sm:$0xff]  }
 0x314   :  { %13310 = vst [vmem:[#allocation18_spill] sm:$0xff] %v12090_v56  ;;  %v12102_v63 = vpack.c.bf16 %v4268_v18, %v4264_v55  ;;  %v8384_v0 = vadd.f32 %v3972_v59, %v11939_v38  ;;  %v4198_v54 = vpop.f32.mrb[48].mxu1  ;;  %v3974_v40 = vpop.f32.mrb[49].mxu0  ;;  %5642 = vmatprep.subr.bf16.mxu0 %v9604_v48  ;;  %5868 = vmatprep.subr.bf16.mxu1 %v9607_v30  ;;  %v9614_v55 = vld [vmem:[%s13272_s5 + $0x480] ss:$24 sps:$4 sm:$0xff]  }
 0x315   :  { %13311 = vst [vmem:[#allocation19_spill] sm:$0xff] %v12094_v57  ;;  %v8416_v16 = vadd.f32 %v4198_v54, %v11942_v22  ;;  %v8385_v19 = vadd.f32 %v3974_v40, %v11945_v23  ;;  %v4200_v25 = vpop.f32.mrb[49].mxu1  ;;  %v3976_v26 = vpop.f32.mrb[50].mxu0  ;;  %5579 = vmatprep.mubr.bf16.mxu0 %v12094_v57  ;;  %5805 = vmatprep.mubr.bf16.mxu1 %v12094_v57  ;;  %v9617_v18 = vld [vmem:[%s13272_s5 + $0x488] ss:$24 sps:$4 sm:$0xff]  }
 0x316   :  { %v8417_v27 = vadd.f32 %v4200_v25, %v11948_v24  ;;  %v8386_v28 = vadd.f32 %v3976_v26, %v11939_v38  ;;  %v4202_v20 = vpop.f32.mrb[50].mxu1  ;;  %v3978_v29 = vpop.f32.mrb[51].mxu0  ;;  %5580 = vmatmul.mubr.bf16.gmra.mrb[76].mxu0 %v12090_v56  ;;  %5806 = vmatmul.mubr.bf16.gmra.mrb[76].mxu1 %v12090_v56  ;;  %v4269_v39 = vmax.f32 %v8384_v0, 0.0  ;;  %v9622_v54 = vld [vmem:[%s13272_s5 + $0x4b4] ss:$24 sps:$4 sm:$0xff]  }
 0x317   :  { %v8418_v34 = vadd.f32 %v4202_v20, %v11942_v22  ;;  %v8387_v35 = vadd.f32 %v3978_v29, %v11945_v23  ;;  %v4204_v36 = vpop.f32.mrb[51].mxu1  ;;  %5643 = vmatpush1.bf16.msra.mxu0 %v9602_v61  ;;  %5869 = vmatpush1.bf16.msra.mxu1 %v9605_v62  ;;  %v4271_v44 = vmax.f32 %v8416_v16, 0.0  ;;  %v4270_v32 = vmax.f32 %v8385_v19, 0.0  ;;  %v9625_v40 = vld [vmem:[%s13272_s5 + $0x4bc] ss:$24 sps:$4 sm:$0xff]  }
 0x318   :  { %v4273_v41 = vmax.f32 %v8386_v28, 0.0  ;;  %v8419_v9 = vadd.f32 %v4204_v36, %v11948_v24  ;;  %5644 = vmatprep.subr.bf16.mxu0 %v9610_v14  ;;  %5870 = vmatprep.subr.bf16.mxu1 %v9613_v15  ;;  %v4272_v48 = vmax.f32 %v8417_v27, 0.0  ;;  %v9623_v36 = vld [vmem:[%s13272_s5 + $0x4b8] ss:$24 sps:$4 sm:$0xff]  }
 0x319   :  { %v4275_v43 = vmax.f32 %v8418_v34, 0.0  ;;  %v4274_v11 = vmax.f32 %v8387_v35, 0.0  ;;  %v9620_v35 = vld [vmem:[%s13272_s5 + $0x4b0] ss:$24 sps:$4 sm:$0xff]  }
 0x31a   :  { %v12134_v30 = vpack.c.bf16 %v4273_v41, %v4269_v39  ;;  %v4276_v21 = vmax.f32 %v8419_v9, 0.0  ;;  %v9628_v41 = vld [vmem:[%s13272_s5 + $0x4e4] ss:$24 sps:$4 sm:$0xff]  }
 0x31b   :  { %v12136_v50 = vpack.c.bf16 %v4275_v43, %v4271_v44  ;;  %v12138_v51 = vpack.c.bf16 %v4274_v11, %v4270_v32  ;;  %5645 = vmatpush1.bf16.msra.mxu0 %v9608_v46  ;;  %v3982_v53 = vpop.f32.mrb[52].mxu0  ;;  %5871 = vmatpush1.bf16.msra.mxu1 %v9611_v37  ;;  %v9631_v9 = vld [vmem:[%s13272_s5 + $0x4ec] ss:$24 sps:$4 sm:$0xff]  }
 0x31c   :  { %13312 = vst [vmem:[#allocation20_spill] sm:$0xff] %v12134_v30  ;;  %v12146_v59 = vpack.c.bf16 %v4276_v21, %v4272_v48  ;;  %v8388_v61 = vadd.f32 %v3982_v53, %v11939_v38  ;;  %v4208_v62 = vpop.f32.mrb[52].mxu1  ;;  %v3984_v0 = vpop.f32.mrb[53].mxu0  ;;  %5646 = vmatprep.subr.bf16.mxu0 %v9616_v10  ;;  %5872 = vmatprep.subr.bf16.mxu1 %v9619_v42 }
 0x31d   :  { %13313 = vst [vmem:[#allocation21_spill] sm:$0xff] %v12138_v51  ;;  %v8420_v14 = vadd.f32 %v4208_v62, %v11942_v22  ;;  %v8389_v15 = vadd.f32 %v3984_v0, %v11945_v23  ;;  %v4210_v16 = vpop.f32.mrb[53].mxu1  ;;  %v3986_v19 = vpop.f32.mrb[54].mxu0  ;;  %5589 = vmatprep.mubr.bf16.mxu0 %v12138_v51  ;;  %5815 = vmatprep.mubr.bf16.mxu1 %v12138_v51 }
 0x31e   :  { %v8421_v25 = vadd.f32 %v4210_v16, %v11948_v24  ;;  %v8390_v26 = vadd.f32 %v3986_v19, %v11939_v38  ;;  %v4212_v27 = vpop.f32.mrb[54].mxu1  ;;  %v3988_v28 = vpop.f32.mrb[55].mxu0  ;;  %5590 = vmatmul.mubr.bf16.gmra.mrb[80].mxu0 %v12134_v30  ;;  %5816 = vmatmul.mubr.bf16.gmra.mrb[80].mxu1 %v12134_v30  ;;  %v4277_v46 = vmax.f32 %v8388_v61, 0.0  ;;  %v9629_v61 = vld [vmem:[%s13272_s5 + $0x4e8] ss:$24 sps:$4 sm:$0xff]  }
 0x31f   :  { %v8422_v20 = vadd.f32 %v4212_v27, %v11942_v22  ;;  %v8391_v29 = vadd.f32 %v3988_v28, %v11945_v23  ;;  %v4214_v34 = vpop.f32.mrb[55].mxu1  ;;  %5647 = vmatpush1.bf16.msra.mxu0 %v9614_v55  ;;  %5873 = vmatpush1.bf16.msra.mxu1 %v9617_v18  ;;  %v4279_v10 = vmax.f32 %v8420_v14, 0.0  ;;  %v4278_v42 = vmax.f32 %v8389_v15, 0.0  ;;  %v9626_v18 = vld [vmem:[%s13272_s5 + $0x4e0] ss:$24 sps:$4 sm:$0xff]  }
 0x320   :  { %v4281_v37 = vmax.f32 %v8390_v26, 0.0  ;;  %v8423_v39 = vadd.f32 %v4214_v34, %v11948_v24  ;;  %5648 = vmatprep.subr.bf16.mxu0 %v9622_v54  ;;  %5874 = vmatprep.subr.bf16.mxu1 %v9625_v40  ;;  %v4280_v43 = vmax.f32 %v8421_v25, 0.0  ;;  %v9634_v14 = vld [vmem:[%s13272_s5 + $0x514] ss:$24 sps:$4 sm:$0xff]  }
 0x321   :  { %v4283_v44 = vmax.f32 %v8422_v20, 0.0  ;;  %v4282_v32 = vmax.f32 %v8391_v29, 0.0  ;;  %v9637_v15 = vld [vmem:[%s13272_s5 + $0x51c] ss:$24 sps:$4 sm:$0xff]  }
 0x322   :  { %v12178_v11 = vpack.c.bf16 %v4281_v37, %v4277_v46  ;;  %v4284_v48 = vmax.f32 %v8423_v39, 0.0  ;;  %v9632_v46 = vld [vmem:[%s13272_s5 + $0x510] ss:$24 sps:$4 sm:$0xff]  }
 0x323   :  { %v12180_v21 = vpack.c.bf16 %v4283_v44, %v4279_v10  ;;  %v12182_v53 = vpack.c.bf16 %v4282_v32, %v4278_v42  ;;  %5649 = vmatpush1.bf16.msra.mxu0 %v9620_v35  ;;  %v3992_v55 = vpop.f32.mrb[56].mxu0  ;;  %5875 = vmatpush1.bf16.msra.mxu1 %v9623_v36  ;;  %v9635_v37 = vld [vmem:[%s13272_s5 + $0x518] ss:$24 sps:$4 sm:$0xff]   ;;  %v9640_v10 = vld [vmem:[%s13272_s5 + $0x544] ss:$24 sps:$4 sm:$0xff]  }
 0x324   :  { %13314 = vst [vmem:[#allocation22_spill] sm:$0xff] %v12178_v11  ;;  %v12190_v62 = vpack.c.bf16 %v4284_v48, %v4280_v43  ;;  %v8392_v0 = vadd.f32 %v3992_v55, %v11939_v38  ;;  %v4218_v54 = vpop.f32.mrb[56].mxu1  ;;  %v3994_v40 = vpop.f32.mrb[57].mxu0  ;;  %5650 = vmatprep.subr.bf16.mxu0 %v9628_v41  ;;  %5876 = vmatprep.subr.bf16.mxu1 %v9631_v9  ;;  %v9643_v42 = vld [vmem:[%s13272_s5 + $0x54c] ss:$24 sps:$4 sm:$0xff]  }
 0x325   :  { %13315 = vst [vmem:[#allocation23_spill] sm:$0xff] %v12182_v53  ;;  %v8424_v16 = vadd.f32 %v4218_v54, %v11942_v22  ;;  %v8393_v19 = vadd.f32 %v3994_v40, %v11945_v23  ;;  %v4220_v25 = vpop.f32.mrb[57].mxu1  ;;  %v3996_v26 = vpop.f32.mrb[58].mxu0  ;;  %5599 = vmatprep.mubr.bf16.mxu0 %v12182_v53  ;;  %5825 = vmatprep.mubr.bf16.mxu1 %v12182_v53 }
 0x326   :  { %v8425_v27 = vadd.f32 %v4220_v25, %v11948_v24  ;;  %v8394_v28 = vadd.f32 %v3996_v26, %v11939_v38  ;;  %v4222_v20 = vpop.f32.mrb[58].mxu1  ;;  %v3998_v29 = vpop.f32.mrb[59].mxu0  ;;  %5600 = vmatmul.mubr.bf16.gmra.mrb[84].mxu0 %v12178_v11  ;;  %5826 = vmatmul.mubr.bf16.gmra.mrb[84].mxu1 %v12178_v11  ;;  %v4285_v39 = vmax.f32 %v8392_v0, 0.0 }
 0x327   :  { %v8426_v34 = vadd.f32 %v4222_v20, %v11942_v22  ;;  %v8395_v35 = vadd.f32 %v3998_v29, %v11945_v23  ;;  %v4224_v36 = vpop.f32.mrb[59].mxu1  ;;  %5651 = vmatpush1.bf16.msra.mxu0 %v9626_v18  ;;  %5877 = vmatpush1.bf16.msra.mxu1 %v9629_v61  ;;  %v4287_v44 = vmax.f32 %v8424_v16, 0.0  ;;  %v4286_v32 = vmax.f32 %v8393_v19, 0.0 }
 0x328   :  { %v4289_v41 = vmax.f32 %v8394_v28, 0.0  ;;  %v8427_v9 = vadd.f32 %v4224_v36, %v11948_v24  ;;  %5652 = vmatprep.subr.bf16.mxu0 %v9634_v14  ;;  %5878 = vmatprep.subr.bf16.mxu1 %v9637_v15  ;;  %v4288_v55 = vmax.f32 %v8425_v27, 0.0  ;;  %v9638_v14 = vld [vmem:[%s13272_s5 + $0x540] ss:$24 sps:$4 sm:$0xff]   ;;  %v9646_v27 = vld [vmem:[%s13272_s5 + $0x574] ss:$24 sps:$4 sm:$0xff]  }
 0x329   :  { %v4291_v43 = vmax.f32 %v8426_v34, 0.0  ;;  %v4290_v48 = vmax.f32 %v8395_v35, 0.0  ;;  %v9641_v15 = vld [vmem:[%s13272_s5 + $0x548] ss:$24 sps:$4 sm:$0xff]   ;;  %v9649_v28 = vld [vmem:[%s13272_s5 + $0x57c] ss:$24 sps:$4 sm:$0xff]  }
 0x32a   :  { %v12222_v18 = vpack.c.bf16 %v4289_v41, %v4285_v39  ;;  %v4292_v61 = vmax.f32 %v8427_v9, 0.0 }
 0x32b   :  { %v12224_v0 = vpack.c.bf16 %v4291_v43, %v4287_v44  ;;  %v12226_v54 = vpack.c.bf16 %v4290_v48, %v4286_v32  ;;  %5653 = vmatpush1.bf16.msra.mxu0 %v9632_v46  ;;  %v4002_v40 = vpop.f32.mrb[60].mxu0  ;;  %5879 = vmatpush1.bf16.msra.mxu1 %v9635_v37 }
 0x32c   :  { %13316 = vst [vmem:[#allocation24_spill] sm:$0xff] %v12222_v18  ;;  %v12234_v16 = vpack.c.bf16 %v4292_v61, %v4288_v55  ;;  %v8396_v19 = vadd.f32 %v4002_v40, %v11939_v38  ;;  %v4228_v25 = vpop.f32.mrb[60].mxu1  ;;  %v4004_v26 = vpop.f32.mrb[61].mxu0  ;;  %5654 = vmatprep.subr.bf16.mxu0 %v9640_v10  ;;  %5880 = vmatprep.subr.bf16.mxu1 %v9643_v42  ;;  %v9644_v42 = vld [vmem:[%s13272_s5 + $0x570] ss:$24 sps:$4 sm:$0xff]  }
 0x32d   :  { %13317 = vst [vmem:[#allocation25_spill] sm:$0xff] %v12226_v54  ;;  %v8428_v20 = vadd.f32 %v4228_v25, %v11942_v22  ;;  %v8397_v29 = vadd.f32 %v4004_v26, %v11945_v23  ;;  %v4230_v34 = vpop.f32.mrb[61].mxu1  ;;  %v4006_v35 = vpop.f32.mrb[62].mxu0  ;;  %5609 = vmatprep.mubr.bf16.mxu0 %v12226_v54  ;;  %5835 = vmatprep.mubr.bf16.mxu1 %v12226_v54  ;;  %v9650_v26 = vld [vmem:[%s13272_s5 + $0x5a0] ss:$24 sps:$4 sm:$0xff]  }
 0x32e   :  { %v8429_v36 = vadd.f32 %v4230_v34, %v11948_v24  ;;  %v8398_v46 = vadd.f32 %v4006_v35, %v11939_v38  ;;  %v4232_v37 = vpop.f32.mrb[62].mxu1  ;;  %v4008_v39 = vpop.f32.mrb[63].mxu0  ;;  %5610 = vmatmul.mubr.bf16.gmra.mrb[88].mxu0 %v12222_v18  ;;  %5836 = vmatmul.mubr.bf16.gmra.mrb[88].mxu1 %v12222_v18  ;;  %v9647_v38 = vld [vmem:[%s13272_s5 + $0x578] ss:$24 sps:$4 sm:$0xff]   ;;  %v4293_v44 = vmax.f32 %v8396_v19, 0.0 }
 0x32f   :  { %v8430_v41 = vadd.f32 %v4232_v37, %v11942_v22  ;;  %v8399_v9 = vadd.f32 %v4008_v39, %v11945_v23  ;;  %v4234_v10 = vpop.f32.mrb[63].mxu1  ;;  %5655 = vmatpush1.bf16.msra.mxu0 %v9638_v14  ;;  %5881 = vmatpush1.bf16.msra.mxu1 %v9641_v15  ;;  %v9652_v22 = vld [vmem:[%s13272_s5 + $0x5a4] ss:$24 sps:$4 sm:$0xff]   ;;  %v4295_v48 = vmax.f32 %v8428_v20, 0.0  ;;  %v4294_v55 = vmax.f32 %v8397_v29, 0.0 }
 0x330   :  { %v4297_v32 = vmax.f32 %v8398_v46, 0.0  ;;  %v8431_v43 = vadd.f32 %v4234_v10, %v11948_v24  ;;  %5656 = vmatprep.subr.bf16.mxu0 %v9646_v27  ;;  %5882 = vmatprep.subr.bf16.mxu1 %v9649_v28  ;;  %v9655_v23 = vld [vmem:[%s13272_s5 + $0x5ac] ss:$24 sps:$4 sm:$0xff]   ;;  %v4296_v14 = vmax.f32 %v8429_v36, 0.0  ;;  %v9653_v28 = vld [vmem:[%s13272_s5 + $0x5a8] ss:$24 sps:$4 sm:$0xff]  }
 0x331   :  { %v4299_v61 = vmax.f32 %v8430_v41, 0.0  ;;  %v4298_v40 = vmax.f32 %v8399_v9, 0.0  ;;  %v9658_v20 = vld [vmem:[%s13272_s5 + $0x5d4] ss:$24 sps:$4 sm:$0xff]   ;;  %v9656_v34 = vld [vmem:[%s13272_s5 + $0x5d0] ss:$24 sps:$4 sm:$0xff]  }
 0x332   :  { %v12266_v15 = vpack.c.bf16 %v4297_v32, %v4293_v44  ;;  %v4300_v19 = vmax.f32 %v8431_v43, 0.0  ;;  %v9661_v29 = vld [vmem:[%s13272_s5 + $0x5dc] ss:$24 sps:$4 sm:$0xff]   ;;  %v9659_v35 = vld [vmem:[%s13272_s5 + $0x5d8] ss:$24 sps:$4 sm:$0xff]  }
 0x333   :  { %v12268_v25 = vpack.c.bf16 %v4299_v61, %v4295_v48  ;;  %v12270_v24 = vpack.c.bf16 %v4298_v40, %v4294_v55  ;;  %5657 = vmatpush1.bf16.msra.mxu0 %v9644_v42  ;;  %5883 = vmatpush1.bf16.msra.mxu1 %v9647_v38  ;;  %v9664_v36 = vld [vmem:[%s13272_s5 + $0x14] ss:$24 sps:$4 sm:$0xff]   ;;  %v9662_v46 = vld [vmem:[%s13272_s5 + $0x10] ss:$24 sps:$4 sm:$0xff]   ;;  %v9667_v37 = vld [vmem:[%s13272_s5 + $0x44] ss:$24 sps:$4 sm:$0xff]  }
 0x334   :  { %13318 = vst [vmem:[#allocation26_spill] sm:$0xff] %v12266_v15  ;;  %v12275_v27 = vpack.c.bf16 %v4300_v19, %v4296_v14  ;;  %5658 = vmatprep.subr.bf16.mxu0 %v9652_v22  ;;  %5884 = vmatprep.subr.bf16.mxu1 %v9655_v23  ;;  %v9665_v39 = vld [vmem:[%s13272_s5 + $0x40] ss:$24 sps:$4 sm:$0xff]   ;;  %v9670_v41 = vld [vmem:[%s13272_s5 + $0x74] ss:$24 sps:$4 sm:$0xff]  }
 0x335   :  { %13319 = vst [vmem:[#allocation27_spill] sm:$0xff] %v12270_v24  ;;  %5619 = vmatprep.mubr.bf16.mxu0 %v12270_v24  ;;  %5845 = vmatprep.mubr.bf16.mxu1 %v12270_v24  ;;  %v9668_v9 = vld [vmem:[%s13272_s5 + $0x70] ss:$24 sps:$4 sm:$0xff]   ;;  %v9673_v10 = vld [vmem:[%s13272_s5 + $0xa4] ss:$24 sps:$4 sm:$0xff]  }
 0x336   :  { %5620 = vmatmul.mubr.bf16.gmra.mrb[92].mxu0 %v12266_v15  ;;  %5846 = vmatmul.mubr.bf16.gmra.mrb[92].mxu1 %v12266_v15  ;;  %v9671_v42 = vld [vmem:[%s13272_s5 + $0xa0] ss:$24 sps:$4 sm:$0xff]   ;;  %v9676_v38 = vld [vmem:[%s13272_s5 + $0xd4] ss:$24 sps:$4 sm:$0xff]   ;;  %v9674_v44 = vld [vmem:[%s13272_s5 + $0xd0] ss:$24 sps:$4 sm:$0xff]  }
 0x337   :  { %5659 = vmatpush1.bf16.msra.mxu0 %v9650_v26  ;;  %5662 = vmatprep.mubr.bf16.mxu0 %v11970_v49  ;;  %v9679_v32 = vld [vmem:[%s13272_s5 + $0x104] ss:$24 sps:$4 sm:$0xff]   ;;  %v9677_v43 = vld [vmem:[%s13272_s5 + $0x100] ss:$24 sps:$4 sm:$0xff]   ;;  %v9682_v22 = vld [vmem:[%s13272_s5 + $0x134] ss:$24 sps:$4 sm:$0xff]  }
 0x338   :  { %5885 = vmatpush1.bf16.msra.mxu1 %v9653_v28  ;;  %5888 = vmatprep.mubr.bf16.mxu1 %v11970_v49  ;;  %v9680_v23 = vld [vmem:[%s13272_s5 + $0x130] ss:$24 sps:$4 sm:$0xff]   ;;  %v9685_v48 = vld [vmem:[%s13272_s5 + $0x164] ss:$24 sps:$4 sm:$0xff]   ;;  %v9683_v55 = vld [vmem:[%s13272_s5 + $0x160] ss:$24 sps:$4 sm:$0xff]  }
 0x339   :  { %5660 = vmatprep.subr.bf16.mxu0 %v9658_v20  ;;  %5886 = vmatprep.subr.bf16.mxu1 %v9661_v29  ;;  %v9688_v61 = vld [vmem:[%s13272_s5 + $0x194] ss:$24 sps:$4 sm:$0xff]   ;;  %v9686_v40 = vld [vmem:[%s13272_s5 + $0x190] ss:$24 sps:$4 sm:$0xff]   ;;  %v9691_v14 = vld [vmem:[%s13272_s5 + $0x1c4] ss:$24 sps:$4 sm:$0xff]  }
 0x33a   :  { %v9689_v19 = vld [vmem:[%s13272_s5 + $0x1c0] ss:$24 sps:$4 sm:$0xff]   ;;  %v9694_v26 = vld [vmem:[%s13272_s5 + $0x1f4] ss:$24 sps:$4 sm:$0xff]   ;;  %v9692_v28 = vld [vmem:[%s13272_s5 + $0x1f0] ss:$24 sps:$4 sm:$0xff]  }
 0x33b   :  { %5661 = vmatpush1.bf16.msra.mxu0 %v9656_v34  ;;  %v9697_v20 = vld [vmem:[%s13272_s5 + $0x224] ss:$24 sps:$4 sm:$0xff]   ;;  %v9695_v29 = vld [vmem:[%s13272_s5 + $0x220] ss:$24 sps:$4 sm:$0xff]   ;;  %v9700_v34 = vld [vmem:[%s13272_s5 + $0x254] ss:$24 sps:$4 sm:$0xff]  }
 0x33c   :  { %5887 = vmatpush1.bf16.msra.mxu1 %v9659_v35  ;;  %5969 = vmatprep.subr.bf16.mxu0 %v9664_v36  ;;  %v9698_v35 = vld [vmem:[%s13272_s5 + $0x250] ss:$24 sps:$4 sm:$0xff]   ;;  %v9703_v36 = vld [vmem:[%s13272_s5 + $0x284] ss:$24 sps:$4 sm:$0xff]  }
 0x33e   :  { %5663 = vmatmul.mubr.bf16.vlgmr.msra.gmra.mrb[64].mxu0 %v11960_v12 }
 0x33f   :  { %5889 = vmatmul.mubr.bf16.vlgmr.msra.gmra.mrb[64].mxu1 %v11960_v12  ;;  %5970 = vmatpush1.bf16.msra.mxu0 %v9662_v46  ;;  %v9701_v46 = vld [vmem:[%s13272_s5 + $0x280] ss:$24 sps:$4 sm:$0xff]  }
 0x340   :  { %5672 = vmatprep.mubr.bf16.mxu0 %v12014_v58  ;;  %5898 = vmatprep.mubr.bf16.mxu1 %v12014_v58 }
 0x341   :  { %5971 = vmatprep.subr.bf16.mxu0 %v9667_v37  ;;  %v9706_v37 = vld [vmem:[%s13272_s5 + $0x2b4] ss:$24 sps:$4 sm:$0xff]  }
 0x343   :  { %5972 = vmatpush1.bf16.msra.mxu0 %v9665_v39  ;;  %v9704_v39 = vld [vmem:[%s13272_s5 + $0x2b0] ss:$24 sps:$4 sm:$0xff]  }
 0x344   :  { %5973 = vmatprep.subr.bf16.mxu0 %v9670_v41  ;;  %v9709_v41 = vld [vmem:[%s13272_s5 + $0x2e4] ss:$24 sps:$4 sm:$0xff]  }
 0x346   :  { %5673 = vmatmul.mubr.bf16.gmra.mrb[68].mxu0 %v12004_v31 }
 0x347   :  { %5899 = vmatmul.mubr.bf16.gmra.mrb[68].mxu1 %v12004_v31  ;;  %5974 = vmatpush1.bf16.msra.mxu0 %v9668_v9  ;;  %v9707_v9 = vld [vmem:[%s13272_s5 + $0x2e0] ss:$24 sps:$4 sm:$0xff]  }
 0x348   :  { %5682 = vmatprep.mubr.bf16.mxu0 %v12058_v17  ;;  %5908 = vmatprep.mubr.bf16.mxu1 %v12058_v17 }
 0x349   :  { %5975 = vmatprep.subr.bf16.mxu0 %v9673_v10  ;;  %v9712_v10 = vld [vmem:[%s13272_s5 + $0x314] ss:$24 sps:$4 sm:$0xff]  }
 0x34b   :  { %5976 = vmatpush1.bf16.msra.mxu0 %v9671_v42  ;;  %v9710_v42 = vld [vmem:[%s13272_s5 + $0x310] ss:$24 sps:$4 sm:$0xff]  }
 0x34c   :  { %5977 = vmatprep.subr.bf16.mxu0 %v9676_v38  ;;  %v9715_v38 = vld [vmem:[%s13272_s5 + $0x344] ss:$24 sps:$4 sm:$0xff]  }
 0x34e   :  { %5683 = vmatmul.mubr.bf16.gmra.mrb[72].mxu0 %v12048_v52 }
 0x34f   :  { %5909 = vmatmul.mubr.bf16.gmra.mrb[72].mxu1 %v12048_v52  ;;  %5978 = vmatpush1.bf16.msra.mxu0 %v9674_v44  ;;  %v9713_v44 = vld [vmem:[%s13272_s5 + $0x340] ss:$24 sps:$4 sm:$0xff]  }
 0x350   :  { %5692 = vmatprep.mubr.bf16.mxu0 %v12102_v63  ;;  %5918 = vmatprep.mubr.bf16.mxu1 %v12102_v63 }
 0x351   :  { %5979 = vmatprep.subr.bf16.mxu0 %v9679_v32  ;;  %v9718_v32 = vld [vmem:[%s13272_s5 + $0x374] ss:$24 sps:$4 sm:$0xff]  }
 0x353   :  { %5980 = vmatpush1.bf16.msra.mxu0 %v9677_v43  ;;  %v9716_v43 = vld [vmem:[%s13272_s5 + $0x370] ss:$24 sps:$4 sm:$0xff]  }
 0x354   :  { %5981 = vmatprep.subr.bf16.mxu0 %v9682_v22  ;;  %v9721_v22 = vld [vmem:[%s13272_s5 + $0x3a4] ss:$24 sps:$4 sm:$0xff]  }
 0x356   :  { %5693 = vmatmul.mubr.bf16.gmra.mrb[76].mxu0 %v12092_v6 }
 0x357   :  { %5919 = vmatmul.mubr.bf16.gmra.mrb[76].mxu1 %v12092_v6  ;;  %5982 = vmatpush1.bf16.msra.mxu0 %v9680_v23  ;;  %v9719_v23 = vld [vmem:[%s13272_s5 + $0x3a0] ss:$24 sps:$4 sm:$0xff]  }
 0x358   :  { %5702 = vmatprep.mubr.bf16.mxu0 %v12146_v59  ;;  %5928 = vmatprep.mubr.bf16.mxu1 %v12146_v59 }
 0x359   :  { %5983 = vmatprep.subr.bf16.mxu0 %v9685_v48  ;;  %v9724_v48 = vld [vmem:[%s13272_s5 + $0x3d4] ss:$24 sps:$4 sm:$0xff]  }
 0x35b   :  { %5984 = vmatpush1.bf16.msra.mxu0 %v9683_v55  ;;  %v9722_v55 = vld [vmem:[%s13272_s5 + $0x3d0] ss:$24 sps:$4 sm:$0xff]  }
 0x35c   :  { %5985 = vmatprep.subr.bf16.mxu0 %v9688_v61  ;;  %v9727_v61 = vld [vmem:[%s13272_s5 + $0x404] ss:$24 sps:$4 sm:$0xff]  }
 0x35e   :  { %5703 = vmatmul.mubr.bf16.gmra.mrb[80].mxu0 %v12136_v50 }
 0x35f   :  { %5929 = vmatmul.mubr.bf16.gmra.mrb[80].mxu1 %v12136_v50  ;;  %5986 = vmatpush1.bf16.msra.mxu0 %v9686_v40  ;;  %v9725_v40 = vld [vmem:[%s13272_s5 + $0x400] ss:$24 sps:$4 sm:$0xff]  }
 0x360   :  { %5712 = vmatprep.mubr.bf16.mxu0 %v12190_v62  ;;  %5938 = vmatprep.mubr.bf16.mxu1 %v12190_v62 }
 0x361   :  { %5987 = vmatprep.subr.bf16.mxu0 %v9691_v14  ;;  %v9730_v14 = vld [vmem:[%s13272_s5 + $0x434] ss:$24 sps:$4 sm:$0xff]  }
 0x363   :  { %5988 = vmatpush1.bf16.msra.mxu0 %v9689_v19  ;;  %v9728_v19 = vld [vmem:[%s13272_s5 + $0x430] ss:$24 sps:$4 sm:$0xff]  }
 0x364   :  { %5989 = vmatprep.subr.bf16.mxu0 %v9694_v26  ;;  %v9733_v26 = vld [vmem:[%s13272_s5 + $0x464] ss:$24 sps:$4 sm:$0xff]  }
 0x366   :  { %5713 = vmatmul.mubr.bf16.gmra.mrb[84].mxu0 %v12180_v21 }
 0x367   :  { %5939 = vmatmul.mubr.bf16.gmra.mrb[84].mxu1 %v12180_v21  ;;  %5990 = vmatpush1.bf16.msra.mxu0 %v9692_v28  ;;  %v9731_v28 = vld [vmem:[%s13272_s5 + $0x460] ss:$24 sps:$4 sm:$0xff]  }
 0x368   :  { %5722 = vmatprep.mubr.bf16.mxu0 %v12234_v16  ;;  %5948 = vmatprep.mubr.bf16.mxu1 %v12234_v16 }
 0x369   :  { %5991 = vmatprep.subr.bf16.mxu0 %v9697_v20  ;;  %v9736_v20 = vld [vmem:[%s13272_s5 + $0x494] ss:$24 sps:$4 sm:$0xff]  }
 0x36b   :  { %5992 = vmatpush1.bf16.msra.mxu0 %v9695_v29  ;;  %v9734_v29 = vld [vmem:[%s13272_s5 + $0x490] ss:$24 sps:$4 sm:$0xff]  }
 0x36c   :  { %5993 = vmatprep.subr.bf16.mxu0 %v9700_v34  ;;  %v9739_v34 = vld [vmem:[%s13272_s5 + $0x4c4] ss:$24 sps:$4 sm:$0xff]  }
 0x36e   :  { %5723 = vmatmul.mubr.bf16.gmra.mrb[88].mxu0 %v12224_v0 }
 0x36f   :  { %5949 = vmatmul.mubr.bf16.gmra.mrb[88].mxu1 %v12224_v0  ;;  %5994 = vmatpush1.bf16.msra.mxu0 %v9698_v35  ;;  %v9737_v35 = vld [vmem:[%s13272_s5 + $0x4c0] ss:$24 sps:$4 sm:$0xff]  }
 0x370   :  { %5732 = vmatprep.mubr.bf16.mxu0 %v12275_v27  ;;  %5958 = vmatprep.mubr.bf16.mxu1 %v12275_v27 }
 0x371   :  { %5995 = vmatprep.subr.bf16.mxu0 %v9703_v36  ;;  %v9742_v36 = vld [vmem:[%s13272_s5 + $0x4f4] ss:$24 sps:$4 sm:$0xff]  }
 0x373   :  { %5996 = vmatpush1.bf16.msra.mxu0 %v9701_v46  ;;  %v9740_v46 = vld [vmem:[%s13272_s5 + $0x4f0] ss:$24 sps:$4 sm:$0xff]  }
 0x374   :  { %5997 = vmatprep.subr.bf16.mxu0 %v9706_v37  ;;  %v9745_v37 = vld [vmem:[%s13272_s5 + $0x524] ss:$24 sps:$4 sm:$0xff]  }
 0x376   :  { %5733 = vmatmul.mubr.bf16.gmra.mrb[92].mxu0 %v12268_v25 }
 0x377   :  { %5959 = vmatmul.mubr.bf16.gmra.mrb[92].mxu1 %v12268_v25  ;;  %5998 = vmatpush1.bf16.msra.mxu0 %v9704_v39  ;;  %v9743_v39 = vld [vmem:[%s13272_s5 + $0x520] ss:$24 sps:$4 sm:$0xff]  }
 0x378   :  { %6001 = vmatprep.mubr.bf16.mxu0 %v11962_v47  ;;  %5999 = vmatprep.subr.bf16.mxu0 %v9709_v41  ;;  %v9748_v41 = vld [vmem:[%s13272_s5 + $0x554] ss:$24 sps:$4 sm:$0xff]  }
 0x37b   :  { %6000 = vmatpush1.bf16.msra.mxu0 %v9707_v9  ;;  %v9746_v9 = vld [vmem:[%s13272_s5 + $0x550] ss:$24 sps:$4 sm:$0xff]  }
 0x37c   :  { %6082 = vmatprep.subr.bf16.mxu0 %v9712_v10  ;;  %v9751_v10 = vld [vmem:[%s13272_s5 + $0x584] ss:$24 sps:$4 sm:$0xff]  }
 0x37e   :  { %6002 = vmatmul.mubr.bf16.vlgmr.msra.gmra.mrb[96].mxu0 %v11958_v45 }
 0x37f   :  { %6083 = vmatpush1.bf16.msra.mxu0 %v9710_v42  ;;  %6011 = vmatprep.mubr.bf16.mxu0 %v12006_v33  ;;  %v9749_v42 = vld [vmem:[%s13272_s5 + $0x580] ss:$24 sps:$4 sm:$0xff]  }
 0x380   :  { %6084 = vmatprep.subr.bf16.mxu0 %v9715_v38  ;;  %v9754_v38 = vld [vmem:[%s13272_s5 + $0x5b4] ss:$24 sps:$4 sm:$0xff]  }
 0x383   :  { %6085 = vmatpush1.bf16.msra.mxu0 %v9713_v44  ;;  %v9752_v44 = vld [vmem:[%s13272_s5 + $0x5b0] ss:$24 sps:$4 sm:$0xff]  }
 0x384   :  { %6086 = vmatprep.subr.bf16.mxu0 %v9718_v32  ;;  %v9757_v32 = vld [vmem:[%s13272_s5 + $0x5e4] ss:$24 sps:$4 sm:$0xff]  }
 0x386   :  { %6012 = vmatmul.mubr.bf16.gmra.mrb[100].mxu0 %v12002_v60 }
 0x387   :  { %6087 = vmatpush1.bf16.msra.mxu0 %v9716_v43  ;;  %6021 = vmatprep.mubr.bf16.mxu0 %v12050_v13  ;;  %v9755_v43 = vld [vmem:[%s13272_s5 + $0x5e0] ss:$24 sps:$4 sm:$0xff]  }
 0x388   :  { %6088 = vmatprep.subr.bf16.mxu0 %v9721_v22 }
 0x38b   :  { %6089 = vmatpush1.bf16.msra.mxu0 %v9719_v23 }
 0x38c   :  { %6090 = vmatprep.subr.bf16.mxu0 %v9724_v48 }
 0x38e   :  { %6022 = vmatmul.mubr.bf16.gmra.mrb[104].mxu0 %v12046_v1 }
 0x38f   :  { %6091 = vmatpush1.bf16.msra.mxu0 %v9722_v55  ;;  %6031 = vmatprep.mubr.bf16.mxu0 %v12094_v57 }
 0x390   :  { %6092 = vmatprep.subr.bf16.mxu0 %v9727_v61 }
 0x393   :  { %6093 = vmatpush1.bf16.msra.mxu0 %v9725_v40 }
 0x394   :  { %6094 = vmatprep.subr.bf16.mxu0 %v9730_v14 }
 0x396   :  { %6032 = vmatmul.mubr.bf16.gmra.mrb[108].mxu0 %v12090_v56 }
 0x397   :  { %6095 = vmatpush1.bf16.msra.mxu0 %v9728_v19  ;;  %6041 = vmatprep.mubr.bf16.mxu0 %v12138_v51 }
 0x398   :  { %6096 = vmatprep.subr.bf16.mxu0 %v9733_v26 }
 0x39b   :  { %6097 = vmatpush1.bf16.msra.mxu0 %v9731_v28 }
 0x39c   :  { %6098 = vmatprep.subr.bf16.mxu0 %v9736_v20 }
 0x39e   :  { %6042 = vmatmul.mubr.bf16.gmra.mrb[112].mxu0 %v12134_v30 }
 0x39f   :  { %6099 = vmatpush1.bf16.msra.mxu0 %v9734_v29  ;;  %6051 = vmatprep.mubr.bf16.mxu0 %v12182_v53 }
 0x3a0   :  { %6100 = vmatprep.subr.bf16.mxu0 %v9739_v34 }
 0x3a3   :  { %6101 = vmatpush1.bf16.msra.mxu0 %v9737_v35 }
 0x3a4   :  { %6102 = vmatprep.subr.bf16.mxu0 %v9742_v36  ;;  %v9761_v36 = vld [vmem:[%s13274_s7 + $0x8] sm:$0xff]  }
 0x3a6   :  { %6052 = vmatmul.mubr.bf16.gmra.mrb[116].mxu0 %v12178_v11 }
 0x3a7   :  { %6103 = vmatpush1.bf16.msra.mxu0 %v9740_v46  ;;  %6061 = vmatprep.mubr.bf16.mxu0 %v12226_v54 }
 0x3a8   :  { %6104 = vmatprep.subr.bf16.mxu0 %v9745_v37 }
 0x3ab   :  { %6105 = vmatpush1.bf16.msra.mxu0 %v9743_v39 }
 0x3ac   :  { %6106 = vmatprep.subr.bf16.mxu0 %v9748_v41 }
 0x3ae   :  { %6062 = vmatmul.mubr.bf16.gmra.mrb[120].mxu0 %v12222_v18 }
 0x3af   :  { %6107 = vmatpush1.bf16.msra.mxu0 %v9746_v9  ;;  %6071 = vmatprep.mubr.bf16.mxu0 %v12270_v24 }
 0x3b0   :  { %6108 = vmatprep.subr.bf16.mxu0 %v9751_v10 }
 0x3b3   :  { %6109 = vmatpush1.bf16.msra.mxu0 %v9749_v42 }
 0x3b4   :  { %6110 = vmatprep.subr.bf16.mxu0 %v9754_v38  ;;  %v9762_v38 = vld [vmem:[%s13274_s7 + $0x50] sm:$0xff]  }
 0x3b6   :  { %6072 = vmatmul.mubr.bf16.gmra.mrb[124].mxu0 %v12266_v15 }
 0x3b7   :  { %6111 = vmatpush1.bf16.msra.mxu0 %v9752_v44  ;;  %6114 = vmatprep.mubr.bf16.mxu0 %v11970_v49 }
 0x3b8   :  { %6112 = vmatprep.subr.bf16.mxu0 %v9757_v32 }
 0x3bb   :  { %6113 = vmatpush1.bf16.msra.mxu0 %v9755_v43 }
 0x3bc   :  { %7021 = vmatprep.subr.bf16.mxu0 %v11970_v49  ;;  %v9759_v49 = vld [vmem:[%s13274_s7] sm:$0xff]  }
 0x3bd   :  { %6801 = vxpose.xlu1.c.b16.start [1/8] (narrow) %v9759_v49, 16 }
 0x3be   :  { %6115 = vmatmul.mubr.bf16.vlgmr.msra.gmra.mrb[96].mxu0 %v11960_v12 }
 0x3bf   :  { %7022 = vmatpush1.bf16.msra.mxu0 %v11960_v12  ;;  %6124 = vmatprep.mubr.bf16.mxu0 %v12014_v58  ;;  %v9758_v12 = vld [vmem:[%s13274_s7 + $0x40] sm:$0xff]  }
 0x3c0   :  { %7023 = vmatprep.subr.bf16.mxu0 %v12014_v58  ;;  %6817 = vxpose.xlu0.c.b16.start [1/8] (narrow) %v9758_v12, 16  ;;  %v12580_v58 = vld [vmem:[%s13273_s6] sm:$0x3f]  ;;  %v9763_v12 = vld [vmem:[%s13274_s7 + $0x10] sm:$0xff]  }
 0x3c1   :  { %v12602_v40 = vrot.slane %v12580_v58, %v11397_v4  ;;  %6802 = vxpose.xlu1.c.b16.cont [2/8] (narrow) %v9761_v36, 16 }
 0x3c3   :  { %7024 = vmatpush1.bf16.msra.mxu0 %v12004_v31 }
 0x3c4   :  { %7025 = vmatprep.subr.bf16.mxu0 %v12058_v17 }
 0x3c5   :  { %6803 = vxpose.xlu1.c.b16.cont [3/8] (narrow) %v9763_v12, 16  ;;  %v9768_v12 = vld [vmem:[%s13274_s7 + $0x68] sm:$0xff]  }
 0x3c6   :  { %6125 = vmatmul.mubr.bf16.gmra.mrb[100].mxu0 %v12004_v31  ;;  %v9760_v31 = vld [vmem:[%s13274_s7 + $0x48] sm:$0xff]  }
 0x3c7   :  { %7026 = vmatpush1.bf16.msra.mxu0 %v12048_v52  ;;  %6134 = vmatprep.mubr.bf16.mxu0 %v12058_v17 }
 0x3c8   :  { %7027 = vmatprep.subr.bf16.mxu0 %v12102_v63  ;;  %6818 = vxpose.xlu0.c.b16.cont [2/8] (narrow) %v9760_v31, 16 }
 0x3cb   :  { %7028 = vmatpush1.bf16.msra.mxu0 %v12092_v6 }
 0x3cc   :  { %7029 = vmatprep.subr.bf16.mxu0 %v12146_v59  ;;  %6819 = vxpose.xlu0.c.b16.cont [3/8] (narrow) %v9762_v38, 16 }
 0x3ce   :  { %6135 = vmatmul.mubr.bf16.gmra.mrb[104].mxu0 %v12048_v52  ;;  %v12584_v52 = vrot.slane %v12580_v58, %v11409_v8 }
 0x3cf   :  { %7030 = vmatpush1.bf16.msra.mxu0 %v12136_v50  ;;  %6144 = vmatprep.mubr.bf16.mxu0 %v12102_v63 }
 0x3d0   :  { %7031 = vmatprep.subr.bf16.mxu0 %v12190_v62 }
 0x3d3   :  { %7032 = vmatpush1.bf16.msra.mxu0 %v12180_v21 }
 0x3d4   :  { %7033 = vmatprep.subr.bf16.mxu0 %v12234_v16 }
 0x3d6   :  { %6145 = vmatmul.mubr.bf16.gmra.mrb[108].mxu0 %v12092_v6 }
 0x3d7   :  { %7034 = vmatpush1.bf16.msra.mxu0 %v12224_v0  ;;  %6154 = vmatprep.mubr.bf16.mxu0 %v12146_v59 }
 0x3d8   :  { %7035 = vmatprep.subr.bf16.mxu0 %v12275_v27 }
 0x3db   :  { %7036 = vmatpush1.bf16.msra.mxu0 %v12268_v25 }
 0x3de   :  { %6155 = vmatmul.mubr.bf16.gmra.mrb[112].mxu0 %v12136_v50 }
 0x3df   :  { %6164 = vmatprep.mubr.bf16.mxu0 %v12190_v62 }
 0x3e6   :  { %6165 = vmatmul.mubr.bf16.gmra.mrb[116].mxu0 %v12180_v21 }
 0x3e7   :  { %6174 = vmatprep.mubr.bf16.mxu0 %v12234_v16 }
 0x3ee   :  { %6175 = vmatmul.mubr.bf16.gmra.mrb[120].mxu0 %v12224_v0 }
 0x3ef   :  { %6184 = vmatprep.mubr.bf16.mxu0 %v12275_v27 }
 0x3f6   :  { %6185 = vmatmul.mubr.bf16.gmra.mrb[124].mxu0 %v12268_v25 }
 0x411   :  { %v5664_v17 = vpop.f32.mrb[64].mxu0 }
 0x412   :  { %v12586_v6 = vpop.f32.mrb[64].mxu1  ;;  %v12588_v63 = vpop.f32.mrb[65].mxu0  ;;  %v8432_v34 = vadd.f32 %v5664_v17, %v12602_v40 }
 0x413   :  { %v5892_v50 = vpop.f32.mrb[65].mxu1  ;;  %v5668_v59 = vpop.f32.mrb[66].mxu0 }
 0x414   :  { %v8465_v21 = vadd.f32 %v5892_v50, %v12584_v52  ;;  %v12591_v62 = vpop.f32.mrb[66].mxu1  ;;  %v12593_v0 = vpop.f32.mrb[67].mxu0  ;;  %v8434_v9 = vadd.f32 %v5668_v59, %v12602_v40 }
 0x415   :  { %v5896_v16 = vpop.f32.mrb[67].mxu1 }
 0x416   :  { %v8126_v25 = vmul.f32 -1.442695, %v8465_v21  ;;  %v8467_v27 = vadd.f32 %v5896_v16, %v12584_v52  ;;  %v9764_v21 = vld [vmem:[%s13274_s7 + $0x58] sm:$0xff]  }
 0x417   :  { %6820 = vxpose.xlu0.c.b16.cont [4/8] (narrow) %v9764_v21, 16 }
 0x418   :  { %9816 = vpow2.f32 %v8126_v25  ;;  %v8129_v8 = vmul.f32 -1.442695, %v8467_v27  ;;  %v9765_v25 = vld [vmem:[%s13274_s7 + $0x18] sm:$0xff]  }
 0x419   :  { %v5674_v22 = vpop.f32.mrb[68].mxu0  ;;  %6804 = vxpose.xlu1.c.b16.cont [4/8] (narrow) %v9765_v25, 16 }
 0x41a   :  { %v12596_v23 = vpop.f32.mrb[68].mxu1  ;;  %v12598_v48 = vpop.f32.mrb[69].mxu0  ;;  %9818 = vpow2.f32 %v8129_v8  ;;  %v8436_v16 = vadd.f32 %v5674_v22, %v12602_v40 }
 0x41b   :  { %v5902_v55 = vpop.f32.mrb[69].mxu1  ;;  %v5678_v61 = vpop.f32.mrb[70].mxu0 }
 0x41c   :  { %v8469_v14 = vadd.f32 %v5902_v55, %v12584_v52  ;;  %v12605_v19 = vpop.f32.mrb[70].mxu1  ;;  %v12607_v26 = vpop.f32.mrb[71].mxu0 }
 0x41d   :  { %v5906_v28 = vpop.f32.mrb[71].mxu1 }
 0x41e   :  { %v8132_v20 = vmul.f32 -1.442695, %v8469_v14  ;;  %v8471_v29 = vadd.f32 %v5906_v28, %v12584_v52 }
 0x420   :  { %9820 = vpow2.f32 %v8132_v20  ;;  %v8135_v35 = vmul.f32 -1.442695, %v8471_v29  ;;  %v8438_v29 = vadd.f32 %v5678_v61, %v12602_v40 }
 0x421   :  { %v12614_v4 = vpop.f32.mrb[72].mxu0 }
 0x422   :  { %v9817_v46 = vpop.eup %9816  ;;  %v12616_v37 = vpop.f32.mrb[72].mxu1  ;;  %9822 = vpow2.f32 %v8135_v35  ;;  %v9766_v35 = vld [vmem:[%s13274_s7 + $0x60] sm:$0xff]  }
 0x423   :  { %v12618_v39 = vpop.f32.mrb[73].mxu0  ;;  %v6387_v41 = vadd.f32 1.0, %v9817_v46  ;;  %v5912_v10 = vpop.f32.mrb[73].mxu1  ;;  %9824 = vtanh.f32 %v8432_v34  ;;  %6821 = vxpose.xlu0.c.b16.cont [5/8] (narrow) %v9766_v35, 16 }
 0x424   :  { %v12621_v42 = vpop.f32.mrb[74].mxu0  ;;  %v8473_v44 = vadd.f32 %v5912_v10, %v12584_v52  ;;  %v12627_v32 = vpop.f32.mrb[74].mxu1 }
 0x425   :  { %v12629_v43 = vpop.f32.mrb[75].mxu0  ;;  %v9819_v49 = vpop.eup %9818  ;;  %9826 = vrcp.f32 %v6387_v41 }
 0x426   :  { %v5916_v31 = vpop.f32.mrb[75].mxu1  ;;  %v6390_v17 = vadd.f32 1.0, %v9819_v49  ;;  %v8138_v50 = vmul.f32 -1.442695, %v8473_v44  ;;  %9828 = vtanh.f32 %v8434_v9  ;;  %v9767_v9 = vld [vmem:[%s13274_s7 + $0x20] sm:$0xff]  }
 0x427   :  { %v8475_v59 = vadd.f32 %v5916_v31, %v12584_v52  ;;  %6805 = vxpose.xlu1.c.b16.cont [5/8] (narrow) %v9767_v9, 16  ;;  %6822 = vxpose.xlu0.c.b16.cont [6/8] (narrow) %v9768_v12, 16 }
 0x428   :  { %9830 = vrcp.f32 %v6390_v17 }
 0x429   :  { %9832 = vpow2.f32 %v8138_v50  ;;  %v12642_v27 = vpop.f32.mrb[76].mxu0  ;;  %v8141_v55 = vmul.f32 -1.442695, %v8475_v59  ;;  %v9769_v50 = vld [vmem:[%s13274_s7 + $0x28] sm:$0xff]  }
 0x42a   :  { %v9821_v8 = vpop.eup %9820  ;;  %v12644_v14 = vpop.f32.mrb[76].mxu1  ;;  %9834 = vtanh.f32 %v8436_v16  ;;  %v8440_v16 = vadd.f32 %v12614_v4, %v12602_v40 }
 0x42b   :  { %v12646_v28 = vpop.f32.mrb[77].mxu0  ;;  %v6393_v20 = vadd.f32 1.0, %v9821_v8  ;;  %v5922_v34 = vpop.f32.mrb[77].mxu1  ;;  %6806 = vxpose.xlu1.c.b16.cont [6/8] (narrow) %v9769_v50, 16 }
 0x42c   :  { %v12649_v22 = vpop.f32.mrb[78].mxu0  ;;  %v8477_v36 = vadd.f32 %v5922_v34, %v12584_v52  ;;  %v12655_v46 = vpop.f32.mrb[78].mxu1 }
 0x42d   :  { %v12657_v41 = vpop.f32.mrb[79].mxu0  ;;  %v9823_v10 = vpop.eup %9822  ;;  %9836 = vrcp.f32 %v6393_v20 }
 0x42e   :  { %v5926_v61 = vpop.f32.mrb[79].mxu1  ;;  %v9825_v38 = vpop.eup %9824  ;;  %v6396_v44 = vadd.f32 1.0, %v9823_v10  ;;  %9838 = vpow2.f32 %v8141_v55  ;;  %v8144_v31 = vmul.f32 -1.442695, %v8477_v36  ;;  %v9770_v36 = vld [vmem:[%s13274_s7 + $0x70] sm:$0xff]  }
 0x42f   :  { %v9827_v49 = vpop.eup %9826  ;;  %9840 = vtanh.f32 %v8438_v29  ;;  %v8479_v17 = vadd.f32 %v5926_v61, %v12584_v52  ;;  %6823 = vxpose.xlu0.c.b16.cont [7/8] (narrow) %v9770_v36, 16 }
 0x430   :  { %9842 = vrcp.f32 %v6396_v44  ;;  %v12669_v59 = vmul.f32 %v9827_v49, %v9825_v38  ;;  %v9829_v21 = vpop.eup %9828  ;;  %v9771_v44 = vld [vmem:[%s13274_s7 + $0x30] sm:$0xff]  }
 0x431   :  { %v12673_v25 = vpop.f32.mrb[80].mxu0  ;;  %9844 = vpow2.f32 %v8144_v31  ;;  %v8147_v10 = vmul.f32 -1.442695, %v8479_v17  ;;  %v8442_v17 = vadd.f32 %v12621_v42, %v12602_v40  ;;  %6807 = vxpose.xlu1.c.b16.cont [7/8] (narrow) %v9771_v44, 16 }
 0x432   :  { %v9831_v8 = vpop.eup %9830  ;;  %v12675_v55 = vpop.f32.mrb[80].mxu1  ;;  %9846 = vtanh.f32 %v8440_v16  ;;  %v9773_v16 = vld [vmem:[%s13274_s7 + $0x38] sm:$0xff]  }
 0x433   :  { %v12677_v20 = vpop.f32.mrb[81].mxu0  ;;  %v9833_v29 = vpop.eup %9832  ;;  %v12684_v9 = vmul.f32 %v9831_v8, %v9829_v21  ;;  %v9772_v8 = vld [vmem:[%s13274_s7 + $0x78] sm:$0xff]  }
 0x434   :  { %v5932_v34 = vpop.f32.mrb[81].mxu1  ;;  %v12679_v35 = vpop.f32.mrb[82].mxu0  ;;  %v6399_v4 = vadd.f32 1.0, %v9833_v29  ;;  %6824 = vxpose.xlu0.c.b16.end [8/8] (narrow) %v9772_v8, 16 }
 0x435   :  { %v12686_v61 = vpop.f32.mrb[82].mxu1  ;;  %v12688_v38 = vpop.f32.mrb[83].mxu0  ;;  %v8481_v12 = vadd.f32 %v5932_v34, %v12584_v52  ;;  %6808 = vxpose.xlu1.c.b16.end [8/8] (narrow) %v9773_v16, 16 }
 0x436   :  { %v5936_v49 = vpop.f32.mrb[83].mxu1  ;;  %v9835_v50 = vpop.eup %9834  ;;  %9848 = vrcp.f32 %v6399_v4 }
 0x437   :  { %v9837_v21 = vpop.eup %9836  ;;  %9850 = vpow2.f32 %v8147_v10  ;;  %v8150_v4 = vmul.f32 -1.442695, %v8481_v12  ;;  %v8483_v44 = vadd.f32 %v5936_v49, %v12584_v52  ;;  %v8444_v10 = vadd.f32 %v12642_v27, %v12602_v40 }
 0x438   :  { %v9839_v29 = vpop.eup %9838  ;;  %v12704_v34 = vmul.f32 %v9837_v21, %v9835_v50  ;;  %9852 = vtanh.f32 %v8442_v17 }
 0x439   :  { %v9841_v36 = vpop.eup %9840  ;;  %v6402_v2 = vadd.f32 1.0, %v9839_v29  ;;  %v12706_v31 = vpop.f32.mrb[84].mxu0 }
 0x43a   :  { %v9843_v42 = vpop.eup %9842  ;;  %v12709_v15 = vpop.f32.mrb[84].mxu1 }
 0x43b   :  { %v12711_v24 = vpop.f32.mrb[85].mxu0  ;;  %9854 = vrcp.f32 %v6402_v2  ;;  %v5942_v50 = vpop.f32.mrb[85].mxu1  ;;  %v12717_v12 = vmul.f32 %v9843_v42, %v9841_v36  ;;  %v8153_v2 = vmul.f32 -1.442695, %v8483_v44  ;;  %v8446_v36 = vadd.f32 %v12649_v22, %v12602_v40 }
 0x43c   :  { %v12715_v21 = vpop.f32.mrb[86].mxu0  ;;  %v12719_v29 = vpop.f32.mrb[86].mxu1  ;;  %9856 = vpow2.f32 %v8150_v4  ;;  %v8485_v27 = vadd.f32 %v5942_v50, %v12584_v52 }
 0x43d   :  { %v12721_v8 = vpop.f32.mrb[87].mxu0  ;;  %v9845_v17 = vpop.eup %9844  ;;  %9858 = vtanh.f32 %v8444_v10 }
 0x43e   :  { %v5946_v49 = vpop.f32.mrb[87].mxu1  ;;  %v6405_v16 = vadd.f32 1.0, %v9845_v17  ;;  %v9847_v54 = vpop.eup %9846  ;;  %v8156_v17 = vmul.f32 -1.442695, %v8485_v27 }
 0x440   :  { %v9849_v11 = vpop.eup %9848  ;;  %9860 = vrcp.f32 %v6405_v16  ;;  %v8487_v16 = vadd.f32 %v5946_v49, %v12584_v52 }
 0x441   :  { %v12728_v42 = vpop.f32.mrb[88].mxu0  ;;  %v12730_v53 = vmul.f32 %v9849_v11, %v9847_v54  ;;  %v9851_v4 = vpop.eup %9850  ;;  %9862 = vpow2.f32 %v8153_v2  ;;  %v8448_v54 = vadd.f32 %v12673_v25, %v12602_v40  ;;  %v8450_v25 = vadd.f32 %v12679_v35, %v12602_v40 }
 0x442   :  { %v12732_v30 = vpop.f32.mrb[88].mxu1  ;;  %v12734_v18 = vpop.f32.mrb[89].mxu0  ;;  %v6408_v44 = vadd.f32 1.0, %v9851_v4  ;;  %9864 = vtanh.f32 %v8446_v36  ;;  %v8159_v1 = vmul.f32 -1.442695, %v8487_v16 }
 0x443   :  { %v5952_v10 = vpop.f32.mrb[89].mxu1  ;;  %v12736_v51 = vpop.f32.mrb[90].mxu0 }
 0x444   :  { %v9853_v50 = vpop.eup %9852  ;;  %v12739_v22 = vpop.f32.mrb[90].mxu1  ;;  %9866 = vrcp.f32 %v6408_v44  ;;  %v8489_v13 = vadd.f32 %v5952_v10, %v12584_v52 }
 0x445   :  { %v12741_v56 = vpop.f32.mrb[91].mxu0  ;;  %v9855_v11 = vpop.eup %9854  ;;  %9868 = vpow2.f32 %v8156_v17 }
 0x446   :  { %v5956_v2 = vpop.f32.mrb[91].mxu1  ;;  %v12745_v57 = vmul.f32 %v9855_v11, %v9853_v50  ;;  %v9857_v27 = vpop.eup %9856  ;;  %9870 = vtanh.f32 %v8448_v54 }
 0x447   :  { %v6411_v4 = vadd.f32 1.0, %v9857_v27  ;;  %v9859_v49 = vpop.eup %9858  ;;  %v8491_v35 = vadd.f32 %v5956_v2, %v12584_v52 }
 0x449   :  { %v12750_v60 = vpop.f32.mrb[92].mxu0  ;;  %9872 = vrcp.f32 %v6411_v4  ;;  %v8162_v4 = vmul.f32 -1.442695, %v8489_v13 }
 0x44a   :  { %v9861_v44 = vpop.eup %9860  ;;  %v12754_v50 = vpop.f32.mrb[92].mxu1  ;;  %9874 = vpow2.f32 %v8159_v1 }
 0x44b   :  { %13320 = vst [vmem:[#allocation28_spill] sm:$0xff] %v12754_v50  ;;  %v12756_v11 = vpop.f32.mrb[93].mxu0  ;;  %v5962_v17 = vpop.f32.mrb[93].mxu1  ;;  %v12760_v27 = vmul.f32 %v9861_v44, %v9859_v49  ;;  %9876 = vtanh.f32 %v8450_v25 }
 0x44c   :  { %13321 = vst [vmem:[#allocation29_spill] sm:$0xff] %v12756_v11  ;;  %v12758_v16 = vpop.f32.mrb[94].mxu0  ;;  %v9863_v36 = vpop.eup %9862  ;;  %v8452_v11 = vadd.f32 %v12706_v31, %v12602_v40  ;;  %v8493_v25 = vadd.f32 %v5962_v17, %v12584_v52 }
 0x44d   :  { %v12762_v54 = vpop.f32.mrb[94].mxu1  ;;  %v12764_v10 = vpop.f32.mrb[95].mxu0  ;;  %v6414_v33 = vadd.f32 1.0, %v9863_v36 }
 0x44e   :  { %13322 = vst [vmem:[#allocation30_spill] sm:$0xff] %v12762_v54  ;;  %13323 = vst [vmem:[#allocation31_spill] sm:$0xff] %v12764_v10  ;;  %v5966_v45 = vpop.f32.mrb[95].mxu1  ;;  %v9865_v47 = vpop.eup %9864  ;;  %v8165_v54 = vmul.f32 -1.442695, %v8491_v35 }
 0x44f   :  { %v9867_v50 = vpop.eup %9866  ;;  %9878 = vrcp.f32 %v6414_v33  ;;  %v8454_v33 = vadd.f32 %v12715_v21, %v12602_v40  ;;  %v8495_v35 = vadd.f32 %v5966_v45, %v12584_v52  ;;  %v9774_v21 = vld [vmem:[%s13274_s7 + $0x80] sm:$0xff]   ;;  %v8458_v52 = vadd.f32 %v12736_v51, %v12602_v40 }
 0x450   :  { %v12769_v49 = vmul.f32 %v9867_v50, %v9865_v47  ;;  %v9869_v44 = vpop.eup %9868  ;;  %9880 = vpow2.f32 %v8162_v4  ;;  %v8168_v50 = vmul.f32 -1.442695, %v8493_v25  ;;  %6833 = vxpose.xlu0.c.b16.start [1/8] (narrow) %v9774_v21, 16  ;;  %v8460_v51 = vadd.f32 %v12750_v60, %v12602_v40  ;;  %v9778_v60 = vld [vmem:[%s13274_s7 + $0xa0] sm:$0xff]  }
 0x451   :  { %v6417_v1 = vadd.f32 1.0, %v9869_v44  ;;  %v9871_v13 = vpop.eup %9870  ;;  %9882 = vtanh.f32 %v8452_v11  ;;  %v8456_v11 = vadd.f32 %v12728_v42, %v12602_v40  ;;  %v9775_v42 = vld [vmem:[%s13274_s7 + $0x88] sm:$0xff]  }
 0x453   :  { %v9873_v10 = vpop.eup %9872  ;;  %9884 = vrcp.f32 %v6417_v1 }
 0x454   :  { %v12776_v2 = vmul.f32 %v9873_v10, %v9871_v13  ;;  %v9875_v47 = vpop.eup %9874  ;;  %9886 = vpow2.f32 %v8165_v54  ;;  %v8171_v10 = vmul.f32 -1.442695, %v8495_v35  ;;  %6834 = vxpose.xlu0.c.b16.cont [2/8] (narrow) %v9775_v42, 16 }
 0x455   :  { %v6420_v31 = vadd.f32 1.0, %v9875_v47  ;;  %v9877_v4 = vpop.eup %9876  ;;  %9888 = vtanh.f32 %v8454_v33 }
 0x457   :  { %9890 = vrcp.f32 %v6420_v31 }
 0x458   :  { %9892 = vpow2.f32 %v8168_v50  ;;  %v9776_v50 = vld [vmem:[%s13274_s7 + $0x90] sm:$0xff]  }
 0x459   :  { %v9879_v44 = vpop.eup %9878  ;;  %9894 = vtanh.f32 %v8456_v11  ;;  %6835 = vxpose.xlu0.c.b16.cont [3/8] (narrow) %v9776_v50, 16 }
 0x45a   :  { %v12781_v17 = vmul.f32 %v9879_v44, %v9877_v4  ;;  %v9881_v1 = vpop.eup %9880 }
 0x45b   :  { %v6423_v54 = vadd.f32 1.0, %v9881_v1  ;;  %v9883_v25 = vpop.eup %9882  ;;  %v9777_v1 = vld [vmem:[%s13274_s7 + $0x98] sm:$0xff]  }
 0x45d   :  { %v9885_v45 = vpop.eup %9884  ;;  %9896 = vrcp.f32 %v6423_v54  ;;  %6836 = vxpose.xlu0.c.b16.cont [4/8] (narrow) %v9777_v1, 16 }
 0x45e   :  { %v12793_v33 = vmul.f32 %v9885_v45, %v9883_v25  ;;  %v9887_v47 = vpop.eup %9886  ;;  %9898 = vpow2.f32 %v8171_v10  ;;  %v8462_v45 = vadd.f32 %v12758_v16, %v12602_v40 }
 0x45f   :  { %v6426_v31 = vadd.f32 1.0, %v9887_v47  ;;  %v9889_v4 = vpop.eup %9888  ;;  %9900 = vtanh.f32 %v8458_v52 }
 0x461   :  { %v9891_v35 = vpop.eup %9890  ;;  %9902 = vrcp.f32 %v6426_v31  ;;  %6837 = vxpose.xlu0.c.b16.cont [5/8] (narrow) %v9778_v60, 16 }
 0x462   :  { %v12800_v44 = vmul.f32 %v9891_v35, %v9889_v4  ;;  %v9893_v11 = vpop.eup %9892  ;;  %9904 = vtanh.f32 %v8460_v51  ;;  %v9779_v4 = vld [vmem:[%s13274_s7 + $0xa8] sm:$0xff]   ;;  %v9780_v51 = vld [vmem:[%s13274_s7 + $0xb0] sm:$0xff]  }
 0x463   :  { %v6429_v21 = vadd.f32 1.0, %v9893_v11  ;;  %v9895_v10 = vpop.eup %9894  ;;  %v13298_v11 = vmov 0.0  }
 0x464   :  { %51 = vst [vmem:[#allocation4] sm:$0x77] %v13298_v11  ;;  %52 = vst [vmem:[#allocation4 + $0x8] sm:$0x77] %v13298_v11 }
 0x465   :  { %9906 = vrcp.f32 %v6429_v21  ;;  %6838 = vxpose.xlu0.c.b16.cont [6/8] (narrow) %v9779_v4, 16 }
 0x466   :  { %9908 = vtanh.f32 %v8462_v45 }
 0x467   :  { %v9897_v25 = vpop.eup %9896 }
 0x468   :  { %v12812_v52 = vmul.f32 %v9897_v25, %v9895_v10  ;;  %v9899_v42 = vpop.eup %9898  ;;  %v9781_v10 = vld [vmem:[%s13274_s7 + $0xb8] sm:$0xff]  }
 0x469   :  { %v6432_v47 = vadd.f32 1.0, %v9899_v42  ;;  %v9901_v31 = vpop.eup %9900  ;;  %6839 = vxpose.xlu0.c.b16.cont [7/8] (narrow) %v9780_v51, 16  ;;  %v12835_v42 = vrot.slane %v12580_v58, %v11400_v5 }
 0x46b   :  { %v9903_v50 = vpop.eup %9902  ;;  %9910 = vrcp.f32 %v6432_v47  ;;  %v8468_v51 = vadd.f32 %v12596_v23, %v12835_v42  ;;  %v8474_v23 = vadd.f32 %v12627_v32, %v12835_v42  ;;  %v8478_v32 = vadd.f32 %v12655_v46, %v12835_v42 }
 0x46c   :  { %v12817_v35 = vmul.f32 %v9903_v50, %v9901_v31  ;;  %v9905_v16 = vpop.eup %9904  ;;  %v12841_v31 = vrot.slane %v12580_v58, %v11406_v7  ;;  %v8464_v50 = vadd.f32 %v12586_v6, %v12835_v42  ;;  %v8470_v6 = vadd.f32 %v12605_v19, %v12835_v42 }
 0x46d   :  { %6840 = vxpose.xlu0.c.b16.end [8/8] (narrow) %v9781_v10, 16  ;;  %v8476_v19 = vadd.f32 %v12644_v14, %v12835_v42 }
 0x46e   :  { %v8433_v4 = vadd.f32 %v12588_v63, %v12841_v31  ;;  %v8435_v5 = vadd.f32 %v12593_v0, %v12841_v31  ;;  %9912 = vtanh.f32 %v8464_v50  ;;  %v8437_v7 = vadd.f32 %v12598_v48, %v12841_v31 }
 0x46f   :  { %v9907_v1 = vpop.eup %9906  ;;  %v8439_v63 = vadd.f32 %v12607_v26, %v12841_v31  ;;  %v8441_v0 = vadd.f32 %v12618_v39, %v12841_v31  ;;  %v8443_v48 = vadd.f32 %v12629_v43, %v12841_v31  ;;  %v4545_v26 = vsub.s32 4, %v11394_v3 }
 0x470   :  { %v12826_v21 = vmul.f32 %v9907_v1, %v9905_v16  ;;  %v9909_v25 = vpop.eup %9908  ;;  %v8466_v16 = vadd.f32 %v12591_v62, %v12835_v42  ;;  %9914 = vtanh.f32 %v8433_v4  ;;  %v8472_v62 = vadd.f32 %v12616_v37, %v12835_v42 }
 0x471   :  { %v8445_v37 = vadd.f32 %v12646_v28, %v12841_v31  ;;  %v4549_v39 = vsub.s32 5, %v11394_v3  ;;  %v8447_v43 = vadd.f32 %v12657_v41, %v12841_v31  ;;  %v8480_v28 = vadd.f32 %v12675_v55, %v12835_v42 }
 0x472   :  { %13324 = vst [vmem:[#allocation32_spill] sm:$0xff] %v12826_v21  ;;  %9916 = vtanh.f32 %v8466_v16  ;;  %v8449_v46 = vadd.f32 %v12677_v20, %v12841_v31  ;;  %v8482_v41 = vadd.f32 %v12686_v61, %v12835_v42  ;;  %v8451_v55 = vadd.f32 %v12688_v38, %v12841_v31 }
 0x473   :  { %9918 = vtanh.f32 %v8435_v5  ;;  %v12893_v4 = vrot.slane %v12580_v58, %v4549_v39 }
 0x474   :  { %9920 = vtanh.f32 %v8468_v51 }
 0x475   :  { %v9911_v45 = vpop.eup %9910  ;;  %9922 = vtanh.f32 %v8437_v7 }
 0x476   :  { %v12831_v60 = vmul.f32 %v9911_v45, %v9909_v25  ;;  %9924 = vtanh.f32 %v8470_v6  ;;  %v12886_v45 = vrot.slane %v12580_v58, %v4545_v26 }
 0x477   :  { %9926 = vtanh.f32 %v8439_v63 }
 0x478   :  { %13325 = vst [vmem:[#allocation33_spill] sm:$0xff] %v12831_v60  ;;  %9928 = vtanh.f32 %v8472_v62  ;;  %v12873_v10 = vpop.eup %9912  ;;  %v8457_v60 = vadd.f32 %v12734_v18, %v12841_v31 }
 0x479   :  { %9930 = vtanh.f32 %v8441_v0 }
 0x47a   :  { %9932 = vtanh.f32 %v8474_v23  ;;  %v12877_v25 = vpop.eup %9914 }
 0x47b   :  { %9934 = vtanh.f32 %v8443_v48 }
 0x47c   :  { %v12881_v14 = vpop.eup %9916  ;;  %9936 = vtanh.f32 %v8476_v19 }
 0x47d   :  { %v12888_v50 = vpop.eup %9918  ;;  %9938 = vtanh.f32 %v8445_v37  ;;  %v8484_v37 = vadd.f32 %v12709_v15, %v12835_v42  ;;  %v8455_v15 = vadd.f32 %v12721_v8, %v12841_v31 }
 0x47e   :  { %v6825_v1 = vpop.trf.xlu0  ;;  %v12895_v16 = vpop.eup %9920  ;;  %9940 = vtanh.f32 %v8478_v32 }
 0x47f   :  { %6881 = vmatprep.mubr.bf16.mxu1 %v6825_v1  ;;  %v12899_v5 = vpop.eup %9922  ;;  %9942 = vtanh.f32 %v8447_v43  ;;  %v8453_v43 = vadd.f32 %v12711_v24, %v12841_v31 }
 0x480   :  { %v12903_v7 = vpop.eup %9924  ;;  %9944 = vtanh.f32 %v8480_v28 }
 0x481   :  { %v12906_v1 = vpop.eup %9926  ;;  %9946 = vtanh.f32 %v8449_v46 }
 0x482   :  { %v12909_v61 = vpop.eup %9928  ;;  %9948 = vtanh.f32 %v8482_v41  ;;  %v8486_v41 = vadd.f32 %v12719_v29, %v12835_v42 }
 0x483   :  { %v12912_v23 = vpop.eup %9930  ;;  %9950 = vtanh.f32 %v8451_v55 }
 0x484   :  { %v12915_v26 = vpop.eup %9932 }
 0x485   :  { %v12919_v32 = vpop.eup %9934 }
 0x486   :  { %v12923_v46 = vpop.eup %9936 }
 0x487   :  { %v12927_v55 = vpop.eup %9938 }
 0x491   :  { %v6116_v51 = vpop.f32.mrb[96].mxu0 }
 0x492   :  { %v8496_v20 = vadd.f32 %v6116_v51, %v12886_v45  ;;  %v6118_v58 = vpop.f32.mrb[97].mxu0 }
 0x493   :  { %v8497_v6 = vadd.f32 %v6118_v58, %v12893_v4  ;;  %v6120_v63 = vpop.f32.mrb[98].mxu0 }
 0x494   :  { %v8127_v62 = vmul.f32 -1.442695, %v8496_v20  ;;  %v8498_v0 = vadd.f32 %v6120_v63, %v12886_v45  ;;  %v6122_v38 = vpop.f32.mrb[99].mxu0  ;;  %v12931_v20 = vpop.eup %9940 }
 0x495   :  { %v8128_v48 = vmul.f32 -1.442695, %v8497_v6  ;;  %v8499_v19 = vadd.f32 %v6122_v38, %v12893_v4  ;;  %v12934_v6 = vpop.eup %9942 }
 0x496   :  { %9952 = vpow2.f32 %v8127_v62  ;;  %v8130_v39 = vmul.f32 -1.442695, %v8498_v0  ;;  %v12937_v62 = vpop.eup %9944 }
 0x497   :  { %9954 = vpow2.f32 %v8128_v48  ;;  %v8131_v28 = vmul.f32 -1.442695, %v8499_v19  ;;  %v12940_v48 = vpop.eup %9946 }
 0x498   :  { %9956 = vpow2.f32 %v8130_v39  ;;  %v12943_v39 = vpop.eup %9948 }
 0x499   :  { %9958 = vpow2.f32 %v8131_v28  ;;  %v6126_v51 = vpop.f32.mrb[100].mxu0 }
 0x49a   :  { %9960 = vtanh.f32 %v8484_v37  ;;  %v8500_v24 = vadd.f32 %v6126_v51, %v12886_v45  ;;  %v6128_v58 = vpop.f32.mrb[101].mxu0  ;;  %v12947_v51 = vpop.eup %9950 }
 0x49b   :  { %9962 = vtanh.f32 %v8453_v43  ;;  %v8501_v63 = vadd.f32 %v6128_v58, %v12893_v4  ;;  %v6130_v29 = vpop.f32.mrb[102].mxu0  ;;  %v8488_v43 = vadd.f32 %v12732_v30, %v12835_v42 }
 0x49c   :  { %9964 = vtanh.f32 %v8486_v41  ;;  %v8133_v0 = vmul.f32 -1.442695, %v8500_v24  ;;  %v8502_v8 = vadd.f32 %v6130_v29, %v12886_v45  ;;  %v6132_v38 = vpop.f32.mrb[103].mxu0 }
 0x49d   :  { %9966 = vtanh.f32 %v8455_v15  ;;  %v8134_v19 = vmul.f32 -1.442695, %v8501_v63  ;;  %v8503_v37 = vadd.f32 %v6132_v38, %v12893_v4 }
 0x49e   :  { %9968 = vpow2.f32 %v8133_v0  ;;  %v8136_v28 = vmul.f32 -1.442695, %v8502_v8 }
 0x49f   :  { %9970 = vpow2.f32 %v8134_v19  ;;  %v8137_v41 = vmul.f32 -1.442695, %v8503_v37 }
 0x4a0   :  { %v9953_v24 = vpop.eup %9952  ;;  %9972 = vpow2.f32 %v8136_v28 }
 0x4a1   :  { %v9955_v58 = vpop.eup %9954  ;;  %v6388_v29 = vadd.f32 1.0, %v9953_v24  ;;  %9974 = vpow2.f32 %v8137_v41  ;;  %v6136_v15 = vpop.f32.mrb[104].mxu0 }
 0x4a2   :  { %v9957_v63 = vpop.eup %9956  ;;  %9976 = vtanh.f32 %v8488_v43  ;;  %v6389_v38 = vadd.f32 1.0, %v9955_v58  ;;  %v8504_v11 = vadd.f32 %v6136_v15, %v12886_v45  ;;  %v6138_v47 = vpop.f32.mrb[105].mxu0 }
 0x4a3   :  { %v9959_v40 = vpop.eup %9958  ;;  %9978 = vrcp.f32 %v6388_v29  ;;  %v6391_v30 = vadd.f32 1.0, %v9957_v63  ;;  %v8505_v0 = vadd.f32 %v6138_v47, %v12893_v4  ;;  %v6140_v8 = vpop.f32.mrb[106].mxu0 }
 0x4a4   :  { %v12951_v19 = vpop.eup %9960  ;;  %9980 = vrcp.f32 %v6389_v38  ;;  %v6392_v37 = vadd.f32 1.0, %v9959_v40  ;;  %v8139_v28 = vmul.f32 -1.442695, %v8504_v11  ;;  %v8506_v41 = vadd.f32 %v6140_v8, %v12886_v45  ;;  %v6142_v24 = vpop.f32.mrb[107].mxu0 }
 0x4a5   :  { %v12954_v54 = vpop.eup %9962  ;;  %9982 = vrcp.f32 %v6391_v30  ;;  %v8140_v43 = vmul.f32 -1.442695, %v8505_v0  ;;  %v8507_v58 = vadd.f32 %v6142_v24, %v12893_v4 }
 0x4a6   :  { %v12957_v15 = vpop.eup %9964  ;;  %9984 = vrcp.f32 %v6392_v37  ;;  %v8142_v29 = vmul.f32 -1.442695, %v8506_v41 }
 0x4a7   :  { %v12959_v47 = vpop.eup %9966  ;;  %9986 = vpow2.f32 %v8139_v28  ;;  %v8143_v63 = vmul.f32 -1.442695, %v8507_v58 }
 0x4a8   :  { %v9969_v38 = vpop.eup %9968  ;;  %9988 = vpow2.f32 %v8140_v43 }
 0x4a9   :  { %v9971_v40 = vpop.eup %9970  ;;  %v6394_v11 = vadd.f32 1.0, %v9969_v38  ;;  %9990 = vpow2.f32 %v8142_v29  ;;  %v6146_v8 = vpop.f32.mrb[108].mxu0 }
 0x4aa   :  { %v9973_v13 = vpop.eup %9972  ;;  %v6395_v36 = vadd.f32 1.0, %v9971_v40  ;;  %9992 = vpow2.f32 %v8143_v63  ;;  %v8508_v30 = vadd.f32 %v6146_v8, %v12886_v45  ;;  %v6148_v0 = vpop.f32.mrb[109].mxu0 }
 0x4ab   :  { %v9975_v24 = vpop.eup %9974  ;;  %9994 = vrcp.f32 %v6394_v11  ;;  %v6397_v37 = vadd.f32 1.0, %v9973_v13  ;;  %v8509_v41 = vadd.f32 %v6148_v0, %v12893_v4  ;;  %v6150_v3 = vpop.f32.mrb[110].mxu0 }
 0x4ac   :  { %v12963_v28 = vpop.eup %9976  ;;  %9996 = vrcp.f32 %v6395_v36  ;;  %v6398_v43 = vadd.f32 1.0, %v9975_v24  ;;  %v8145_v58 = vmul.f32 -1.442695, %v8508_v30  ;;  %v8510_v29 = vadd.f32 %v6150_v3, %v12886_v45  ;;  %v6152_v38 = vpop.f32.mrb[111].mxu0 }
 0x4ad   :  { %v9979_v21 = vpop.eup %9978  ;;  %9998 = vrcp.f32 %v6397_v37  ;;  %v8146_v63 = vmul.f32 -1.442695, %v8509_v41  ;;  %v8511_v40 = vadd.f32 %v6152_v38, %v12893_v4 }
 0x4ae   :  { %v9981_v8 = vpop.eup %9980  ;;  %10000 = vrcp.f32 %v6398_v43  ;;  %v8148_v11 = vmul.f32 -1.442695, %v8510_v29  ;;  %v6532_v13 = vmul.f32 %v9979_v21, %v12877_v25 }
 0x4af   :  { %v9983_v0 = vpop.eup %9982  ;;  %10002 = vpow2.f32 %v8145_v58  ;;  %v8149_v36 = vmul.f32 -1.442695, %v8511_v40  ;;  %v12971_v30 = vmul.f32 %v9981_v8, %v12873_v10 }
 0x4b0   :  { %v9985_v3 = vpop.eup %9984  ;;  %10004 = vpow2.f32 %v8146_v63  ;;  %v6535_v24 = vmul.f32 %v9983_v0, %v12888_v50 }
 0x4b1   :  { %v9987_v37 = vpop.eup %9986  ;;  %10006 = vpow2.f32 %v8148_v11  ;;  %v6156_v41 = vpop.f32.mrb[112].mxu0  ;;  %v12975_v43 = vmul.f32 %v9985_v3, %v12881_v14 }
 0x4b2   :  { %v9989_v21 = vpop.eup %9988  ;;  %v6400_v25 = vadd.f32 1.0, %v9987_v37  ;;  %10008 = vpow2.f32 %v8149_v36  ;;  %v8512_v18 = vadd.f32 %v6156_v41, %v12886_v45  ;;  %v6158_v58 = vpop.f32.mrb[113].mxu0  ;;  %v6580_v29 = vpack.c.bf16 %v6535_v24, %v6532_v13 }
 0x4b3   :  { %v9991_v38 = vpop.eup %9990  ;;  %10010 = vtanh.f32 %v8457_v60  ;;  %v6401_v10 = vadd.f32 1.0, %v9989_v21  ;;  %v8513_v63 = vadd.f32 %v6158_v58, %v12893_v4  ;;  %v6160_v40 = vpop.f32.mrb[114].mxu0  ;;  %v6581_v50 = vpack.c.bf16 %v12975_v43, %v12971_v30  ;;  %v13342_v30 = vld [vmem:[#allocation12_spill] sm:$0xff]  ;;  %v13343_v43 = vld [vmem:[#allocation15_spill] sm:$0xff] }
 0x4b4   :  { %v9993_v8 = vpop.eup %9992  ;;  %10012 = vrcp.f32 %v6400_v25  ;;  %v6403_v14 = vadd.f32 1.0, %v9991_v38  ;;  %v8151_v11 = vmul.f32 -1.442695, %v8512_v18  ;;  %v8514_v0 = vadd.f32 %v6160_v40, %v12886_v45  ;;  %v6162_v36 = vpop.f32.mrb[115].mxu0  ;;  %6849 = vmatprep.subr.bf16.mxu1 %v6580_v29 }
 0x4b5   :  { %v9995_v3 = vpop.eup %9994  ;;  %10014 = vrcp.f32 %v6401_v10  ;;  %v6404_v13 = vadd.f32 1.0, %v9993_v8  ;;  %v8152_v24 = vmul.f32 -1.442695, %v8513_v63  ;;  %v8515_v60 = vadd.f32 %v6162_v36, %v12893_v4 }
 0x4b6   :  { %v13326_v37 = vpack.c.bf16 %v12684_v9, %v12669_v59  ;;  %v9997_v41 = vpop.eup %9996  ;;  %10016 = vrcp.f32 %v6403_v14  ;;  %v8154_v21 = vmul.f32 -1.442695, %v8514_v0  ;;  %v6538_v25 = vmul.f32 %v9995_v3, %v12899_v5 }
 0x4b7   :  { %v9999_v18 = vpop.eup %9998  ;;  %10018 = vrcp.f32 %v6404_v13  ;;  %v8155_v58 = vmul.f32 -1.442695, %v8515_v60  ;;  %v12988_v29 = vmul.f32 %v9997_v41, %v12895_v16 }
 0x4b8   :  { %6850 = vmatpush1.bf16.xpose.msra.mxu1 %v13326_v37  ;;  %v10001_v38 = vpop.eup %10000  ;;  %10020 = vpow2.f32 %v8151_v11  ;;  %v6541_v10 = vmul.f32 %v9999_v18, %v12906_v1 }
 0x4b9   :  { %v10003_v63 = vpop.eup %10002  ;;  %10022 = vpow2.f32 %v8152_v24  ;;  %v6166_v40 = vpop.f32.mrb[116].mxu0  ;;  %v12992_v59 = vmul.f32 %v10001_v38, %v12903_v7 }
 0x4ba   :  { %v10005_v9 = vpop.eup %10004  ;;  %v6406_v8 = vadd.f32 1.0, %v10003_v63  ;;  %10024 = vpow2.f32 %v8154_v21  ;;  %v8516_v5 = vadd.f32 %v6166_v40, %v12886_v45  ;;  %v6168_v14 = vpop.f32.mrb[117].mxu0  ;;  %v6583_v0 = vpack.c.bf16 %v6541_v10, %v6538_v25 }
 0x4bb   :  { %v10007_v36 = vpop.eup %10006  ;;  %v6407_v16 = vadd.f32 1.0, %v10005_v9  ;;  %10026 = vpow2.f32 %v8155_v58  ;;  %v8517_v11 = vadd.f32 %v6168_v14, %v12893_v4  ;;  %v6170_v3 = vpop.f32.mrb[118].mxu0  ;;  %v6584_v1 = vpack.c.bf16 %v12992_v59, %v12988_v29  ;;  %v13345_v29 = vld [vmem:[#allocation17_spill] sm:$0xff]  ;;  %v13346_v59 = vld [vmem:[#allocation16_spill] sm:$0xff] }
 0x4bc   :  { %v10009_v13 = vpop.eup %10008  ;;  %10028 = vrcp.f32 %v6406_v8  ;;  %v6409_v7 = vadd.f32 1.0, %v10007_v36  ;;  %v8157_v24 = vmul.f32 -1.442695, %v8516_v5  ;;  %v8518_v60 = vadd.f32 %v6170_v3, %v12886_v45  ;;  %v6172_v37 = vpop.f32.mrb[119].mxu0  ;;  %6851 = vmatprep.subr.bf16.mxu1 %v6583_v0 }
 0x4bd   :  { %v12999_v41 = vpop.eup %10010  ;;  %10030 = vrcp.f32 %v6407_v16  ;;  %v6410_v21 = vadd.f32 1.0, %v10009_v13  ;;  %v8158_v25 = vmul.f32 -1.442695, %v8517_v11  ;;  %v8519_v18 = vadd.f32 %v6172_v37, %v12893_v4 }
 0x4be   :  { %v13327_v58 = vpack.c.bf16 %v12717_v12, %v12704_v34  ;;  %v10013_v38 = vpop.eup %10012  ;;  %10032 = vrcp.f32 %v6409_v7  ;;  %v8160_v10 = vmul.f32 -1.442695, %v8518_v60  ;;  %v8490_v5 = vadd.f32 %v12739_v22, %v12835_v42 }
 0x4bf   :  { %v10015_v63 = vpop.eup %10014  ;;  %10034 = vrcp.f32 %v6410_v21  ;;  %v8161_v40 = vmul.f32 -1.442695, %v8519_v18  ;;  %v6544_v9 = vmul.f32 %v10013_v38, %v12912_v23 }
 0x4c0   :  { %6852 = vmatpush1.bf16.xpose.msra.mxu1 %v13327_v58  ;;  %v10017_v8 = vpop.eup %10016  ;;  %10036 = vpow2.f32 %v8157_v24  ;;  %v13009_v14 = vmul.f32 %v10015_v63, %v12909_v61 }
 0x4c1   :  { %v10019_v0 = vpop.eup %10018  ;;  %10038 = vpow2.f32 %v8158_v25  ;;  %v6176_v34 = vpop.f32.mrb[120].mxu0  ;;  %v6547_v12 = vmul.f32 %v10017_v8, %v12919_v32 }
 0x4c2   :  { %v10021_v36 = vpop.eup %10020  ;;  %10040 = vpow2.f32 %v8160_v10  ;;  %v8520_v16 = vadd.f32 %v6176_v34, %v12886_v45  ;;  %v6178_v11 = vpop.f32.mrb[121].mxu0  ;;  %v13014_v23 = vmul.f32 %v10019_v0, %v12915_v26 }
 0x4c3   :  { %v10023_v3 = vpop.eup %10022  ;;  %v6412_v13 = vadd.f32 1.0, %v10021_v36  ;;  %10042 = vpow2.f32 %v8161_v40  ;;  %v8521_v22 = vadd.f32 %v6178_v11, %v12893_v4  ;;  %v6180_v61 = vpop.f32.mrb[122].mxu0  ;;  %v6586_v7 = vpack.c.bf16 %v6547_v12, %v6544_v9 }
 0x4c4   :  { %v10025_v24 = vpop.eup %10024  ;;  %10044 = vtanh.f32 %v8490_v5  ;;  %v6413_v60 = vadd.f32 1.0, %v10023_v3  ;;  %v8522_v32 = vadd.f32 %v6180_v61, %v12886_v45  ;;  %v6182_v37 = vpop.f32.mrb[123].mxu0  ;;  %v6587_v21 = vpack.c.bf16 %v13014_v23, %v13009_v14  ;;  %v13348_v14 = vld [vmem:[#allocation18_spill] sm:$0xff]  ;;  %v13349_v23 = vld [vmem:[#allocation21_spill] sm:$0xff] }
 0x4c5   :  { %v10027_v25 = vpop.eup %10026  ;;  %10046 = vrcp.f32 %v6412_v13  ;;  %v6415_v26 = vadd.f32 1.0, %v10025_v24  ;;  %v8163_v18 = vmul.f32 -1.442695, %v8520_v16  ;;  %v8523_v58 = vadd.f32 %v6182_v37, %v12893_v4  ;;  %6853 = vmatprep.subr.bf16.mxu1 %v6586_v7 }
 0x4c6   :  { %v10029_v38 = vpop.eup %10028  ;;  %10048 = vrcp.f32 %v6413_v60  ;;  %v6416_v10 = vadd.f32 1.0, %v10027_v25  ;;  %v8164_v63 = vmul.f32 -1.442695, %v8521_v22  ;;  %v13328_v40 = vpack.c.bf16 %v12745_v57, %v12730_v53 }
 0x4c7   :  { %v10031_v9 = vpop.eup %10030  ;;  %10050 = vrcp.f32 %v6415_v26  ;;  %v8166_v8 = vmul.f32 -1.442695, %v8522_v32  ;;  %v6550_v5 = vmul.f32 %v10029_v38, %v12927_v55  ;;  %v8167_v34 = vmul.f32 -1.442695, %v8523_v58 }
 0x4c8   :  { %6854 = vmatpush1.bf16.xpose.msra.mxu1 %v13328_v40  ;;  %v10033_v0 = vpop.eup %10032  ;;  %10052 = vrcp.f32 %v6416_v10  ;;  %v13026_v12 = vmul.f32 %v10031_v9, %v12923_v46  ;;  %v13329_v10 = vpack.c.bf16 %v12769_v49, %v12760_v27 }
 0x4c9   :  { %v10035_v36 = vpop.eup %10034  ;;  %10054 = vpow2.f32 %v8163_v18  ;;  %v6186_v16 = vpop.f32.mrb[124].mxu0  ;;  %v6553_v11 = vmul.f32 %v10033_v0, %v12934_v6  ;;  %v8459_v0 = vadd.f32 %v12741_v56, %v12841_v31  ;;  %v6651_v56 = vld [vmem:[%s13275_s8] sm:$0x7] }
 0x4ca   :  { %v10037_v3 = vpop.eup %10036  ;;  %10056 = vpow2.f32 %v8164_v63  ;;  %v8524_v57 = vadd.f32 %v6186_v16, %v12886_v45  ;;  %v6188_v53 = vpop.f32.mrb[125].mxu0  ;;  %v13031_v13 = vmul.f32 %v10035_v36, %v12931_v20 }
 0x4cb   :  { %v10039_v55 = vpop.eup %10038  ;;  %v6418_v22 = vadd.f32 1.0, %v10037_v3  ;;  %10058 = vpow2.f32 %v8166_v8  ;;  %v8525_v61 = vadd.f32 %v6188_v53, %v12893_v4  ;;  %v6190_v46 = vpop.f32.mrb[126].mxu0  ;;  %v6589_v7 = vpack.c.bf16 %v6553_v11, %v6550_v5 }
 0x4cc   :  { %v10041_v24 = vpop.eup %10040  ;;  %v6419_v60 = vadd.f32 1.0, %v10039_v55  ;;  %10060 = vpow2.f32 %v8167_v34  ;;  %v8526_v6 = vadd.f32 %v6190_v46, %v12886_v45  ;;  %v6192_v32 = vpop.f32.mrb[127].mxu0  ;;  %v8169_v26 = vmul.f32 -1.442695, %v8524_v57  ;;  %v13330_v55 = vld [vmem:[#allocation28_spill] sm:$0xff] }
 0x4cd   :  { %v10043_v37 = vpop.eup %10042  ;;  %10062 = vrcp.f32 %v6418_v22  ;;  %v6421_v25 = vadd.f32 1.0, %v10041_v24  ;;  %v8527_v20 = vadd.f32 %v6192_v32, %v12893_v4  ;;  %6855 = vmatprep.subr.bf16.mxu1 %v6589_v7  ;;  %v8170_v38 = vmul.f32 -1.442695, %v8525_v61  ;;  %v13331_v7 = vld [vmem:[#allocation29_spill] sm:$0xff] }
 0x4ce   :  { %v13036_v18 = vpop.eup %10044  ;;  %10064 = vrcp.f32 %v6419_v60  ;;  %v6422_v58 = vadd.f32 1.0, %v10043_v37  ;;  %v6590_v45 = vpack.c.bf16 %v13031_v13, %v13026_v12  ;;  %v8172_v40 = vmul.f32 -1.442695, %v8526_v6  ;;  %v13333_v37 = vld [vmem:[#allocation30_spill] sm:$0xff]  ;;  %v13351_v12 = vld [vmem:[#allocation23_spill] sm:$0xff] }
 0x4cf   :  { %v10047_v63 = vpop.eup %10046  ;;  %10066 = vrcp.f32 %v6421_v25  ;;  %v8173_v8 = vmul.f32 -1.442695, %v8527_v20  ;;  %v8492_v22 = vadd.f32 %v13330_v55, %v12835_v42  ;;  %v8461_v24 = vadd.f32 %v13331_v7, %v12841_v31  ;;  %v13352_v13 = vld [vmem:[#allocation22_spill] sm:$0xff] }
 0x4d0   :  { %6856 = vmatpush1.bf16.xpose.msra.mxu1 %v13329_v10  ;;  %v10049_v9 = vpop.eup %10048  ;;  %10068 = vrcp.f32 %v6422_v58  ;;  %v6556_v4 = vmul.f32 %v10047_v63, %v12940_v48  ;;  %v13332_v6 = vpack.c.bf16 %v12781_v17, %v12776_v2  ;;  %v8494_v25 = vadd.f32 %v13333_v37, %v12835_v42  ;;  %v13334_v58 = vld [vmem:[#allocation31_spill] sm:$0xff] }
 0x4d1   :  { %v10051_v5 = vpop.eup %10050  ;;  %10070 = vpow2.f32 %v8169_v26  ;;  %v13047_v34 = vmul.f32 %v10049_v9, %v12937_v62 }
 0x4d2   :  { %v10053_v27 = vpop.eup %10052  ;;  %10072 = vpow2.f32 %v8170_v38  ;;  %v6559_v49 = vmul.f32 %v10051_v5, %v12947_v51  ;;  %v10159_v51 = vmov 0   ;;  %v8463_v38 = vadd.f32 %v13334_v58, %v12841_v31 }
 0x4d3   :  { %v10055_v36 = vpop.eup %10054  ;;  %10074 = vpow2.f32 %v8172_v40  ;;  %v13051_v16 = vmul.f32 %v10053_v27, %v12943_v39  ;;  %8892 = vset.pattern.permute.xlu1 %v10159_v51  ;;  %8893 = vset.pattern.permute.xlu0 %v10159_v51  ;;  %v13335_v27 = vpack.c.bf16 %v12800_v44, %v12793_v33  ;;  %v13340_v58 = vmov 0.0  }
 0x4d4   :  { %v10057_v11 = vpop.eup %10056  ;;  %v6424_v3 = vadd.f32 1.0, %v10055_v36  ;;  %10076 = vpow2.f32 %v8173_v8  ;;  %v6592_v48 = vpack.c.bf16 %v6559_v49, %v6556_v4  ;;  %6654 = vperm.xlu1 %8892, %v6651_v56   ;;  %7053 = vmatprep.mubr.bf16.mxu0 %v10159_v51  ;;  %50 = vst.msk [vmem:[#allocation3] sm:$0x7] %vm48_vm3, %v13340_v58 }
 0x4d5   :  { %v10059_v57 = vpop.eup %10058  ;;  %10078 = vtanh.f32 %v8459_v0  ;;  %v6425_v62 = vadd.f32 1.0, %v10057_v11  ;;  %v6593_v53 = vpack.c.bf16 %v13051_v16, %v13047_v34  ;;  %v13354_v34 = vld [vmem:[#allocation24_spill] sm:$0xff]  ;;  %v13355_v16 = vld [vmem:[#allocation27_spill] sm:$0xff] }
 0x4d6   :  { %v10061_v39 = vpop.eup %10060  ;;  %10080 = vrcp.f32 %v6424_v3  ;;  %v6427_v61 = vadd.f32 1.0, %v10059_v57  ;;  %6857 = vmatprep.subr.bf16.mxu1 %v6592_v48 }
 0x4d7   :  { %v10063_v46 = vpop.eup %10062  ;;  %10082 = vrcp.f32 %v6425_v62  ;;  %v6428_v60 = vadd.f32 1.0, %v10061_v39 }
 0x4d8   :  { %6858 = vmatpush1.bf16.xpose.msra.mxu1 %v13332_v6  ;;  %v10065_v32 = vpop.eup %10064  ;;  %10084 = vrcp.f32 %v6427_v61  ;;  %v6562_v26 = vmul.f32 %v10063_v46, %v12954_v54  ;;  %v13336_v46 = vpack.c.bf16 %v12817_v35, %v12812_v52  ;;  %v13341_v52 = vld [vmem:[#allocation13_spill] sm:$0xff]  ;;  %v6841_v35 = vpop.trf.xlu0 }
 0x4d9   :  { %v10067_v20 = vpop.eup %10066  ;;  %10086 = vrcp.f32 %v6428_v60  ;;  %v13074_v10 = vmul.f32 %v10065_v32, %v12951_v19 }
 0x4da   :  { %v10069_v63 = vpop.eup %10068  ;;  %10088 = vtanh.f32 %v8492_v22  ;;  %v6565_v2 = vmul.f32 %v10067_v20, %v12959_v47 }
 0x4db   :  { %v10071_v17 = vpop.eup %10070  ;;  %10090 = vtanh.f32 %v8461_v24  ;;  %v6566_v40 = vmul.f32 %v10069_v63, %v12957_v15 }
 0x4dc   :  { %v10073_v42 = vpop.eup %10072  ;;  %10092 = vtanh.f32 %v8494_v25  ;;  %v6430_v9 = vadd.f32 1.0, %v10071_v17  ;;  %v6595_v54 = vpack.c.bf16 %v6565_v2, %v6562_v26  ;;  %v13337_v25 = vld [vmem:[#allocation33_spill] sm:$0xff]  ;;  %v13338_v26 = vld [vmem:[#allocation32_spill] sm:$0xff] }
 0x4dd   :  { %v10075_v8 = vpop.eup %10074  ;;  %10094 = vtanh.f32 %v8463_v38  ;;  %v6431_v4 = vadd.f32 1.0, %v10073_v42  ;;  %v6596_v31 = vpack.c.bf16 %v6566_v40, %v13074_v10  ;;  %v13339_v20 = vpack.c.bf16 %v13337_v25, %v13338_v26  ;;  %v6809_v38 = vpop.trf.xlu1  ;;  %v9803_v25 = vld [vmem:[%s13276_s9 + $0xa0] sm:$0xff]   ;;  %v9804_v26 = vld [vmem:[%s13276_s9 + $0x68] sm:$0xff]  }
 0x4de   :  { %v10077_v5 = vpop.eup %10076  ;;  %10096 = vrcp.f32 %v6430_v9  ;;  %v6433_v19 = vadd.f32 1.0, %v10075_v8  ;;  %6859 = vmatprep.subr.bf16.mxu1 %v6595_v54 }
 0x4df   :  { %v10079_v0 = vpop.eup %10078  ;;  %10098 = vrcp.f32 %v6431_v4  ;;  %v6434_v47 = vadd.f32 1.0, %v10077_v5  ;;  %v10161_v4 = vmov -inf  }
 0x4e0   :  { %6860 = vmatpush1.bf16.xpose.msra.mxu1 %v13335_v27  ;;  %v10081_v15 = vpop.eup %10080  ;;  %10100 = vrcp.f32 %v6433_v19  ;;  %49 = vst.msk [vmem:[#allocation2] sm:$0x7] %vm48_vm3, %v10161_v4 }
 0x4e1   :  { %v10083_v49 = vpop.eup %10082  ;;  %10102 = vrcp.f32 %v6434_v47  ;;  %v6568_v36 = vmul.f32 %v10081_v15, %v12999_v41 }
 0x4e2   :  { %v10085_v11 = vpop.eup %10084  ;;  %v6569_v3 = vmul.f32 %v10083_v49, %v12963_v28 }
 0x4e3   :  { %v10087_v48 = vpop.eup %10086  ;;  %v6571_v56 = vmul.f32 %v10085_v11, %v10079_v0 }
 0x4e4   :  { %v10089_v57 = vpop.eup %10088  ;;  %v6572_v62 = vmul.f32 %v10087_v48, %v13036_v18 }
 0x4e5   :  { %v10091_v39 = vpop.eup %10090  ;;  %v6598_v55 = vpack.c.bf16 %v6571_v56, %v6568_v36  ;;  %v9784_v56 = vld [vmem:[%s13276_s9 + $0x40] sm:$0xff]  }
 0x4e6   :  { %v10093_v22 = vpop.eup %10092  ;;  %v6599_v61 = vpack.c.bf16 %v6572_v62, %v6569_v3  ;;  %v9786_v62 = vld [vmem:[%s13276_s9] sm:$0xff]  }
 0x4e7   :  { %v10095_v33 = vpop.eup %10094  ;;  %6861 = vmatprep.subr.bf16.mxu1 %v6598_v55  ;;  %v9788_v55 = vld [vmem:[%s13276_s9 + $0x48] sm:$0xff]  }
 0x4e8   :  { %v10097_v44 = vpop.eup %10096  ;;  %6862 = vmatpush1.bf16.xpose.msra.mxu1 %v13336_v46  ;;  %v9793_v46 = vld [vmem:[%s13276_s9 + $0xd0] sm:$0xff]  }
 0x4e9   :  { %v10099_v41 = vpop.eup %10098  ;;  %v6574_v7 = vmul.f32 %v10097_v44, %v10091_v39  ;;  %v9787_v39 = vld [vmem:[%s13276_s9 + $0x80] sm:$0xff]   ;;  %v9792_v44 = vld [vmem:[%s13276_s9 + $0x50] sm:$0xff]  }
 0x4ea   :  { %v10101_v24 = vpop.eup %10100  ;;  %v6575_v28 = vmul.f32 %v10099_v41, %v10089_v57  ;;  %v9785_v57 = vld [vmem:[%s13276_s9 + $0xc0] sm:$0xff]   ;;  %v9794_v41 = vld [vmem:[%s13276_s9 + $0x10] sm:$0xff]  }
 0x4eb   :  { %v10103_v60 = vpop.eup %10102  ;;  %v6577_v6 = vmul.f32 %v10101_v24, %v10095_v33  ;;  %8262 = vmatprep.subr.bf16.mxu0 %v9785_v57  ;;  %v9791_v33 = vld [vmem:[%s13276_s9 + $0x88] sm:$0xff]   ;;  %v9796_v24 = vld [vmem:[%s13276_s9 + $0x58] sm:$0xff]  }
 0x4ec   :  { %v6578_v32 = vmul.f32 %v10103_v60, %v10093_v22  ;;  %v9789_v22 = vld [vmem:[%s13276_s9 + $0xc8] sm:$0xff]   ;;  %v9798_v60 = vld [vmem:[%s13276_s9 + $0x18] sm:$0xff]  }
 0x4ed   :  { %v6601_v37 = vpack.c.bf16 %v6577_v6, %v6574_v7  ;;  %v9795_v7 = vld [vmem:[%s13276_s9 + $0x90] sm:$0xff]   ;;  %v9799_v6 = vld [vmem:[%s13276_s9 + $0x98] sm:$0xff]  }
 0x4ee   :  { %v6602_v18 = vpack.c.bf16 %v6578_v32, %v6575_v28  ;;  %v9797_v28 = vld [vmem:[%s13276_s9 + $0xd8] sm:$0xff]   ;;  %v9800_v32 = vld [vmem:[%s13276_s9 + $0x60] sm:$0xff]  }
 0x4ef   :  { %6863 = vmatprep.subr.bf16.mxu1 %v6601_v37  ;;  %v9801_v37 = vld [vmem:[%s13276_s9 + $0xe0] sm:$0xff]  }
 0x4f0   :  { %6864 = vmatpush1.bf16.xpose.msra.mxu1 %v13339_v20  ;;  %v9805_v20 = vld [vmem:[%s13276_s9 + $0xe8] sm:$0xff]  }
 0x4f1   :  { %8284 = vmatprep.subr.bf16.mxu1 %v13340_v58 }
 0x4f7   :  { %6882 = vmatmul.mubr.bf16.vlgmr.msra.gmra.mrb[96].mxu1 %v6809_v38  ;;  %v9807_v38 = vld [vmem:[%s13276_s9 + $0xa8] sm:$0xff]  }
 0x4f8   :  { %8285 = vmatpush3.bf16.xpose.msra.mxu1 %v6581_v50  ;;  %8300 = vmatprep.mubr.msk.bf16.mxu1 %vm10160_vm0, %v13340_v58  ;;  %v13344_v50 = vld [vmem:[#allocation14_spill] sm:$0xff] }
 0x4f9   :  { %8286 = vmatprep.subr.bf16.mxu1 %v13340_v58 }
 0x500   :  { %8287 = vmatpush3.bf16.xpose.msra.mxu1 %v6584_v1  ;;  %v13347_v1 = vld [vmem:[#allocation19_spill] sm:$0xff] }
 0x501   :  { %8288 = vmatprep.subr.bf16.mxu1 %v13340_v58 }
 0x508   :  { %8289 = vmatpush3.bf16.xpose.msra.mxu1 %v6587_v21  ;;  %v13350_v21 = vld [vmem:[#allocation20_spill] sm:$0xff] }
 0x509   :  { %8290 = vmatprep.subr.bf16.mxu1 %v13340_v58 }
 0x510   :  { %8291 = vmatpush3.bf16.xpose.msra.mxu1 %v6590_v45  ;;  %v13353_v45 = vld [vmem:[#allocation25_spill] sm:$0xff] }
 0x511   :  { %8292 = vmatprep.subr.bf16.mxu1 %v13340_v58 }
 0x518   :  { %8293 = vmatpush3.bf16.xpose.msra.mxu1 %v6593_v53  ;;  %v13356_v53 = vld [vmem:[#allocation26_spill] sm:$0xff] }
 0x519   :  { %8294 = vmatprep.subr.bf16.mxu1 %v13340_v58 }
 0x520   :  { %8295 = vmatpush3.bf16.xpose.msra.mxu1 %v6596_v31  ;;  %v6941_v31 = vld [vmem:[#allocation2] sm:$0x7] }
 0x521   :  { %8296 = vmatprep.subr.bf16.mxu1 %v13340_v58 }
 0x528   :  { %8297 = vmatpush3.bf16.xpose.msra.mxu1 %v6599_v61  ;;  %v9790_v61 = vld [vmem:[%s13276_s9 + $0x8] sm:$0xff]  }
 0x529   :  { %8298 = vmatprep.subr.bf16.mxu1 %v13340_v58  ;;  %v9806_v58 = vld [vmem:[%s13276_s9 + $0x28] sm:$0xff]  }
 0x530   :  { %8299 = vmatpush3.bf16.xpose.msra.mxu1 %v6602_v18  ;;  %v9802_v18 = vld [vmem:[%s13276_s9 + $0x20] sm:$0xff]  }
 0x531   :  { %6980 = vmatprep.subr.bf16.mxu1 %v13341_v52  ;;  %v6954_v52 = vld [vmem:[#allocation3] sm:$0x7] }
 0x537   :  { %8301 = vmatmul.mubr.bf16.vlgmr.msra.gmra.mrb[96].mxu1 %v6841_v35 }
 0x538   :  { %6981 = vmatpush1.bf16.msra.mxu1 %v13342_v30  ;;  %7012 = vmatprep.mubr.bf16.mxu1 %v10159_v51  ;;  %v13357_v51 = vlaneseq }
 0x539   :  { %6982 = vmatprep.subr.bf16.mxu1 %v13343_v43 }
 0x53a   :  { %v6931_v10 = vand.u32 127, %v13357_v51 }
 0x53c   :  { %6983 = vmatpush1.bf16.msra.mxu1 %v13344_v50  ;;  %vm6935_vm1 = vcmp.lt.s32.totalorder %v6931_v10, 8 }
 0x53d   :  { %6984 = vmatprep.subr.bf16.mxu1 %v13345_v29 }
 0x540   :  { %6985 = vmatpush1.bf16.msra.mxu1 %v13346_v59  ;;  %v9808_v59 = vld [vmem:[%s13276_s9 + $0x70] sm:$0xff]  }
 0x541   :  { %6986 = vmatprep.subr.bf16.mxu1 %v13347_v1  ;;  %v9809_v1 = vld [vmem:[%s13276_s9 + $0xf0] sm:$0xff]  }
 0x544   :  { %6987 = vmatpush1.bf16.msra.mxu1 %v13348_v14  ;;  %v9810_v14 = vld [vmem:[%s13276_s9 + $0x30] sm:$0xff]  }
 0x545   :  { %6988 = vmatprep.subr.bf16.mxu1 %v13349_v23  ;;  %v9811_v23 = vld [vmem:[%s13276_s9 + $0xb0] sm:$0xff]  }
 0x548   :  { %6989 = vmatpush1.bf16.msra.mxu1 %v13350_v21  ;;  %v9812_v21 = vld [vmem:[%s13276_s9 + $0x78] sm:$0xff]  }
 0x549   :  { %6990 = vmatprep.subr.bf16.mxu1 %v13351_v12  ;;  %v9813_v12 = vld [vmem:[%s13276_s9 + $0xf8] sm:$0xff]  }
 0x54c   :  { %6991 = vmatpush1.bf16.msra.mxu1 %v13352_v13  ;;  %v9814_v13 = vld [vmem:[%s13276_s9 + $0x38] sm:$0xff]  }
 0x54d   :  { %6992 = vmatprep.subr.bf16.mxu1 %v13353_v45  ;;  %v9815_v45 = vld [vmem:[%s13276_s9 + $0xb8] sm:$0xff]   ;;  %s10163_s9 = smov [#allocation5]  }
 0x54e   :  { %s7460_s4 = sshll.u32 %s10163_s9, 4  ;;  %s7461_s4 = int_to_ptr.vmem [resolvable:$true] %s7460_s4 }
 0x54f   :  { %s10110_s16 = scalar_lea.vmem %s7461_s4, 64  ;;  %p10115_p1 = scmp.lt.s32.totalorder %s7461_s4, %s7461_s4 }
 0x550   :  { %6993 = vmatpush1.bf16.msra.mxu1 %v13354_v34  ;;  %v6962_v34 = vld [vmem:[#allocation4] sm:$0x77]  ;;  %p10111_p0 = scmp.ne.s32.totalorder %s7461_s4, %s10110_s16  ;;  %p10116_p2 = scmp.lt.s32.totalorder %s10110_s16, %s10110_s16 }
 0x551   :  { %6994 = vmatprep.subr.bf16.mxu1 %v13355_v16  ;;  %v6963_v16 = vld [vmem:[#allocation4 + $0x8] sm:$0x77]  ;;  %v6971_v51 = vcombine.high %v6962_v34, %v6962_v34 }
 0x552   :  { %v6972_v10 = vcombine.high %v6963_v16, %v6963_v16  ;;  %p10117_p3 = por %p10116_p2, %p10115_p1 }
 0x553   :  { %v6655_v63 = vpop.permute.xlu1 %6654 }
 0x554   :  { %6995 = vmatpush1.bf16.msra.mxu1 %v13356_v53  ;;  %p10118_p4 = pnand %p10117_p3, %p10111_p0 }
 0x555   :  { %8240 = vmatprep.subr.bf16.mxu1 %v9784_v56  ;;  %v13358_v56 = vld [vmem:[#allocation11_spill] sm:$0xff] }
 0x60a   :  { %v6923_v2 = vpop.f32.mrb[96].mxu1 }
 0x60b   :  { %v8528_v17 = vadd.f32 %v6923_v2, %v6655_v63  ;;  %v8302_v40 = vpop.f32.mrb[97].mxu1 }
 0x60c   :  { %v6926_v42 = vpop.f32.mrb[98].mxu1 }
 0x60d   :  { %6929 = vst [vmem:[#allocation5] sm:$0x7] %v8528_v17  ;;  %v8303_v9 = vpop.f32.mrb[99].mxu1  ;;  %v6936_v54 = vsel %vm6935_vm1, %v8528_v17, -inf }
 0x60e   :  { %v6938_v8 = vsel %vm6937_vm2, %v6936_v54, -inf }
 0x60f   :  { %6939 = vmax.xlane.f32.xlu1 %v6938_v8 }
 0x69c   :  { %v6940_v5 = vpop.xlane.xlu1 %6939 }
 0x69d   :  { %v6942_v19 = vmax.f32 %v6941_v31, %v6940_v5 }
 0x69f   :  { %v6943_v0 = vsub.f32 %v6941_v31, %v6942_v19  ;;  %7076 = vst.msk [vmem:[#allocation2] sm:$0x7] %vm48_vm3, %v6942_v19  ;;  %6948 = vperm.xlu0 %8893, %v6942_v19  }
 0x6a1   :  { %v6944_v47 = vmul.f32 1.442695, %v6943_v0 }
 0x6a3   :  { %10104 = vpow2.f32 %v6944_v47 }
 0x6ad   :  { %v10105_v27 = vpop.eup %10104 }
 0x6ae   :  { %6966 = vperm.xlu0 %8893, %v10105_v27   ;;  %v6955_v35 = vmul.f32 %v10105_v27, %v6954_v52 }
 0x71e   :  { %v6949_v15 = vpop.permute.xlu0 %6948 }
 0x71f   :  { %v6951_v49 = vsub.f32 %v6936_v54, %v6949_v15 }
 0x721   :  { %v6952_v36 = vmul.f32 1.442695, %v6951_v49 }
 0x723   :  { %10106 = vpow2.f32 %v6952_v36 }
 0x72d   :  { %v10107_v11 = vpop.eup %10106  ;;  %v6967_v53 = vpop.permute.xlu0 %6966 }
 0x72e   :  { %v6956_v3 = vsel %vm6937_vm2, %v10107_v11, 0.0  ;;  %v6979_v48 = vpack.c.bf16 %v10107_v11, %v10107_v11  ;;  %v6975_v63 = vmul.f32 %v6967_v53, %v6962_v34  ;;  %v6977_v2 = vmul.f32 %v6967_v53, %v6963_v16 }
 0x72f   :  { %6957 = vadd.xlane.f32.xlu1 %v6956_v3  ;;  %v6976_v42 = vmul.f32 %v6971_v51, %v6967_v53  ;;  %v6978_v9 = vmul.f32 %v6972_v10, %v6967_v53  ;;  %v10162_v11 = vmov 839922192  }
 0x730   :  { %7013 = vmatmul.mubr.bf16.vlgmr.msra.gmra.mrb[100].mxu1 %v6979_v48  ;;  %7054 = vmatmul.mubr.bf16.vlgmr.msra.gmra.mrb[128].mxu0 %v6979_v48  ;;  %v7089_v3 = vunpack.c.l.s4 %v10162_v11 }
 0x731   :  { %8241 = vmatpush3.bf16.msra.mxu1 %v9786_v62  ;;  %8263 = vmatpush3.bf16.msra.mxu0 %v9787_v39 }
 0x732   :  { %8242 = vmatprep.subr.bf16.mxu1 %v9788_v55  ;;  %8264 = vmatprep.subr.bf16.mxu0 %v9789_v22  ;;  %v7090_v48 = vunpack.c.0.s8 %v7089_v3 }
 0x734   :  { %v7093_v57 = vsub.s32 %v7090_v48, %v13358_v56 }
 0x735   :  { %8243 = vmatpush3.bf16.msra.mxu1 %v9790_v61  ;;  %8265 = vmatpush3.bf16.msra.mxu0 %v9791_v33 }
 0x736   :  { %8244 = vmatprep.subr.bf16.mxu1 %v9792_v44  ;;  %8266 = vmatprep.subr.bf16.mxu0 %v9793_v46 }
 0x739   :  { %8245 = vmatpush3.bf16.msra.mxu1 %v9794_v41  ;;  %8267 = vmatpush3.bf16.msra.mxu0 %v9795_v7 }
 0x73a   :  { %8246 = vmatprep.subr.bf16.mxu1 %v9796_v24  ;;  %8268 = vmatprep.subr.bf16.mxu0 %v9797_v28 }
 0x73d   :  { %8247 = vmatpush3.bf16.msra.mxu1 %v9798_v60  ;;  %8269 = vmatpush3.bf16.msra.mxu0 %v9799_v6 }
 0x73e   :  { %8248 = vmatprep.subr.bf16.mxu1 %v9800_v32  ;;  %8270 = vmatprep.subr.bf16.mxu0 %v9801_v37 }
 0x741   :  { %8249 = vmatpush3.bf16.msra.mxu1 %v9802_v18  ;;  %8271 = vmatpush3.bf16.msra.mxu0 %v9803_v25 }
 0x742   :  { %8250 = vmatprep.subr.bf16.mxu1 %v9804_v26  ;;  %8272 = vmatprep.subr.bf16.mxu0 %v9805_v20 }
 0x745   :  { %8251 = vmatpush3.bf16.msra.mxu1 %v9806_v58  ;;  %8273 = vmatpush3.bf16.msra.mxu0 %v9807_v38 }
 0x746   :  { %8252 = vmatprep.subr.bf16.mxu1 %v9808_v59  ;;  %8274 = vmatprep.subr.bf16.mxu0 %v9809_v1 }
 0x749   :  { %8253 = vmatpush3.bf16.msra.mxu1 %v9810_v14  ;;  %8275 = vmatpush3.bf16.msra.mxu0 %v9811_v23 }
 0x74a   :  { %8254 = vmatprep.subr.bf16.mxu1 %v9812_v21  ;;  %8276 = vmatprep.subr.bf16.mxu0 %v9813_v12 }
 0x74d   :  { %8255 = vmatpush3.bf16.msra.mxu1 %v9814_v13  ;;  %8277 = vmatpush3.bf16.msra.mxu0 %v9815_v45 }
 0x7bc   :  { %v6958_v30 = vpop.xlane.xlu1 %6957 }
 0x7bd   :  { %v6959_v43 = vadd.f32 %v6958_v30, %v6955_v35 }
 0x7bf   :  { %6961 = vst.msk [vmem:[#allocation3] sm:$0x7] %vm48_vm3, %v6959_v43 }
 0x7c6   :  { %v7080_v50 = vld [vmem:[#allocation3] sm:$0x7] }
 0x7c7   :  { %10108 = vrcp.f32 %v7080_v50 }
 0x7d1   :  { %v10109_v29 = vpop.eup %10108 }
 0x7d2   :  { %7086 = vperm.xlu1 %8892, %v10109_v29  }
 0x803   :  { %v7014_v17 = vpop.f32.mrb[100].mxu1  ;;  %v7055_v40 = vpop.f32.mrb[128].mxu0 }
 0x804   :  { %v7062_v54 = vadd.f32 %v7014_v17, %v6975_v63  ;;  %v7064_v8 = vadd.f32 %v7055_v40, %v6977_v2  ;;  %v7016_v4 = vpop.f32.mrb[101].mxu1  ;;  %v7057_v31 = vpop.f32.mrb[129].mxu0 }
 0x805   :  { %v7063_v5 = vadd.f32 %v7016_v4, %v6976_v42  ;;  %v7065_v19 = vadd.f32 %v7057_v31, %v6978_v9  ;;  %v7018_v0 = vpop.f32.mrb[102].mxu1  ;;  %v7059_v47 = vpop.f32.mrb[130].mxu0 }
 0x806   :  { %v7019_v27 = vpop.f32.mrb[103].mxu1  ;;  %v7060_v15 = vpop.f32.mrb[131].mxu0 }
 0x807   :  { %v7070_v49 = vcombine.low %v7062_v54, %v7063_v5  ;;  %v7071_v36 = vcombine.low %v7064_v8, %v7065_v19 }
 0x809   :  { %7074 = vst [vmem:[#allocation4] sm:$0x77] %v7070_v49  ;;  %7075 = vst [vmem:[#allocation4 + $0x8] sm:$0x77] %v7071_v36 }
 0x810   :  { %v7082_v55 = vld [vmem:[#allocation4] sm:$0x77]  ;;  %v7083_v22 = vld [vmem:[#allocation4 + $0x8] sm:$0x77] }
 0x851   :  { %v7087_v62 = vpop.permute.xlu1 %7086 }
 0x852   :  { %v7094_v39 = vrot.slane %v7087_v62, %v7093_v57 }
 0x854   :  { %v7096_v61 = vmul.f32 %v7094_v39, %v7082_v55  ;;  %v7097_v33 = vmul.f32 %v7094_v39, %v7083_v22 }
 0x856   :  { %7098 = vst [vmem:[#allocation7] sm:$0x77] %v7096_v61  ;;  %7099 = vst [vmem:[#allocation7 + $0x8] sm:$0x77] %v7097_v33  ;;  %v7102_v44 = vcombine.high %v7096_v61, %v7096_v61  ;;  %v7103_v46 = vcombine.high %v7097_v33, %v7097_v33  ;;  %v7106_v24 = vpack.c.bf16 %v7096_v61, %v7096_v61 }
 0x857   :  { %v7108_v28 = vpack.c.bf16 %v7097_v33, %v7097_v33 }
 0x858   :  { %v7107_v41 = vpack.c.bf16 %v7102_v44, %v7102_v44  ;;  %v7109_v7 = vpack.c.bf16 %v7103_v46, %v7103_v46 }
 0x85a   :  { %7405 = vmatprep.mubr.bf16.mxu1 %v7107_v41  ;;  %7445 = vmatprep.mubr.bf16.mxu0 %v7109_v7 }
 0x85b   :  { %7406 = vmatmul.mubr.bf16.vlgmr.msra.gmra.mrb[104].mxu1 %v7106_v24  ;;  %7446 = vmatmul.mubr.bf16.vlgmr.msra.gmra.mrb[132].mxu0 %v7108_v28 }
 0x85c   :  { %10121 = shalt.err (!%p10118_p4)
}
 0x85d   :  { %s10122_s19 = scalar_lea.hbm %s13278_s11, 64 }
 0x85e   :  { %p10123_p5 = scmp.ne.s32.totalorder %s13278_s11, %s10122_s19  ;;  %p10126_p6 = scmp.lt.u32.totalorder %s10122_s19, %s13278_s11 }
 0x860   :  { %p10128_p7 = pnand %p10126_p6, %p10123_p5 }
 0x862   :  { %10131 = shalt.err (!%p10128_p7)
}
 0x863   :  { %7463 = dma.vmem_to_hbm [thread:$0]  %s7461_s4, 64, %s13278_s11, [#allocation6]  }
 0x864   :  { %s10132_s23 = scalar_lea.vmem %s7471_s1, 256  ;;  %p10137_p9 = scmp.lt.s32.totalorder %s7471_s1, %s7471_s1 }
 0x865   :  { %p10133_p8 = scmp.ne.s32.totalorder %s7471_s1, %s10132_s23  ;;  %p10138_p10 = scmp.lt.s32.totalorder %s10132_s23, %s10132_s23 }
 0x867   :  { %p10139_p11 = por %p10138_p10, %p10137_p9 }
 0x869   :  { %p10140_p12 = pnand %p10139_p11, %p10133_p8 }
 0x86b   :  { %10143 = shalt.err (!%p10140_p12)
}
 0x86c   :  { %s10144_s25 = scalar_lea.hbm %s13279_s12, 256 }
 0x86d   :  { %p10145_p13 = scmp.ne.s32.totalorder %s13279_s12, %s10144_s25  ;;  %p10148_p0 = scmp.lt.u32.totalorder %s10144_s25, %s13279_s12 }
 0x86f   :  { %p10150_p1 = pnand %p10148_p0, %p10145_p13 }
 0x871   :  { %10153 = shalt.err (!%p10150_p1)
}
 0x872   :  { %7473 = dma.vmem_to_hbm [thread:$0]  %s7471_s1, 256, %s13279_s12, [#allocation8]   ;;  %v8198_v32 = vld [vmem:[%s13277_s10] ss:$0 sm:$0xff] }
 0x92e   :  { %v8256_v60 = vpop.f32.mrb[104].mxu1  ;;  %v8278_v6 = vpop.f32.mrb[132].mxu0 }
 0x92f   :  { %v8257_v37 = vpop.f32.mrb[105].mxu1  ;;  %v8279_v18 = vpop.f32.mrb[133].mxu0 }
 0x930   :  { %v8258_v25 = vadd.f32 %v8257_v37, %v8256_v60  ;;  %v8280_v26 = vadd.f32 %v8279_v18, %v8278_v6  ;;  %v8259_v20 = vpop.f32.mrb[106].mxu1  ;;  %v8281_v58 = vpop.f32.mrb[134].mxu0 }
 0x931   :  { %v8260_v38 = vpop.f32.mrb[107].mxu1  ;;  %v8282_v52 = vpop.f32.mrb[135].mxu0 }
 0x932   :  { %v7408_v35 = vadd.f32 %v8258_v25, %v8198_v32 }
 0x934   :  { %v7448_v30 = vadd.f32 %v8280_v26, %v7408_v35 }
 0x936   :  { %7453 = vst [vmem:[%s13280_s13] sm:$0x7] %v7448_v30 }
 0x937   :  { %10154 = dma.done.wait [#allocation6], 64  }
 0x938   :  { %10155 = vsyncadd [#allocation6], 4294967232 }
 0x939   :  { %10156 = dma.done.wait [#allocation8], 256  }
 0x93a   :  { %10157 = vsyncadd [#allocation8], 4294967040 }
 0x93b   :  { %7484 = vsyncpa [#allocation6], 1 }
 0x93c   :  { %7485 = vsyncpa [#allocation8], 1 }

</bundles_post_ra>
